<compile_context>
chip_gen: v7x
topology: tpu7x:2x2x1
jax: 0.10.0
libtpu: 0.0.40
codegen_flags: <defaults>
</compile_context>

<pallas_src>
import functools

import jax
import jax.numpy as jnp
from jax import lax
from jax.experimental import pallas as pl
from jax.experimental.pallas import tpu as pltpu


# ----------------------------- small helpers --------------------------------
def _compiler_params(dimension_semantics, vmem_limit_bytes=None):
    if vmem_limit_bytes is None:
        return pltpu.CompilerParams(dimension_semantics=dimension_semantics)
    return pltpu.CompilerParams(dimension_semantics=dimension_semantics,
                                vmem_limit_bytes=vmem_limit_bytes)


def _gate_step(gates, c, hidden_dim, full_vreg_gates):
    """One LSTM cell update from pre-activations `gates` (B, 4H), f32."""
    H = hidden_dim
    if full_vreg_gates:
        # 4H fits a single 128-lane vreg: 2 EUP pushes on the critical path,
        # slice the i/f/g/o lane ranges from the two results.
        sg = jax.nn.sigmoid(gates)
        tg = jnp.tanh(gates)
        i_g = sg[:, 0 * H:1 * H]
        f_g = sg[:, 1 * H:2 * H]
        g_g = tg[:, 2 * H:3 * H]
        o_g = sg[:, 3 * H:4 * H]
    else:
        # PyTorch gate order: i, f, g, o.
        i_g = jax.nn.sigmoid(gates[:, 0 * H:1 * H])
        f_g = jax.nn.sigmoid(gates[:, 1 * H:2 * H])
        g_g = jnp.tanh(gates[:, 2 * H:3 * H])
        o_g = jax.nn.sigmoid(gates[:, 3 * H:4 * H])
    c_new = f_g * c + i_g * g_g
    h_new = o_g * jnp.tanh(c_new)
    return h_new, c_new


# --------------- fused embedding + input-projection kernel -------------------
# P[v, :] = table[v, :] @ W_ih^T + (b_ih + b_hh)   (bf16 MXU operands, f32 acc)
def _proj_kernel(table_ref, wih_ref, bias_ref, p_ref):
    t = table_ref[...].astype(jnp.bfloat16)                  # (v_block, E)
    w = wih_ref[...].astype(jnp.bfloat16)                    # (4H, E), original layout
    p_ref[...] = lax.dot_general(
        t, w, (((1,), (1,)), ((), ())),                      # contract on E
        preferred_element_type=jnp.float32) + bias_ref[...]


def fused_input_projection(table, w_ih, bias_row):
    """table (V,E) f32, w_ih (4H,E) f32, bias_row (1,4H) f32 -> P (V,4H) f32."""
    V, E = table.shape
    G = w_ih.shape[0]

    v_block = V
    for cand in (2048, 1024, 512, 256, 128, 64, 32, 16, 8):
        if V % cand == 0:
            v_block = cand
            break

    return pl.pallas_call(
        _proj_kernel,
        out_shape=jax.ShapeDtypeStruct((V, G), jnp.float32),
        grid_spec=pltpu.PrefetchScalarGridSpec(
            num_scalar_prefetch=0,
            grid=(V // v_block,),
            in_specs=[
                pl.BlockSpec((v_block, E), lambda v: (v, 0)),
                pl.BlockSpec((G, E), lambda v: (0, 0)),      # resident
                pl.BlockSpec((1, G), lambda v: (0, 0)),      # resident
            ],
            out_specs=pl.BlockSpec((v_block, G), lambda v: (v, 0)),
        ),
        compiler_params=_compiler_params(("parallel",)),
    )(table, w_ih, bias_row)


# ----------------- LSTM recurrence, small-vocab (P-resident) path ------------
def _lstm_gather_kernel(ids_ref, p_ref, whh_ref, out_ref, hN_ref, cN_ref,
                        h_scr, c_scr, *, hidden_dim, t_block, b_block,
                        full_vreg_gates):
    bb = pl.program_id(0)                    # batch block ("parallel")
    tb = pl.program_id(1)                    # time block  ("arbitrary", sequential)

    @pl.when(tb == 0)
    def _():
        h_scr[...] = jnp.zeros_like(h_scr)
        c_scr[...] = jnp.zeros_like(c_scr)

    H = hidden_dim
    whh = whh_ref[...]                       # (4H, H) bf16, VMEM-resident
    h = h_scr[...]                           # (b_block, H) f32 carry
    c = c_scr[...]
    b0 = bb * b_block
    t0 = tb * t_block

    # Statically unrolled time block (t_block capped at 32 so live ranges stay
    # bounded; use lax.fori_loop(unroll=True) instead for larger blocks).
    for j in range(t_block):
        # In-kernel gather of the fused input pre-activation rows from the
        # VMEM-resident P table; token ids come from SMEM (scalar prefetch),
        # so there is no (B, S, 4H) HBM intermediate.
        rows = [p_ref[pl.ds(ids_ref[b0 + b, t0 + j], 1), :]
                for b in range(b_block)]
        xg = rows[0] if b_block == 1 else jnp.concatenate(rows, axis=0)
        # Recurrent projection: bf16 operands, f32 accumulation, 1 MXU pass.
        gates = xg + lax.dot_general(
            h.astype(jnp.bfloat16), whh, (((1,), (1,)), ((), ())),
            preferred_element_type=jnp.float32)
        h, c = _gate_step(gates, c, H, full_vreg_gates)
        out_ref[:, j, :] = h                 # batch-first output, no transpose

    h_scr[...] = h
    c_scr[...] = c

    @pl.when(tb == pl.num_programs(1) - 1)
    def _():
        hN_ref[...] = h[None, :, :]
        cN_ref[...] = c[None, :, :]


def lstm_recurrence_gather(ids, p, w_hh_bf16, *, hidden_dim, t_block, b_block):
    B, S = ids.shape
    V, G = p.shape
    H = hidden_dim
    n_b = B // b_block
    n_t = S // t_block

    kernel = functools.partial(
        _lstm_gather_kernel, hidden_dim=H, t_block=t_block, b_block=b_block,
        full_vreg_gates=(G <= 128))

    # VMEM residency estimate (P + bf16 W_hh + double-buffered output blocks
    # + carries); only raise the scoped limit if actually needed.
    resident = (2 * V * G * 4 + 2 * G * H * 2
                + 2 * b_block * t_block * H * 4 + 6 * b_block * H * 4)
    vmem_limit = None if resident < (24 << 20) else min(2 * resident, 100 << 20)

    outputs, h_n, c_n = pl.pallas_call(
        kernel,
        out_shape=(
            jax.ShapeDtypeStruct((B, S, H), jnp.float32),
            jax.ShapeDtypeStruct((n_b, b_block, H), jnp.float32),
            jax.ShapeDtypeStruct((n_b, b_block, H), jnp.float32),
        ),
        grid_spec=pltpu.PrefetchScalarGridSpec(
            num_scalar_prefetch=1,                      # token ids -> SMEM
            grid=(n_b, n_t),
            in_specs=[
                # P resident across the whole grid (constant block index).
                pl.BlockSpec((V, G), lambda bb, tb, ids_s: (0, 0)),
                # W_hh resident, original (4H, H) layout, bf16.
                pl.BlockSpec((G, H), lambda bb, tb, ids_s: (0, 0)),
            ],
            out_specs=(
                pl.BlockSpec((b_block, t_block, H),
                             lambda bb, tb, ids_s: (bb, tb, 0)),
                pl.BlockSpec((1, b_block, H), lambda bb, tb, ids_s: (bb, 0, 0)),
                pl.BlockSpec((1, b_block, H), lambda bb, tb, ids_s: (bb, 0, 0)),
            ),
            scratch_shapes=[
                pltpu.VMEM((b_block, H), jnp.float32),   # h carry
                pltpu.VMEM((b_block, H), jnp.float32),   # c carry
            ],
        ),
        compiler_params=_compiler_params(("parallel", "arbitrary"), vmem_limit),
    )(ids, p, w_hh_bf16)

    return outputs, h_n.reshape(B, H), c_n.reshape(B, H)


# ----------- LSTM recurrence, large-vocab (in-kernel projection) path --------
def _lstm_embed_kernel(emb_ref, wih_ref, bias_ref, whh_ref,
                       out_ref, hN_ref, cN_ref, h_scr, c_scr,
                       *, hidden_dim, t_block, b_block, full_vreg_gates):
    tb = pl.program_id(1)

    @pl.when(tb == 0)
    def _():
        h_scr[...] = jnp.zeros_like(h_scr)
        c_scr[...] = jnp.zeros_like(c_scr)

    H = hidden_dim
    emb = emb_ref[...]                                   # (b_block, t_block, E) bf16
    E = emb.shape[-1]
    # Input projection for the whole time block in one MXU call (bf16 x bf16,
    # f32 accumulation), bias folded in here.
    xg = lax.dot_general(
        emb.reshape(b_block * t_block, E), wih_ref[...],
        (((1,), (1,)), ((), ())), preferred_element_type=jnp.float32)
    xg = xg.reshape(b_block, t_block, 4 * H) + bias_ref[...]

    whh = whh_ref[...]                                   # (4H, H) bf16
    h = h_scr[...]
    c = c_scr[...]
    for j in range(t_block):
        gates = xg[:, j, :] + lax.dot_general(
            h.astype(jnp.bfloat16), whh, (((1,), (1,)), ((), ())),
            preferred_element_type=jnp.float32)
        h, c = _gate_step(gates, c, H, full_vreg_gates)
        out_ref[:, j, :] = h

    h_scr[...] = h
    c_scr[...] = c

    @pl.when(tb == pl.num_programs(1) - 1)
    def _():
        hN_ref[...] = h[None, :, :]
        cN_ref[...] = c[None, :, :]


def lstm_recurrence_embed(emb_bf16, w_ih_bf16, bias_row, w_hh_bf16,
                          *, hidden_dim, t_block, b_block):
    B, S, E = emb_bf16.shape
    H = hidden_dim
    G = 4 * H
    n_b = B // b_block
    n_t = S // t_block

    kernel = functools.partial(
        _lstm_embed_kernel, hidden_dim=H, t_block=t_block, b_block=b_block,
        full_vreg_gates=(G <= 128))

    resident = (2 * b_block * t_block * E * 2 + 2 * G * E * 2 + 2 * G * 4
                + 2 * G * H * 2 + 2 * b_block * t_block * H * 4
                + 6 * b_block * H * 4)
    vmem_limit = None if resident < (24 << 20) else min(2 * resident, 100 << 20)

    outputs, h_n, c_n = pl.pallas_call(
        kernel,
        out_shape=(
            jax.ShapeDtypeStruct((B, S, H), jnp.float32),
            jax.ShapeDtypeStruct((n_b, b_block, H), jnp.float32),
            jax.ShapeDtypeStruct((n_b, b_block, H), jnp.float32),
        ),
        grid_spec=pltpu.PrefetchScalarGridSpec(
            num_scalar_prefetch=0,
            grid=(n_b, n_t),
            in_specs=[
                pl.BlockSpec((b_block, t_block, E), lambda bb, tb: (bb, tb, 0)),
                pl.BlockSpec((G, E), lambda bb, tb: (0, 0)),   # resident
                pl.BlockSpec((1, G), lambda bb, tb: (0, 0)),   # resident
                pl.BlockSpec((G, H), lambda bb, tb: (0, 0)),   # resident
            ],
            out_specs=(
                pl.BlockSpec((b_block, t_block, H), lambda bb, tb: (bb, tb, 0)),
                pl.BlockSpec((1, b_block, H), lambda bb, tb: (bb, 0, 0)),
                pl.BlockSpec((1, b_block, H), lambda bb, tb: (bb, 0, 0)),
            ),
            scratch_shapes=[
                pltpu.VMEM((b_block, H), jnp.float32),
                pltpu.VMEM((b_block, H), jnp.float32),
            ],
        ),
        compiler_params=_compiler_params(("parallel", "arbitrary"), vmem_limit),
    )(emb_bf16, w_ih_bf16, bias_row, w_hh_bf16)

    return outputs, h_n.reshape(B, H), c_n.reshape(B, H)


# ------------------------------ Encoder forward ------------------------------
def encoder_forward(x, params, *, t_block=None, batch_blocks=None,
                    force_embed_path=False):
    """x: (B, S) int token ids.  Returns (outputs, hidden, cell) like PyTorch:
    outputs (B, S, H), hidden (1, B, H), cell (1, B, H)."""
    table = params["embedding"].astype(jnp.float32)          # (V, E)
    w_ih = params["w_ih"].astype(jnp.float32)                # (4H, E)
    w_hh = params["w_hh"].astype(jnp.float32)                # (4H, H)
    bias = (params["b_ih"] + params["b_hh"]).reshape(1, -1).astype(jnp.float32)

    V, E = table.shape
    G, H = w_hh.shape
    B, S = x.shape
    ids = x.astype(jnp.int32)

    # Time blocking: amortise the ~0.35us fixed grid-step cost.  Capped at 32
    # because the in-kernel time loop is statically unrolled.
    if t_block is None:
        t_block = S
        if S > 32:
            t_block = 1
            for cand in (32, 16, 8, 4, 2):
                if S % cand == 0:
                    t_block = cand
                    break
    assert S % t_block == 0

    # Batch blocking: leading "parallel" grid axis (v7x megacore).  Only
    # engaged by default for larger batches; splitting a tiny batch on a
    # single-TC chip just serialises the recurrence.
    if batch_blocks is None:
        batch_blocks = 2 if (B >= 8 and B % 2 == 0) else 1
    assert B % batch_blocks == 0
    b_block = B // batch_blocks

    w_hh_bf16 = w_hh.astype(jnp.bfloat16)

    # Small vocab: P = table @ W_ih^T + bias once, VMEM-resident, gather rows
    # in-kernel.  Large vocab: gather (B,S,E) embeddings in bf16 and project
    # inside the recurrence kernel (no O(V) work, no (B,S,4H) intermediate).
    use_p_path = (not force_embed_path
                  and V * G * 4 <= (8 << 20)            # P (+ its 2nd buffer) fits VMEM
                  and V <= max(4096, 4 * B * S))        # full-V projection not wasteful

    if use_p_path:
        p = fused_input_projection(table, w_ih, bias)               # (V, 4H) f32
        outputs, h_n, c_n = lstm_recurrence_gather(
            ids, p, w_hh_bf16, hidden_dim=H, t_block=t_block, b_block=b_block)
    else:
        emb = jnp.take(table, ids, axis=0).astype(jnp.bfloat16)     # (B, S, E)
        outputs, h_n, c_n = lstm_recurrence_embed(
            emb, w_ih.astype(jnp.bfloat16), bias, w_hh_bf16,
            hidden_dim=H, t_block=t_block, b_block=b_block)

    return outputs, h_n[None, :, :], c_n[None, :, :]


# ----------------------------- pure-JAX reference ----------------------------
def encoder_reference(x, params):
    table = params["embedding"]
    emb = jnp.take(table, x, axis=0)                     # (B, S, E)
    w_ih, w_hh = params["w_ih"], params["w_hh"]
    b = params["b_ih"] + params["b_hh"]
    B = x.shape[0]
    H = w_hh.shape[1]

    def step(carry, x_t):
        h, c = carry
        gates = (jnp.dot(x_t, w_ih.T, precision=lax.Precision.HIGHEST)
                 + jnp.dot(h, w_hh.T, precision=lax.Precision.HIGHEST) + b)
        i_g, f_g, g_g, o_g = jnp.split(gates, 4, axis=-1)
        i_g = jax.nn.sigmoid(i_g)
        f_g = jax.nn.sigmoid(f_g)
        g_g = jnp.tanh(g_g)
        o_g = jax.nn.sigmoid(o_g)
        c_new = f_g * c + i_g * g_g
        h_new = o_g * jnp.tanh(c_new)
        return (h_new, c_new), h_new

    h0 = jnp.zeros((B, H), jnp.float32)
    c0 = jnp.zeros((B, H), jnp.float32)
    (h_n, c_n), outs = lax.scan(step, (h0, c0), jnp.transpose(emb, (1, 0, 2)))
    return jnp.transpose(outs, (1, 0, 2)), h_n[None], c_n[None]


# ----------------------------------- main ------------------------------------
if __name__ == "__main__":
    vocab_size, embed_dim, hidden_dim = 32, 16, 32
    batch, seq = 2, 32                                  # seq=32 -> t_block=32, single time block

    key = jax.random.PRNGKey(0)
    k_emb, k_wih, k_whh, k_bih, k_bhh, k_x = jax.random.split(key, 6)

    params = {
        "embedding": jax.random.normal(k_emb, (vocab_size, embed_dim), jnp.float32) * 0.1,
        "w_ih": jax.random.normal(k_wih, (4 * hidden_dim, embed_dim), jnp.float32) * 0.1,
        "w_hh": jax.random.normal(k_whh, (4 * hidden_dim, hidden_dim), jnp.float32) * 0.1,
        "b_ih": jax.random.normal(k_bih, (4 * hidden_dim,), jnp.float32) * 0.1,
        "b_hh": jax.random.normal(k_bhh, (4 * hidden_dim,), jnp.float32) * 0.1,
    }
    x = jax.random.randint(k_x, (batch, seq), 0, vocab_size, dtype=jnp.int32)

    ref_out, ref_h, ref_c = encoder_reference(x, params)

    def check(out, h, c, tag):
        assert out.shape == (batch, seq, hidden_dim), tag
        assert h.shape == (1, batch, hidden_dim), tag
        assert c.shape == (1, batch, hidden_dim), tag
        # bf16 MXU operands (f32 accumulation, f32 h/c carries) vs an f32
        # HIGHEST reference -> loosened tolerance, per review guidance.
        assert jnp.allclose(out, ref_out, atol=1e-2, rtol=1e-2), tag
        assert jnp.allclose(h, ref_h, atol=1e-2, rtol=1e-2), tag
        assert jnp.allclose(c, ref_c, atol=1e-2, rtol=1e-2), tag

    # 1) Default path: VMEM-resident P + in-kernel token gather.
    out, h, c = jax.block_until_ready(jax.jit(encoder_forward)(x, params))
    check(out, h, c, "p_path")

    # 2) Same path with the batch axis split across grid blocks ("parallel",
    #    v7x megacore layout) to verify the per-block carry logic.
    out, h, c = jax.block_until_ready(
        jax.jit(functools.partial(encoder_forward, batch_blocks=2))(x, params))
    check(out, h, c, "p_path_batch_split")

    # 3) Large-vocab fallback: embeddings gathered, input projection in-kernel.
    out, h, c = jax.block_until_ready(
        jax.jit(functools.partial(encoder_forward, force_embed_path=True))(x, params))
    check(out, h, c, "embed_path")

    print("KERNEL_OK")
</pallas_src>

<mosaic_0001>
module attributes {stable_mosaic.version = 11 : i64} {
  func.func @_proj_kernel(%arg0: i32, %arg1: memref<32x16xf32, #tpu.memory_space<vmem>>, %arg2: memref<128x16xf32, #tpu.memory_space<vmem>>, %arg3: memref<1x128xf32, #tpu.memory_space<vmem>>, %arg4: memref<32x128xf32, #tpu.memory_space<vmem>>) attributes {dimension_semantics = [#tpu.dimension_semantics<parallel>], iteration_bounds = array<i64: 1>, scalar_prefetch = 0 : i64, scratch_operands = 0 : i64, tpu.core_type = #tpu.core_type<tc>, window_params = [{transform_indices = @transform_0, window_bounds = array<i64: 32, 16>}, {pipeline_mode = #tpu.pipeline_mode<synchronous>, transform_indices = @transform_1, window_bounds = array<i64: 128, 16>}, {pipeline_mode = #tpu.pipeline_mode<synchronous>, transform_indices = @transform_2, window_bounds = array<i64: 1, 128>}, {transform_indices = @transform_3, window_bounds = array<i64: 32, 128>}]} {
    %c0 = arith.constant 0 : index
    %c0_0 = arith.constant 0 : index
    %0 = vector.load %arg1[%c0, %c0_0] : memref<32x16xf32, #tpu.memory_space<vmem>>, vector<32x16xf32>
    %1 = arith.truncf %0 : vector<32x16xf32> to vector<32x16xbf16>
    %c0_1 = arith.constant 0 : index
    %c0_2 = arith.constant 0 : index
    %2 = vector.load %arg2[%c0_1, %c0_2] : memref<128x16xf32, #tpu.memory_space<vmem>>, vector<128x16xf32>
    %3 = arith.truncf %2 : vector<128x16xf32> to vector<128x16xbf16>
    %cst = arith.constant dense<0.000000e+00> : vector<32x128xf32>
    %4 = tpu.matmul %1, %3, %cst {dimension_numbers = #tpu.dot_dimension_numbers<[1], [1], [0], [0], [0, 0, 1, 0], [], []>} : vector<32x16xbf16>, vector<128x16xbf16>, vector<32x128xf32> -> vector<32x128xf32>
    %c0_3 = arith.constant 0 : index
    %c0_4 = arith.constant 0 : index
    %5 = vector.load %arg3[%c0_3, %c0_4] : memref<1x128xf32, #tpu.memory_space<vmem>>, vector<1x128xf32>
    %6 = vector.broadcast %5 : vector<1x128xf32> to vector<32x128xf32>
    %7 = arith.addf %4, %6 : vector<32x128xf32>
    %c0_5 = arith.constant 0 : index
    %c0_6 = arith.constant 0 : index
    %8 = vector.load %arg4[%c0_5, %c0_6] : memref<32x128xf32, #tpu.memory_space<vmem>>, vector<32x128xf32>
    tpu.vector_store %arg4[%c0_5, %c0_6], %7 {strides = array<i32>} : memref<32x128xf32, #tpu.memory_space<vmem>>, vector<32x128xf32>,
    return
  }
  func.func @transform_0(%arg0: i32) -> (i32, i32) {
    %c0_i32 = arith.constant 0 : i32
    %c0_i32_0 = arith.constant 0 : i32
    return %arg0, %c0_i32 : i32, i32
  }
  func.func @transform_1(%arg0: i32) -> (i32, i32) {
    %c0_i32 = arith.constant 0 : i32
    %c0_i32_0 = arith.constant 0 : i32
    %c0_i32_1 = arith.constant 0 : i32
    return %c0_i32, %c0_i32_0 : i32, i32
  }
  func.func @transform_2(%arg0: i32) -> (i32, i32) {
    %c0_i32 = arith.constant 0 : i32
    %c0_i32_0 = arith.constant 0 : i32
    %c0_i32_1 = arith.constant 0 : i32
    return %c0_i32, %c0_i32_0 : i32, i32
  }
  func.func @transform_3(%arg0: i32) -> (i32, i32) {
    %c0_i32 = arith.constant 0 : i32
    %c0_i32_0 = arith.constant 0 : i32
    return %arg0, %c0_i32 : i32, i32
  }
}

module attributes {stable_mosaic.version = 11 : i64} {
  func.func @_lstm_gather_kernel(%arg0: i32, %arg1: i32, %arg2: memref<2x32xi32, #tpu.memory_space<smem>>, %arg3: memref<32x128xf32, #tpu.memory_space<vmem>>, %arg4: memref<128x32xbf16, #tpu.memory_space<vmem>>, %arg5: memref<2x32x32xf32, #tpu.memory_space<vmem>>, %arg6: memref<1x2x32xf32, #tpu.memory_space<vmem>>, %arg7: memref<1x2x32xf32, #tpu.memory_space<vmem>>, %arg8: memref<2x32xf32, #tpu.memory_space<vmem>>, %arg9: memref<2x32xf32, #tpu.memory_space<vmem>>) attributes {dimension_semantics = [#tpu.dimension_semantics<parallel>, #tpu.dimension_semantics<arbitrary>], iteration_bounds = array<i64: 1, 1>, scalar_prefetch = 1 : i64, scratch_operands = 2 : i64, tpu.core_type = #tpu.core_type<tc>, window_params = [{pipeline_mode = #tpu.pipeline_mode<synchronous>, transform_indices = @transform_0, window_bounds = array<i64: 32, 128>}, {pipeline_mode = #tpu.pipeline_mode<synchronous>, transform_indices = @transform_1, window_bounds = array<i64: 128, 32>}, {transform_indices = @transform_2, window_bounds = array<i64: 2, 32, 32>}, {transform_indices = @transform_3, window_bounds = array<i64: 1, 2, 32>}, {transform_indices = @transform_4, window_bounds = array<i64: 1, 2, 32>}]} {
    %c0_i32 = arith.constant 0 : i32
    %0 = arith.cmpi eq, %arg1, %c0_i32 : i32
    %1 = arith.extui %0 : i1 to i32
    %c0_i32_0 = arith.constant 0 : i32
    %2 = arith.cmpi ne, %1, %c0_i32_0 : i32
    scf.if %2 {
      %cst_302 = arith.constant 0.000000e+00 : f32
      %1165 = vector.broadcast %cst_302 : f32 to vector<2x32xf32>
      %c0_303 = arith.constant 0 : index
      %c0_304 = arith.constant 0 : index
      %1166 = vector.load %arg8[%c0_303, %c0_304] : memref<2x32xf32, #tpu.memory_space<vmem>>, vector<2x32xf32>
      tpu.vector_store %arg8[%c0_303, %c0_304], %1165 {strides = array<i32>} : memref<2x32xf32, #tpu.memory_space<vmem>>, vector<2x32xf32>,
      %cst_305 = arith.constant 0.000000e+00 : f32
      %1167 = vector.broadcast %cst_305 : f32 to vector<2x32xf32>
      %c0_306 = arith.constant 0 : index
      %c0_307 = arith.constant 0 : index
      %1168 = vector.load %arg9[%c0_306, %c0_307] : memref<2x32xf32, #tpu.memory_space<vmem>>, vector<2x32xf32>
      tpu.vector_store %arg9[%c0_306, %c0_307], %1167 {strides = array<i32>} : memref<2x32xf32, #tpu.memory_space<vmem>>, vector<2x32xf32>,
    } else {
    }
    %c0 = arith.constant 0 : index
    %c0_1 = arith.constant 0 : index
    %3 = vector.load %arg4[%c0, %c0_1] : memref<128x32xbf16, #tpu.memory_space<vmem>>, vector<128x32xbf16>
    %c0_2 = arith.constant 0 : index
    %c0_3 = arith.constant 0 : index
    %4 = vector.load %arg8[%c0_2, %c0_3] : memref<2x32xf32, #tpu.memory_space<vmem>>, vector<2x32xf32>
    %c0_4 = arith.constant 0 : index
    %c0_5 = arith.constant 0 : index
    %5 = vector.load %arg9[%c0_4, %c0_5] : memref<2x32xf32, #tpu.memory_space<vmem>>, vector<2x32xf32>
    %c2_i32 = arith.constant 2 : i32
    %6 = arith.muli %arg0, %c2_i32 : i32
    %c32_i32 = arith.constant 32 : i32
    %7 = arith.muli %arg1, %c32_i32 : i32
    %c0_i32_6 = arith.constant 0 : i32
    %8 = arith.addi %6, %c0_i32_6 : i32
    %c0_i32_7 = arith.constant 0 : i32
    %9 = arith.addi %7, %c0_i32_7 : i32
    %10 = arith.index_cast %8 : i32 to index
    %11 = arith.index_cast %9 : i32 to index
    %12 = memref.load %arg2[%10, %11] : memref<2x32xi32, #tpu.memory_space<smem>>
    %13 = arith.index_cast %12 : i32 to index
    %c0_8 = arith.constant 0 : index
    %14 = vector.load %arg3[%13, %c0_8] : memref<32x128xf32, #tpu.memory_space<vmem>>, vector<1x128xf32>
    %c1_i32 = arith.constant 1 : i32
    %15 = arith.addi %6, %c1_i32 : i32
    %c0_i32_9 = arith.constant 0 : i32
    %16 = arith.addi %7, %c0_i32_9 : i32
    %17 = arith.index_cast %15 : i32 to index
    %18 = arith.index_cast %16 : i32 to index
    %19 = memref.load %arg2[%17, %18] : memref<2x32xi32, #tpu.memory_space<smem>>
    %20 = arith.index_cast %19 : i32 to index
    %c0_10 = arith.constant 0 : index
    %21 = vector.load %arg3[%20, %c0_10] : memref<32x128xf32, #tpu.memory_space<vmem>>, vector<1x128xf32>
    %22 = tpu.concatenate %14, %21 in 0 : vector<1x128xf32>, vector<1x128xf32> -> vector<2x128xf32>
    %23 = arith.truncf %4 : vector<2x32xf32> to vector<2x32xbf16>
    %cst = arith.constant dense<0.000000e+00> : vector<2x128xf32>
    %24 = tpu.matmul %23, %3, %cst {dimension_numbers = #tpu.dot_dimension_numbers<[1], [1], [0], [0], [0, 0, 1, 0], [], []>} : vector<2x32xbf16>, vector<128x32xbf16>, vector<2x128xf32> -> vector<2x128xf32>
    %25 = arith.addf %22, %24 : vector<2x128xf32>
    %26 = arith.negf %25 : vector<2x128xf32>
    %27 = math.exp %26 : vector<2x128xf32>
    %cst_11 = arith.constant 1.000000e+00 : f32
    %28 = vector.broadcast %cst_11 : f32 to vector<2x128xf32>
    %29 = arith.addf %28, %27 : vector<2x128xf32>
    %30 = arith.divf %28, %29 : vector<2x128xf32>
    %31 = math.tanh %25 : vector<2x128xf32>
    %32 = vector.extract_strided_slice %30 {offsets = [0, 0], sizes = [2, 32], strides = [1, 1]} : vector<2x128xf32> to vector<2x32xf32>
    %33 = vector.extract_strided_slice %30 {offsets = [0, 32], sizes = [2, 32], strides = [1, 1]} : vector<2x128xf32> to vector<2x32xf32>
    %34 = vector.extract_strided_slice %31 {offsets = [0, 64], sizes = [2, 32], strides = [1, 1]} : vector<2x128xf32> to vector<2x32xf32>
    %35 = vector.extract_strided_slice %30 {offsets = [0, 96], sizes = [2, 32], strides = [1, 1]} : vector<2x128xf32> to vector<2x32xf32>
    %36 = arith.mulf %33, %5 : vector<2x32xf32>
    %37 = arith.mulf %32, %34 : vector<2x32xf32>
    %38 = arith.addf %36, %37 : vector<2x32xf32>
    %39 = math.tanh %38 : vector<2x32xf32>
    %40 = arith.mulf %35, %39 : vector<2x32xf32>
    %c0_12 = arith.constant 0 : index
    %c0_13 = arith.constant 0 : index
    %c0_14 = arith.constant 0 : index
    %41 = vector.load %arg5[%c0_12, %c0_13, %c0_14] : memref<2x32x32xf32, #tpu.memory_space<vmem>>, vector<2x1x32xf32>
    %42 = vector.shape_cast %41 : vector<2x1x32xf32> to vector<2x32xf32>
    %43 = vector.shape_cast %40 : vector<2x32xf32> to vector<2x1x32xf32>
    tpu.vector_store %arg5[%c0_12, %c0_13, %c0_14], %43 {strides = array<i32>} : memref<2x32x32xf32, #tpu.memory_space<vmem>>, vector<2x1x32xf32>,
    %c0_i32_15 = arith.constant 0 : i32
    %44 = arith.addi %6, %c0_i32_15 : i32
    %c1_i32_16 = arith.constant 1 : i32
    %45 = arith.addi %7, %c1_i32_16 : i32
    %46 = arith.index_cast %44 : i32 to index
    %47 = arith.index_cast %45 : i32 to index
    %48 = memref.load %arg2[%46, %47] : memref<2x32xi32, #tpu.memory_space<smem>>
    %49 = arith.index_cast %48 : i32 to index
    %c0_17 = arith.constant 0 : index
    %50 = vector.load %arg3[%49, %c0_17] : memref<32x128xf32, #tpu.memory_space<vmem>>, vector<1x128xf32>
    %c1_i32_18 = arith.constant 1 : i32
    %51 = arith.addi %6, %c1_i32_18 : i32
    %c1_i32_19 = arith.constant 1 : i32
    %52 = arith.addi %7, %c1_i32_19 : i32
    %53 = arith.index_cast %51 : i32 to index
    %54 = arith.index_cast %52 : i32 to index
    %55 = memref.load %arg2[%53, %54] : memref<2x32xi32, #tpu.memory_space<smem>>
    %56 = arith.index_cast %55 : i32 to index
    %c0_20 = arith.constant 0 : index
    %57 = vector.load %arg3[%56, %c0_20] : memref<32x128xf32, #tpu.memory_space<vmem>>, vector<1x128xf32>
    %58 = tpu.concatenate %50, %57 in 0 : vector<1x128xf32>, vector<1x128xf32> -> vector<2x128xf32>
    %59 = arith.truncf %40 : vector<2x32xf32> to vector<2x32xbf16>
    %cst_21 = arith.constant dense<0.000000e+00> : vector<2x128xf32>
    %60 = tpu.matmul %59, %3, %cst_21 {dimension_numbers = #tpu.dot_dimension_numbers<[1], [1], [0], [0], [0, 0, 1, 0], [], []>} : vector<2x32xbf16>, vector<128x32xbf16>, vector<2x128xf32> -> vector<2x128xf32>
    %61 = arith.addf %58, %60 : vector<2x128xf32>
    %62 = arith.negf %61 : vector<2x128xf32>
    %63 = math.exp %62 : vector<2x128xf32>
    %cst_22 = arith.constant 1.000000e+00 : f32
    %64 = vector.broadcast %cst_22 : f32 to vector<2x128xf32>
    %65 = arith.addf %64, %63 : vector<2x128xf32>
    %66 = arith.divf %64, %65 : vector<2x128xf32>
    %67 = math.tanh %61 : vector<2x128xf32>
    %68 = vector.extract_strided_slice %66 {offsets = [0, 0], sizes = [2, 32], strides = [1, 1]} : vector<2x128xf32> to vector<2x32xf32>
    %69 = vector.extract_strided_slice %66 {offsets = [0, 32], sizes = [2, 32], strides = [1, 1]} : vector<2x128xf32> to vector<2x32xf32>
    %70 = vector.extract_strided_slice %67 {offsets = [0, 64], sizes = [2, 32], strides = [1, 1]} : vector<2x128xf32> to vector<2x32xf32>
    %71 = vector.extract_strided_slice %66 {offsets = [0, 96], sizes = [2, 32], strides = [1, 1]} : vector<2x128xf32> to vector<2x32xf32>
    %72 = arith.mulf %69, %38 : vector<2x32xf32>
    %73 = arith.mulf %68, %70 : vector<2x32xf32>
    %74 = arith.addf %72, %73 : vector<2x32xf32>
    %75 = math.tanh %74 : vector<2x32xf32>
    %76 = arith.mulf %71, %75 : vector<2x32xf32>
    %c0_23 = arith.constant 0 : index
    %c1 = arith.constant 1 : index
    %c0_24 = arith.constant 0 : index
    %77 = vector.load %arg5[%c0_23, %c1, %c0_24] : memref<2x32x32xf32, #tpu.memory_space<vmem>>, vector<2x1x32xf32>
    %78 = vector.shape_cast %77 : vector<2x1x32xf32> to vector<2x32xf32>
    %79 = vector.shape_cast %76 : vector<2x32xf32> to vector<2x1x32xf32>
    tpu.vector_store %arg5[%c0_23, %c1, %c0_24], %79 {strides = array<i32>} : memref<2x32x32xf32, #tpu.memory_space<vmem>>, vector<2x1x32xf32>,
    %c0_i32_25 = arith.constant 0 : i32
    %80 = arith.addi %6, %c0_i32_25 : i32
    %c2_i32_26 = arith.constant 2 : i32
    %81 = arith.addi %7, %c2_i32_26 : i32
    %82 = arith.index_cast %80 : i32 to index
    %83 = arith.index_cast %81 : i32 to index
    %84 = memref.load %arg2[%82, %83] : memref<2x32xi32, #tpu.memory_space<smem>>
    %85 = arith.index_cast %84 : i32 to index
    %c0_27 = arith.constant 0 : index
    %86 = vector.load %arg3[%85, %c0_27] : memref<32x128xf32, #tpu.memory_space<vmem>>, vector<1x128xf32>
    %c1_i32_28 = arith.constant 1 : i32
    %87 = arith.addi %6, %c1_i32_28 : i32
    %c2_i32_29 = arith.constant 2 : i32
    %88 = arith.addi %7, %c2_i32_29 : i32
    %89 = arith.index_cast %87 : i32 to index
    %90 = arith.index_cast %88 : i32 to index
    %91 = memref.load %arg2[%89, %90] : memref<2x32xi32, #tpu.memory_space<smem>>
    %92 = arith.index_cast %91 : i32 to index
    %c0_30 = arith.constant 0 : index
    %93 = vector.load %arg3[%92, %c0_30] : memref<32x128xf32, #tpu.memory_space<vmem>>, vector<1x128xf32>
    %94 = tpu.concatenate %86, %93 in 0 : vector<1x128xf32>, vector<1x128xf32> -> vector<2x128xf32>
    %95 = arith.truncf %76 : vector<2x32xf32> to vector<2x32xbf16>
    %cst_31 = arith.constant dense<0.000000e+00> : vector<2x128xf32>
    %96 = tpu.matmul %95, %3, %cst_31 {dimension_numbers = #tpu.dot_dimension_numbers<[1], [1], [0], [0], [0, 0, 1, 0], [], []>} : vector<2x32xbf16>, vector<128x32xbf16>, vector<2x128xf32> -> vector<2x128xf32>
    %97 = arith.addf %94, %96 : vector<2x128xf32>
    %98 = arith.negf %97 : vector<2x128xf32>
    %99 = math.exp %98 : vector<2x128xf32>
    %cst_32 = arith.constant 1.000000e+00 : f32
    %100 = vector.broadcast %cst_32 : f32 to vector<2x128xf32>
    %101 = arith.addf %100, %99 : vector<2x128xf32>
    %102 = arith.divf %100, %101 : vector<2x128xf32>
    %103 = math.tanh %97 : vector<2x128xf32>
    %104 = vector.extract_strided_slice %102 {offsets = [0, 0], sizes = [2, 32], strides = [1, 1]} : vector<2x128xf32> to vector<2x32xf32>
    %105 = vector.extract_strided_slice %102 {offsets = [0, 32], sizes = [2, 32], strides = [1, 1]} : vector<2x128xf32> to vector<2x32xf32>
    %106 = vector.extract_strided_slice %103 {offsets = [0, 64], sizes = [2, 32], strides = [1, 1]} : vector<2x128xf32> to vector<2x32xf32>
    %107 = vector.extract_strided_slice %102 {offsets = [0, 96], sizes = [2, 32], strides = [1, 1]} : vector<2x128xf32> to vector<2x32xf32>
    %108 = arith.mulf %105, %74 : vector<2x32xf32>
    %109 = arith.mulf %104, %106 : vector<2x32xf32>
    %110 = arith.addf %108, %109 : vector<2x32xf32>
    %111 = math.tanh %110 : vector<2x32xf32>
    %112 = arith.mulf %107, %111 : vector<2x32xf32>
    %c0_33 = arith.constant 0 : index
    %c2 = arith.constant 2 : index
    %c0_34 = arith.constant 0 : index
    %113 = vector.load %arg5[%c0_33, %c2, %c0_34] : memref<2x32x32xf32, #tpu.memory_space<vmem>>, vector<2x1x32xf32>
    %114 = vector.shape_cast %113 : vector<2x1x32xf32> to vector<2x32xf32>
    %115 = vector.shape_cast %112 : vector<2x32xf32> to vector<2x1x32xf32>
    tpu.vector_store %arg5[%c0_33, %c2, %c0_34], %115 {strides = array<i32>} : memref<2x32x32xf32, #tpu.memory_space<vmem>>, vector<2x1x32xf32>,
    %c0_i32_35 = arith.constant 0 : i32
    %116 = arith.addi %6, %c0_i32_35 : i32
    %c3_i32 = arith.constant 3 : i32
    %117 = arith.addi %7, %c3_i32 : i32
    %118 = arith.index_cast %116 : i32 to index
    %119 = arith.index_cast %117 : i32 to index
    %120 = memref.load %arg2[%118, %119] : memref<2x32xi32, #tpu.memory_space<smem>>
    %121 = arith.index_cast %120 : i32 to index
    %c0_36 = arith.constant 0 : index
    %122 = vector.load %arg3[%121, %c0_36] : memref<32x128xf32, #tpu.memory_space<vmem>>, vector<1x128xf32>
    %c1_i32_37 = arith.constant 1 : i32
    %123 = arith.addi %6, %c1_i32_37 : i32
    %c3_i32_38 = arith.constant 3 : i32
    %124 = arith.addi %7, %c3_i32_38 : i32
    %125 = arith.index_cast %123 : i32 to index
    %126 = arith.index_cast %124 : i32 to index
    %127 = memref.load %arg2[%125, %126] : memref<2x32xi32, #tpu.memory_space<smem>>
    %128 = arith.index_cast %127 : i32 to index
    %c0_39 = arith.constant 0 : index
    %129 = vector.load %arg3[%128, %c0_39] : memref<32x128xf32, #tpu.memory_space<vmem>>, vector<1x128xf32>
    %130 = tpu.concatenate %122, %129 in 0 : vector<1x128xf32>, vector<1x128xf32> -> vector<2x128xf32>
    %131 = arith.truncf %112 : vector<2x32xf32> to vector<2x32xbf16>
    %cst_40 = arith.constant dense<0.000000e+00> : vector<2x128xf32>
    %132 = tpu.matmul %131, %3, %cst_40 {dimension_numbers = #tpu.dot_dimension_numbers<[1], [1], [0], [0], [0, 0, 1, 0], [], []>} : vector<2x32xbf16>, vector<128x32xbf16>, vector<2x128xf32> -> vector<2x128xf32>
    %133 = arith.addf %130, %132 : vector<2x128xf32>
    %134 = arith.negf %133 : vector<2x128xf32>
    %135 = math.exp %134 : vector<2x128xf32>
    %cst_41 = arith.constant 1.000000e+00 : f32
    %136 = vector.broadcast %cst_41 : f32 to vector<2x128xf32>
    %137 = arith.addf %136, %135 : vector<2x128xf32>
    %138 = arith.divf %136, %137 : vector<2x128xf32>
    %139 = math.tanh %133 : vector<2x128xf32>
    %140 = vector.extract_strided_slice %138 {offsets = [0, 0], sizes = [2, 32], strides = [1, 1]} : vector<2x128xf32> to vector<2x32xf32>
    %141 = vector.extract_strided_slice %138 {offsets = [0, 32], sizes = [2, 32], strides = [1, 1]} : vector<2x128xf32> to vector<2x32xf32>
    %142 = vector.extract_strided_slice %139 {offsets = [0, 64], sizes = [2, 32], strides = [1, 1]} : vector<2x128xf32> to vector<2x32xf32>
    %143 = vector.extract_strided_slice %138 {offsets = [0, 96], sizes = [2, 32], strides = [1, 1]} : vector<2x128xf32> to vector<2x32xf32>
    %144 = arith.mulf %141, %110 : vector<2x32xf32>
    %145 = arith.mulf %140, %142 : vector<2x32xf32>
    %146 = arith.addf %144, %145 : vector<2x32xf32>
    %147 = math.tanh %146 : vector<2x32xf32>
    %148 = arith.mulf %143, %147 : vector<2x32xf32>
    %c0_42 = arith.constant 0 : index
    %c3 = arith.constant 3 : index
    %c0_43 = arith.constant 0 : index
    %149 = vector.load %arg5[%c0_42, %c3, %c0_43] : memref<2x32x32xf32, #tpu.memory_space<vmem>>, vector<2x1x32xf32>
    %150 = vector.shape_cast %149 : vector<2x1x32xf32> to vector<2x32xf32>
    %151 = vector.shape_cast %148 : vector<2x32xf32> to vector<2x1x32xf32>
    tpu.vector_store %arg5[%c0_42, %c3, %c0_43], %151 {strides = array<i32>} : memref<2x32x32xf32, #tpu.memory_space<vmem>>, vector<2x1x32xf32>,
    %c0_i32_44 = arith.constant 0 : i32
    %152 = arith.addi %6, %c0_i32_44 : i32
    %c4_i32 = arith.constant 4 : i32
    %153 = arith.addi %7, %c4_i32 : i32
    %154 = arith.index_cast %152 : i32 to index
    %155 = arith.index_cast %153 : i32 to index
    %156 = memref.load %arg2[%154, %155] : memref<2x32xi32, #tpu.memory_space<smem>>
    %157 = arith.index_cast %156 : i32 to index
    %c0_45 = arith.constant 0 : index
    %158 = vector.load %arg3[%157, %c0_45] : memref<32x128xf32, #tpu.memory_space<vmem>>, vector<1x128xf32>
    %c1_i32_46 = arith.constant 1 : i32
    %159 = arith.addi %6, %c1_i32_46 : i32
    %c4_i32_47 = arith.constant 4 : i32
    %160 = arith.addi %7, %c4_i32_47 : i32
    %161 = arith.index_cast %159 : i32 to index
    %162 = arith.index_cast %160 : i32 to index
    %163 = memref.load %arg2[%161, %162] : memref<2x32xi32, #tpu.memory_space<smem>>
    %164 = arith.index_cast %163 : i32 to index
    %c0_48 = arith.constant 0 : index
    %165 = vector.load %arg3[%164, %c0_48] : memref<32x128xf32, #tpu.memory_space<vmem>>, vector<1x128xf32>
    %166 = tpu.concatenate %158, %165 in 0 : vector<1x128xf32>, vector<1x128xf32> -> vector<2x128xf32>
    %167 = arith.truncf %148 : vector<2x32xf32> to vector<2x32xbf16>
    %cst_49 = arith.constant dense<0.000000e+00> : vector<2x128xf32>
    %168 = tpu.matmul %167, %3, %cst_49 {dimension_numbers = #tpu.dot_dimension_numbers<[1], [1], [0], [0], [0, 0, 1, 0], [], []>} : vector<2x32xbf16>, vector<128x32xbf16>, vector<2x128xf32> -> vector<2x128xf32>
    %169 = arith.addf %166, %168 : vector<2x128xf32>
    %170 = arith.negf %169 : vector<2x128xf32>
    %171 = math.exp %170 : vector<2x128xf32>
    %cst_50 = arith.constant 1.000000e+00 : f32
    %172 = vector.broadcast %cst_50 : f32 to vector<2x128xf32>
    %173 = arith.addf %172, %171 : vector<2x128xf32>
    %174 = arith.divf %172, %173 : vector<2x128xf32>
    %175 = math.tanh %169 : vector<2x128xf32>
    %176 = vector.extract_strided_slice %174 {offsets = [0, 0], sizes = [2, 32], strides = [1, 1]} : vector<2x128xf32> to vector<2x32xf32>
    %177 = vector.extract_strided_slice %174 {offsets = [0, 32], sizes = [2, 32], strides = [1, 1]} : vector<2x128xf32> to vector<2x32xf32>
    %178 = vector.extract_strided_slice %175 {offsets = [0, 64], sizes = [2, 32], strides = [1, 1]} : vector<2x128xf32> to vector<2x32xf32>
    %179 = vector.extract_strided_slice %174 {offsets = [0, 96], sizes = [2, 32], strides = [1, 1]} : vector<2x128xf32> to vector<2x32xf32>
    %180 = arith.mulf %177, %146 : vector<2x32xf32>
    %181 = arith.mulf %176, %178 : vector<2x32xf32>
    %182 = arith.addf %180, %181 : vector<2x32xf32>
    %183 = math.tanh %182 : vector<2x32xf32>
    %184 = arith.mulf %179, %183 : vector<2x32xf32>
    %c0_51 = arith.constant 0 : index
    %c4 = arith.constant 4 : index
    %c0_52 = arith.constant 0 : index
    %185 = vector.load %arg5[%c0_51, %c4, %c0_52] : memref<2x32x32xf32, #tpu.memory_space<vmem>>, vector<2x1x32xf32>
    %186 = vector.shape_cast %185 : vector<2x1x32xf32> to vector<2x32xf32>
    %187 = vector.shape_cast %184 : vector<2x32xf32> to vector<2x1x32xf32>
    tpu.vector_store %arg5[%c0_51, %c4, %c0_52], %187 {strides = array<i32>} : memref<2x32x32xf32, #tpu.memory_space<vmem>>, vector<2x1x32xf32>,
    %c0_i32_53 = arith.constant 0 : i32
    %188 = arith.addi %6, %c0_i32_53 : i32
    %c5_i32 = arith.constant 5 : i32
    %189 = arith.addi %7, %c5_i32 : i32
    %190 = arith.index_cast %188 : i32 to index
    %191 = arith.index_cast %189 : i32 to index
    %192 = memref.load %arg2[%190, %191] : memref<2x32xi32, #tpu.memory_space<smem>>
    %193 = arith.index_cast %192 : i32 to index
    %c0_54 = arith.constant 0 : index
    %194 = vector.load %arg3[%193, %c0_54] : memref<32x128xf32, #tpu.memory_space<vmem>>, vector<1x128xf32>
    %c1_i32_55 = arith.constant 1 : i32
    %195 = arith.addi %6, %c1_i32_55 : i32
    %c5_i32_56 = arith.constant 5 : i32
    %196 = arith.addi %7, %c5_i32_56 : i32
    %197 = arith.index_cast %195 : i32 to index
    %198 = arith.index_cast %196 : i32 to index
    %199 = memref.load %arg2[%197, %198] : memref<2x32xi32, #tpu.memory_space<smem>>
    %200 = arith.index_cast %199 : i32 to index
    %c0_57 = arith.constant 0 : index
    %201 = vector.load %arg3[%200, %c0_57] : memref<32x128xf32, #tpu.memory_space<vmem>>, vector<1x128xf32>
    %202 = tpu.concatenate %194, %201 in 0 : vector<1x128xf32>, vector<1x128xf32> -> vector<2x128xf32>
    %203 = arith.truncf %184 : vector<2x32xf32> to vector<2x32xbf16>
    %cst_58 = arith.constant dense<0.000000e+00> : vector<2x128xf32>
    %204 = tpu.matmul %203, %3, %cst_58 {dimension_numbers = #tpu.dot_dimension_numbers<[1], [1], [0], [0], [0, 0, 1, 0], [], []>} : vector<2x32xbf16>, vector<128x32xbf16>, vector<2x128xf32> -> vector<2x128xf32>
    %205 = arith.addf %202, %204 : vector<2x128xf32>
    %206 = arith.negf %205 : vector<2x128xf32>
    %207 = math.exp %206 : vector<2x128xf32>
    %cst_59 = arith.constant 1.000000e+00 : f32
    %208 = vector.broadcast %cst_59 : f32 to vector<2x128xf32>
    %209 = arith.addf %208, %207 : vector<2x128xf32>
    %210 = arith.divf %208, %209 : vector<2x128xf32>
    %211 = math.tanh %205 : vector<2x128xf32>
    %212 = vector.extract_strided_slice %210 {offsets = [0, 0], sizes = [2, 32], strides = [1, 1]} : vector<2x128xf32> to vector<2x32xf32>
    %213 = vector.extract_strided_slice %210 {offsets = [0, 32], sizes = [2, 32], strides = [1, 1]} : vector<2x128xf32> to vector<2x32xf32>
    %214 = vector.extract_strided_slice %211 {offsets = [0, 64], sizes = [2, 32], strides = [1, 1]} : vector<2x128xf32> to vector<2x32xf32>
    %215 = vector.extract_strided_slice %210 {offsets = [0, 96], sizes = [2, 32], strides = [1, 1]} : vector<2x128xf32> to vector<2x32xf32>
    %216 = arith.mulf %213, %182 : vector<2x32xf32>
    %217 = arith.mulf %212, %214 : vector<2x32xf32>
    %218 = arith.addf %216, %217 : vector<2x32xf32>
    %219 = math.tanh %218 : vector<2x32xf32>
    %220 = arith.mulf %215, %219 : vector<2x32xf32>
    %c0_60 = arith.constant 0 : index
    %c5 = arith.constant 5 : index
    %c0_61 = arith.constant 0 : index
    %221 = vector.load %arg5[%c0_60, %c5, %c0_61] : memref<2x32x32xf32, #tpu.memory_space<vmem>>, vector<2x1x32xf32>
    %222 = vector.shape_cast %221 : vector<2x1x32xf32> to vector<2x32xf32>
    %223 = vector.shape_cast %220 : vector<2x32xf32> to vector<2x1x32xf32>
    tpu.vector_store %arg5[%c0_60, %c5, %c0_61], %223 {strides = array<i32>} : memref<2x32x32xf32, #tpu.memory_space<vmem>>, vector<2x1x32xf32>,
    %c0_i32_62 = arith.constant 0 : i32
    %224 = arith.addi %6, %c0_i32_62 : i32
    %c6_i32 = arith.constant 6 : i32
    %225 = arith.addi %7, %c6_i32 : i32
    %226 = arith.index_cast %224 : i32 to index
    %227 = arith.index_cast %225 : i32 to index
    %228 = memref.load %arg2[%226, %227] : memref<2x32xi32, #tpu.memory_space<smem>>
    %229 = arith.index_cast %228 : i32 to index
    %c0_63 = arith.constant 0 : index
    %230 = vector.load %arg3[%229, %c0_63] : memref<32x128xf32, #tpu.memory_space<vmem>>, vector<1x128xf32>
    %c1_i32_64 = arith.constant 1 : i32
    %231 = arith.addi %6, %c1_i32_64 : i32
    %c6_i32_65 = arith.constant 6 : i32
    %232 = arith.addi %7, %c6_i32_65 : i32
    %233 = arith.index_cast %231 : i32 to index
    %234 = arith.index_cast %232 : i32 to index
    %235 = memref.load %arg2[%233, %234] : memref<2x32xi32, #tpu.memory_space<smem>>
    %236 = arith.index_cast %235 : i32 to index
    %c0_66 = arith.constant 0 : index
    %237 = vector.load %arg3[%236, %c0_66] : memref<32x128xf32, #tpu.memory_space<vmem>>, vector<1x128xf32>
    %238 = tpu.concatenate %230, %237 in 0 : vector<1x128xf32>, vector<1x128xf32> -> vector<2x128xf32>
    %239 = arith.truncf %220 : vector<2x32xf32> to vector<2x32xbf16>
    %cst_67 = arith.constant dense<0.000000e+00> : vector<2x128xf32>
    %240 = tpu.matmul %239, %3, %cst_67 {dimension_numbers = #tpu.dot_dimension_numbers<[1], [1], [0], [0], [0, 0, 1, 0], [], []>} : vector<2x32xbf16>, vector<128x32xbf16>, vector<2x128xf32> -> vector<2x128xf32>
    %241 = arith.addf %238, %240 : vector<2x128xf32>
    %242 = arith.negf %241 : vector<2x128xf32>
    %243 = math.exp %242 : vector<2x128xf32>
    %cst_68 = arith.constant 1.000000e+00 : f32
    %244 = vector.broadcast %cst_68 : f32 to vector<2x128xf32>
    %245 = arith.addf %244, %243 : vector<2x128xf32>
    %246 = arith.divf %244, %245 : vector<2x128xf32>
    %247 = math.tanh %241 : vector<2x128xf32>
    %248 = vector.extract_strided_slice %246 {offsets = [0, 0], sizes = [2, 32], strides = [1, 1]} : vector<2x128xf32> to vector<2x32xf32>
    %249 = vector.extract_strided_slice %246 {offsets = [0, 32], sizes = [2, 32], strides = [1, 1]} : vector<2x128xf32> to vector<2x32xf32>
    %250 = vector.extract_strided_slice %247 {offsets = [0, 64], sizes = [2, 32], strides = [1, 1]} : vector<2x128xf32> to vector<2x32xf32>
    %251 = vector.extract_strided_slice %246 {offsets = [0, 96], sizes = [2, 32], strides = [1, 1]} : vector<2x128xf32> to vector<2x32xf32>
    %252 = arith.mulf %249, %218 : vector<2x32xf32>
    %253 = arith.mulf %248, %250 : vector<2x32xf32>
    %254 = arith.addf %252, %253 : vector<2x32xf32>
    %255 = math.tanh %254 : vector<2x32xf32>
    %256 = arith.mulf %251, %255 : vector<2x32xf32>
    %c0_69 = arith.constant 0 : index
    %c6 = arith.constant 6 : index
    %c0_70 = arith.constant 0 : index
    %257 = vector.load %arg5[%c0_69, %c6, %c0_70] : memref<2x32x32xf32, #tpu.memory_space<vmem>>, vector<2x1x32xf32>
    %258 = vector.shape_cast %257 : vector<2x1x32xf32> to vector<2x32xf32>
    %259 = vector.shape_cast %256 : vector<2x32xf32> to vector<2x1x32xf32>
    tpu.vector_store %arg5[%c0_69, %c6, %c0_70], %259 {strides = array<i32>} : memref<2x32x32xf32, #tpu.memory_space<vmem>>, vector<2x1x32xf32>,
    %c0_i32_71 = arith.constant 0 : i32
    %260 = arith.addi %6, %c0_i32_71 : i32
    %c7_i32 = arith.constant 7 : i32
    %261 = arith.addi %7, %c7_i32 : i32
    %262 = arith.index_cast %260 : i32 to index
    %263 = arith.index_cast %261 : i32 to index
    %264 = memref.load %arg2[%262, %263] : memref<2x32xi32, #tpu.memory_space<smem>>
    %265 = arith.index_cast %264 : i32 to index
    %c0_72 = arith.constant 0 : index
    %266 = vector.load %arg3[%265, %c0_72] : memref<32x128xf32, #tpu.memory_space<vmem>>, vector<1x128xf32>
    %c1_i32_73 = arith.constant 1 : i32
    %267 = arith.addi %6, %c1_i32_73 : i32
    %c7_i32_74 = arith.constant 7 : i32
    %268 = arith.addi %7, %c7_i32_74 : i32
    %269 = arith.index_cast %267 : i32 to index
    %270 = arith.index_cast %268 : i32 to index
    %271 = memref.load %arg2[%269, %270] : memref<2x32xi32, #tpu.memory_space<smem>>
    %272 = arith.index_cast %271 : i32 to index
    %c0_75 = arith.constant 0 : index
    %273 = vector.load %arg3[%272, %c0_75] : memref<32x128xf32, #tpu.memory_space<vmem>>, vector<1x128xf32>
    %274 = tpu.concatenate %266, %273 in 0 : vector<1x128xf32>, vector<1x128xf32> -> vector<2x128xf32>
    %275 = arith.truncf %256 : vector<2x32xf32> to vector<2x32xbf16>
    %cst_76 = arith.constant dense<0.000000e+00> : vector<2x128xf32>
    %276 = tpu.matmul %275, %3, %cst_76 {dimension_numbers = #tpu.dot_dimension_numbers<[1], [1], [0], [0], [0, 0, 1, 0], [], []>} : vector<2x32xbf16>, vector<128x32xbf16>, vector<2x128xf32> -> vector<2x128xf32>
    %277 = arith.addf %274, %276 : vector<2x128xf32>
    %278 = arith.negf %277 : vector<2x128xf32>
    %279 = math.exp %278 : vector<2x128xf32>
    %cst_77 = arith.constant 1.000000e+00 : f32
    %280 = vector.broadcast %cst_77 : f32 to vector<2x128xf32>
    %281 = arith.addf %280, %279 : vector<2x128xf32>
    %282 = arith.divf %280, %281 : vector<2x128xf32>
    %283 = math.tanh %277 : vector<2x128xf32>
    %284 = vector.extract_strided_slice %282 {offsets = [0, 0], sizes = [2, 32], strides = [1, 1]} : vector<2x128xf32> to vector<2x32xf32>
    %285 = vector.extract_strided_slice %282 {offsets = [0, 32], sizes = [2, 32], strides = [1, 1]} : vector<2x128xf32> to vector<2x32xf32>
    %286 = vector.extract_strided_slice %283 {offsets = [0, 64], sizes = [2, 32], strides = [1, 1]} : vector<2x128xf32> to vector<2x32xf32>
    %287 = vector.extract_strided_slice %282 {offsets = [0, 96], sizes = [2, 32], strides = [1, 1]} : vector<2x128xf32> to vector<2x32xf32>
    %288 = arith.mulf %285, %254 : vector<2x32xf32>
    %289 = arith.mulf %284, %286 : vector<2x32xf32>
    %290 = arith.addf %288, %289 : vector<2x32xf32>
    %291 = math.tanh %290 : vector<2x32xf32>
    %292 = arith.mulf %287, %291 : vector<2x32xf32>
    %c0_78 = arith.constant 0 : index
    %c7 = arith.constant 7 : index
    %c0_79 = arith.constant 0 : index
    %293 = vector.load %arg5[%c0_78, %c7, %c0_79] : memref<2x32x32xf32, #tpu.memory_space<vmem>>, vector<2x1x32xf32>
    %294 = vector.shape_cast %293 : vector<2x1x32xf32> to vector<2x32xf32>
    %295 = vector.shape_cast %292 : vector<2x32xf32> to vector<2x1x32xf32>
    tpu.vector_store %arg5[%c0_78, %c7, %c0_79], %295 {strides = array<i32>} : memref<2x32x32xf32, #tpu.memory_space<vmem>>, vector<2x1x32xf32>,
    %c0_i32_80 = arith.constant 0 : i32
    %296 = arith.addi %6, %c0_i32_80 : i32
    %c8_i32 = arith.constant 8 : i32
    %297 = arith.addi %7, %c8_i32 : i32
    %298 = arith.index_cast %296 : i32 to index
    %299 = arith.index_cast %297 : i32 to index
    %300 = memref.load %arg2[%298, %299] : memref<2x32xi32, #tpu.memory_space<smem>>
    %301 = arith.index_cast %300 : i32 to index
    %c0_81 = arith.constant 0 : index
    %302 = vector.load %arg3[%301, %c0_81] : memref<32x128xf32, #tpu.memory_space<vmem>>, vector<1x128xf32>
    %c1_i32_82 = arith.constant 1 : i32
    %303 = arith.addi %6, %c1_i32_82 : i32
    %c8_i32_83 = arith.constant 8 : i32
    %304 = arith.addi %7, %c8_i32_83 : i32
    %305 = arith.index_cast %303 : i32 to index
    %306 = arith.index_cast %304 : i32 to index
    %307 = memref.load %arg2[%305, %306] : memref<2x32xi32, #tpu.memory_space<smem>>
    %308 = arith.index_cast %307 : i32 to index
    %c0_84 = arith.constant 0 : index
    %309 = vector.load %arg3[%308, %c0_84] : memref<32x128xf32, #tpu.memory_space<vmem>>, vector<1x128xf32>
    %310 = tpu.concatenate %302, %309 in 0 : vector<1x128xf32>, vector<1x128xf32> -> vector<2x128xf32>
    %311 = arith.truncf %292 : vector<2x32xf32> to vector<2x32xbf16>
    %cst_85 = arith.constant dense<0.000000e+00> : vector<2x128xf32>
    %312 = tpu.matmul %311, %3, %cst_85 {dimension_numbers = #tpu.dot_dimension_numbers<[1], [1], [0], [0], [0, 0, 1, 0], [], []>} : vector<2x32xbf16>, vector<128x32xbf16>, vector<2x128xf32> -> vector<2x128xf32>
    %313 = arith.addf %310, %312 : vector<2x128xf32>
    %314 = arith.negf %313 : vector<2x128xf32>
    %315 = math.exp %314 : vector<2x128xf32>
    %cst_86 = arith.constant 1.000000e+00 : f32
    %316 = vector.broadcast %cst_86 : f32 to vector<2x128xf32>
    %317 = arith.addf %316, %315 : vector<2x128xf32>
    %318 = arith.divf %316, %317 : vector<2x128xf32>
    %319 = math.tanh %313 : vector<2x128xf32>
    %320 = vector.extract_strided_slice %318 {offsets = [0, 0], sizes = [2, 32], strides = [1, 1]} : vector<2x128xf32> to vector<2x32xf32>
    %321 = vector.extract_strided_slice %318 {offsets = [0, 32], sizes = [2, 32], strides = [1, 1]} : vector<2x128xf32> to vector<2x32xf32>
    %322 = vector.extract_strided_slice %319 {offsets = [0, 64], sizes = [2, 32], strides = [1, 1]} : vector<2x128xf32> to vector<2x32xf32>
    %323 = vector.extract_strided_slice %318 {offsets = [0, 96], sizes = [2, 32], strides = [1, 1]} : vector<2x128xf32> to vector<2x32xf32>
    %324 = arith.mulf %321, %290 : vector<2x32xf32>
    %325 = arith.mulf %320, %322 : vector<2x32xf32>
    %326 = arith.addf %324, %325 : vector<2x32xf32>
    %327 = math.tanh %326 : vector<2x32xf32>
    %328 = arith.mulf %323, %327 : vector<2x32xf32>
    %c0_87 = arith.constant 0 : index
    %c8 = arith.constant 8 : index
    %c0_88 = arith.constant 0 : index
    %329 = vector.load %arg5[%c0_87, %c8, %c0_88] : memref<2x32x32xf32, #tpu.memory_space<vmem>>, vector<2x1x32xf32>
    %330 = vector.shape_cast %329 : vector<2x1x32xf32> to vector<2x32xf32>
    %331 = vector.shape_cast %328 : vector<2x32xf32> to vector<2x1x32xf32>
    tpu.vector_store %arg5[%c0_87, %c8, %c0_88], %331 {strides = array<i32>} : memref<2x32x32xf32, #tpu.memory_space<vmem>>, vector<2x1x32xf32>,
    %c0_i32_89 = arith.constant 0 : i32
    %332 = arith.addi %6, %c0_i32_89 : i32
    %c9_i32 = arith.constant 9 : i32
    %333 = arith.addi %7, %c9_i32 : i32
    %334 = arith.index_cast %332 : i32 to index
    %335 = arith.index_cast %333 : i32 to index
    %336 = memref.load %arg2[%334, %335] : memref<2x32xi32, #tpu.memory_space<smem>>
    %337 = arith.index_cast %336 : i32 to index
    %c0_90 = arith.constant 0 : index
    %338 = vector.load %arg3[%337, %c0_90] : memref<32x128xf32, #tpu.memory_space<vmem>>, vector<1x128xf32>
    %c1_i32_91 = arith.constant 1 : i32
    %339 = arith.addi %6, %c1_i32_91 : i32
    %c9_i32_92 = arith.constant 9 : i32
    %340 = arith.addi %7, %c9_i32_92 : i32
    %341 = arith.index_cast %339 : i32 to index
    %342 = arith.index_cast %340 : i32 to index
    %343 = memref.load %arg2[%341, %342] : memref<2x32xi32, #tpu.memory_space<smem>>
    %344 = arith.index_cast %343 : i32 to index
    %c0_93 = arith.constant 0 : index
    %345 = vector.load %arg3[%344, %c0_93] : memref<32x128xf32, #tpu.memory_space<vmem>>, vector<1x128xf32>
    %346 = tpu.concatenate %338, %345 in 0 : vector<1x128xf32>, vector<1x128xf32> -> vector<2x128xf32>
    %347 = arith.truncf %328 : vector<2x32xf32> to vector<2x32xbf16>
    %cst_94 = arith.constant dense<0.000000e+00> : vector<2x128xf32>
    %348 = tpu.matmul %347, %3, %cst_94 {dimension_numbers = #tpu.dot_dimension_numbers<[1], [1], [0], [0], [0, 0, 1, 0], [], []>} : vector<2x32xbf16>, vector<128x32xbf16>, vector<2x128xf32> -> vector<2x128xf32>
    %349 = arith.addf %346, %348 : vector<2x128xf32>
    %350 = arith.negf %349 : vector<2x128xf32>
    %351 = math.exp %350 : vector<2x128xf32>
    %cst_95 = arith.constant 1.000000e+00 : f32
    %352 = vector.broadcast %cst_95 : f32 to vector<2x128xf32>
    %353 = arith.addf %352, %351 : vector<2x128xf32>
    %354 = arith.divf %352, %353 : vector<2x128xf32>
    %355 = math.tanh %349 : vector<2x128xf32>
    %356 = vector.extract_strided_slice %354 {offsets = [0, 0], sizes = [2, 32], strides = [1, 1]} : vector<2x128xf32> to vector<2x32xf32>
    %357 = vector.extract_strided_slice %354 {offsets = [0, 32], sizes = [2, 32], strides = [1, 1]} : vector<2x128xf32> to vector<2x32xf32>
    %358 = vector.extract_strided_slice %355 {offsets = [0, 64], sizes = [2, 32], strides = [1, 1]} : vector<2x128xf32> to vector<2x32xf32>
    %359 = vector.extract_strided_slice %354 {offsets = [0, 96], sizes = [2, 32], strides = [1, 1]} : vector<2x128xf32> to vector<2x32xf32>
    %360 = arith.mulf %357, %326 : vector<2x32xf32>
    %361 = arith.mulf %356, %358 : vector<2x32xf32>
    %362 = arith.addf %360, %361 : vector<2x32xf32>
    %363 = math.tanh %362 : vector<2x32xf32>
    %364 = arith.mulf %359, %363 : vector<2x32xf32>
    %c0_96 = arith.constant 0 : index
    %c9 = arith.constant 9 : index
    %c0_97 = arith.constant 0 : index
    %365 = vector.load %arg5[%c0_96, %c9, %c0_97] : memref<2x32x32xf32, #tpu.memory_space<vmem>>, vector<2x1x32xf32>
    %366 = vector.shape_cast %365 : vector<2x1x32xf32> to vector<2x32xf32>
    %367 = vector.shape_cast %364 : vector<2x32xf32> to vector<2x1x32xf32>
    tpu.vector_store %arg5[%c0_96, %c9, %c0_97], %367 {strides = array<i32>} : memref<2x32x32xf32, #tpu.memory_space<vmem>>, vector<2x1x32xf32>,
    %c0_i32_98 = arith.constant 0 : i32
    %368 = arith.addi %6, %c0_i32_98 : i32
    %c10_i32 = arith.constant 10 : i32
    %369 = arith.addi %7, %c10_i32 : i32
    %370 = arith.index_cast %368 : i32 to index
    %371 = arith.index_cast %369 : i32 to index
    %372 = memref.load %arg2[%370, %371] : memref<2x32xi32, #tpu.memory_space<smem>>
    %373 = arith.index_cast %372 : i32 to index
    %c0_99 = arith.constant 0 : index
    %374 = vector.load %arg3[%373, %c0_99] : memref<32x128xf32, #tpu.memory_space<vmem>>, vector<1x128xf32>
    %c1_i32_100 = arith.constant 1 : i32
    %375 = arith.addi %6, %c1_i32_100 : i32
    %c10_i32_101 = arith.constant 10 : i32
    %376 = arith.addi %7, %c10_i32_101 : i32
    %377 = arith.index_cast %375 : i32 to index
    %378 = arith.index_cast %376 : i32 to index
    %379 = memref.load %arg2[%377, %378] : memref<2x32xi32, #tpu.memory_space<smem>>
    %380 = arith.index_cast %379 : i32 to index
    %c0_102 = arith.constant 0 : index
    %381 = vector.load %arg3[%380, %c0_102] : memref<32x128xf32, #tpu.memory_space<vmem>>, vector<1x128xf32>
    %382 = tpu.concatenate %374, %381 in 0 : vector<1x128xf32>, vector<1x128xf32> -> vector<2x128xf32>
    %383 = arith.truncf %364 : vector<2x32xf32> to vector<2x32xbf16>
    %cst_103 = arith.constant dense<0.000000e+00> : vector<2x128xf32>
    %384 = tpu.matmul %383, %3, %cst_103 {dimension_numbers = #tpu.dot_dimension_numbers<[1], [1], [0], [0], [0, 0, 1, 0], [], []>} : vector<2x32xbf16>, vector<128x32xbf16>, vector<2x128xf32> -> vector<2x128xf32>
    %385 = arith.addf %382, %384 : vector<2x128xf32>
    %386 = arith.negf %385 : vector<2x128xf32>
    %387 = math.exp %386 : vector<2x128xf32>
    %cst_104 = arith.constant 1.000000e+00 : f32
    %388 = vector.broadcast %cst_104 : f32 to vector<2x128xf32>
    %389 = arith.addf %388, %387 : vector<2x128xf32>
    %390 = arith.divf %388, %389 : vector<2x128xf32>
    %391 = math.tanh %385 : vector<2x128xf32>
    %392 = vector.extract_strided_slice %390 {offsets = [0, 0], sizes = [2, 32], strides = [1, 1]} : vector<2x128xf32> to vector<2x32xf32>
    %393 = vector.extract_strided_slice %390 {offsets = [0, 32], sizes = [2, 32], strides = [1, 1]} : vector<2x128xf32> to vector<2x32xf32>
    %394 = vector.extract_strided_slice %391 {offsets = [0, 64], sizes = [2, 32], strides = [1, 1]} : vector<2x128xf32> to vector<2x32xf32>
    %395 = vector.extract_strided_slice %390 {offsets = [0, 96], sizes = [2, 32], strides = [1, 1]} : vector<2x128xf32> to vector<2x32xf32>
    %396 = arith.mulf %393, %362 : vector<2x32xf32>
    %397 = arith.mulf %392, %394 : vector<2x32xf32>
    %398 = arith.addf %396, %397 : vector<2x32xf32>
    %399 = math.tanh %398 : vector<2x32xf32>
    %400 = arith.mulf %395, %399 : vector<2x32xf32>
    %c0_105 = arith.constant 0 : index
    %c10 = arith.constant 10 : index
    %c0_106 = arith.constant 0 : index
    %401 = vector.load %arg5[%c0_105, %c10, %c0_106] : memref<2x32x32xf32, #tpu.memory_space<vmem>>, vector<2x1x32xf32>
    %402 = vector.shape_cast %401 : vector<2x1x32xf32> to vector<2x32xf32>
    %403 = vector.shape_cast %400 : vector<2x32xf32> to vector<2x1x32xf32>
    tpu.vector_store %arg5[%c0_105, %c10, %c0_106], %403 {strides = array<i32>} : memref<2x32x32xf32, #tpu.memory_space<vmem>>, vector<2x1x32xf32>,
    %c0_i32_107 = arith.constant 0 : i32
    %404 = arith.addi %6, %c0_i32_107 : i32
    %c11_i32 = arith.constant 11 : i32
    %405 = arith.addi %7, %c11_i32 : i32
    %406 = arith.index_cast %404 : i32 to index
    %407 = arith.index_cast %405 : i32 to index
    %408 = memref.load %arg2[%406, %407] : memref<2x32xi32, #tpu.memory_space<smem>>
    %409 = arith.index_cast %408 : i32 to index
    %c0_108 = arith.constant 0 : index
    %410 = vector.load %arg3[%409, %c0_108] : memref<32x128xf32, #tpu.memory_space<vmem>>, vector<1x128xf32>
    %c1_i32_109 = arith.constant 1 : i32
    %411 = arith.addi %6, %c1_i32_109 : i32
    %c11_i32_110 = arith.constant 11 : i32
    %412 = arith.addi %7, %c11_i32_110 : i32
    %413 = arith.index_cast %411 : i32 to index
    %414 = arith.index_cast %412 : i32 to index
    %415 = memref.load %arg2[%413, %414] : memref<2x32xi32, #tpu.memory_space<smem>>
    %416 = arith.index_cast %415 : i32 to index
    %c0_111 = arith.constant 0 : index
    %417 = vector.load %arg3[%416, %c0_111] : memref<32x128xf32, #tpu.memory_space<vmem>>, vector<1x128xf32>
    %418 = tpu.concatenate %410, %417 in 0 : vector<1x128xf32>, vector<1x128xf32> -> vector<2x128xf32>
    %419 = arith.truncf %400 : vector<2x32xf32> to vector<2x32xbf16>
    %cst_112 = arith.constant dense<0.000000e+00> : vector<2x128xf32>
    %420 = tpu.matmul %419, %3, %cst_112 {dimension_numbers = #tpu.dot_dimension_numbers<[1], [1], [0], [0], [0, 0, 1, 0], [], []>} : vector<2x32xbf16>, vector<128x32xbf16>, vector<2x128xf32> -> vector<2x128xf32>
    %421 = arith.addf %418, %420 : vector<2x128xf32>
    %422 = arith.negf %421 : vector<2x128xf32>
    %423 = math.exp %422 : vector<2x128xf32>
    %cst_113 = arith.constant 1.000000e+00 : f32
    %424 = vector.broadcast %cst_113 : f32 to vector<2x128xf32>
    %425 = arith.addf %424, %423 : vector<2x128xf32>
    %426 = arith.divf %424, %425 : vector<2x128xf32>
    %427 = math.tanh %421 : vector<2x128xf32>
    %428 = vector.extract_strided_slice %426 {offsets = [0, 0], sizes = [2, 32], strides = [1, 1]} : vector<2x128xf32> to vector<2x32xf32>
    %429 = vector.extract_strided_slice %426 {offsets = [0, 32], sizes = [2, 32], strides = [1, 1]} : vector<2x128xf32> to vector<2x32xf32>
    %430 = vector.extract_strided_slice %427 {offsets = [0, 64], sizes = [2, 32], strides = [1, 1]} : vector<2x128xf32> to vector<2x32xf32>
    %431 = vector.extract_strided_slice %426 {offsets = [0, 96], sizes = [2, 32], strides = [1, 1]} : vector<2x128xf32> to vector<2x32xf32>
    %432 = arith.mulf %429, %398 : vector<2x32xf32>
    %433 = arith.mulf %428, %430 : vector<2x32xf32>
    %434 = arith.addf %432, %433 : vector<2x32xf32>
    %435 = math.tanh %434 : vector<2x32xf32>
    %436 = arith.mulf %431, %435 : vector<2x32xf32>
    %c0_114 = arith.constant 0 : index
    %c11 = arith.constant 11 : index
    %c0_115 = arith.constant 0 : index
    %437 = vector.load %arg5[%c0_114, %c11, %c0_115] : memref<2x32x32xf32, #tpu.memory_space<vmem>>, vector<2x1x32xf32>
    %438 = vector.shape_cast %437 : vector<2x1x32xf32> to vector<2x32xf32>
    %439 = vector.shape_cast %436 : vector<2x32xf32> to vector<2x1x32xf32>
    tpu.vector_store %arg5[%c0_114, %c11, %c0_115], %439 {strides = array<i32>} : memref<2x32x32xf32, #tpu.memory_space<vmem>>, vector<2x1x32xf32>,
    %c0_i32_116 = arith.constant 0 : i32
    %440 = arith.addi %6, %c0_i32_116 : i32
    %c12_i32 = arith.constant 12 : i32
    %441 = arith.addi %7, %c12_i32 : i32
    %442 = arith.index_cast %440 : i32 to index
    %443 = arith.index_cast %441 : i32 to index
    %444 = memref.load %arg2[%442, %443] : memref<2x32xi32, #tpu.memory_space<smem>>
    %445 = arith.index_cast %444 : i32 to index
    %c0_117 = arith.constant 0 : index
    %446 = vector.load %arg3[%445, %c0_117] : memref<32x128xf32, #tpu.memory_space<vmem>>, vector<1x128xf32>
    %c1_i32_118 = arith.constant 1 : i32
    %447 = arith.addi %6, %c1_i32_118 : i32
    %c12_i32_119 = arith.constant 12 : i32
    %448 = arith.addi %7, %c12_i32_119 : i32
    %449 = arith.index_cast %447 : i32 to index
    %450 = arith.index_cast %448 : i32 to index
    %451 = memref.load %arg2[%449, %450] : memref<2x32xi32, #tpu.memory_space<smem>>
    %452 = arith.index_cast %451 : i32 to index
    %c0_120 = arith.constant 0 : index
    %453 = vector.load %arg3[%452, %c0_120] : memref<32x128xf32, #tpu.memory_space<vmem>>, vector<1x128xf32>
    %454 = tpu.concatenate %446, %453 in 0 : vector<1x128xf32>, vector<1x128xf32> -> vector<2x128xf32>
    %455 = arith.truncf %436 : vector<2x32xf32> to vector<2x32xbf16>
    %cst_121 = arith.constant dense<0.000000e+00> : vector<2x128xf32>
    %456 = tpu.matmul %455, %3, %cst_121 {dimension_numbers = #tpu.dot_dimension_numbers<[1], [1], [0], [0], [0, 0, 1, 0], [], []>} : vector<2x32xbf16>, vector<128x32xbf16>, vector<2x128xf32> -> vector<2x128xf32>
    %457 = arith.addf %454, %456 : vector<2x128xf32>
    %458 = arith.negf %457 : vector<2x128xf32>
    %459 = math.exp %458 : vector<2x128xf32>
    %cst_122 = arith.constant 1.000000e+00 : f32
    %460 = vector.broadcast %cst_122 : f32 to vector<2x128xf32>
    %461 = arith.addf %460, %459 : vector<2x128xf32>
    %462 = arith.divf %460, %461 : vector<2x128xf32>
    %463 = math.tanh %457 : vector<2x128xf32>
    %464 = vector.extract_strided_slice %462 {offsets = [0, 0], sizes = [2, 32], strides = [1, 1]} : vector<2x128xf32> to vector<2x32xf32>
    %465 = vector.extract_strided_slice %462 {offsets = [0, 32], sizes = [2, 32], strides = [1, 1]} : vector<2x128xf32> to vector<2x32xf32>
    %466 = vector.extract_strided_slice %463 {offsets = [0, 64], sizes = [2, 32], strides = [1, 1]} : vector<2x128xf32> to vector<2x32xf32>
    %467 = vector.extract_strided_slice %462 {offsets = [0, 96], sizes = [2, 32], strides = [1, 1]} : vector<2x128xf32> to vector<2x32xf32>
    %468 = arith.mulf %465, %434 : vector<2x32xf32>
    %469 = arith.mulf %464, %466 : vector<2x32xf32>
    %470 = arith.addf %468, %469 : vector<2x32xf32>
    %471 = math.tanh %470 : vector<2x32xf32>
    %472 = arith.mulf %467, %471 : vector<2x32xf32>
    %c0_123 = arith.constant 0 : index
    %c12 = arith.constant 12 : index
    %c0_124 = arith.constant 0 : index
    %473 = vector.load %arg5[%c0_123, %c12, %c0_124] : memref<2x32x32xf32, #tpu.memory_space<vmem>>, vector<2x1x32xf32>
    %474 = vector.shape_cast %473 : vector<2x1x32xf32> to vector<2x32xf32>
    %475 = vector.shape_cast %472 : vector<2x32xf32> to vector<2x1x32xf32>
    tpu.vector_store %arg5[%c0_123, %c12, %c0_124], %475 {strides = array<i32>} : memref<2x32x32xf32, #tpu.memory_space<vmem>>, vector<2x1x32xf32>,
    %c0_i32_125 = arith.constant 0 : i32
    %476 = arith.addi %6, %c0_i32_125 : i32
    %c13_i32 = arith.constant 13 : i32
    %477 = arith.addi %7, %c13_i32 : i32
    %478 = arith.index_cast %476 : i32 to index
    %479 = arith.index_cast %477 : i32 to index
    %480 = memref.load %arg2[%478, %479] : memref<2x32xi32, #tpu.memory_space<smem>>
    %481 = arith.index_cast %480 : i32 to index
    %c0_126 = arith.constant 0 : index
    %482 = vector.load %arg3[%481, %c0_126] : memref<32x128xf32, #tpu.memory_space<vmem>>, vector<1x128xf32>
    %c1_i32_127 = arith.constant 1 : i32
    %483 = arith.addi %6, %c1_i32_127 : i32
    %c13_i32_128 = arith.constant 13 : i32
    %484 = arith.addi %7, %c13_i32_128 : i32
    %485 = arith.index_cast %483 : i32 to index
    %486 = arith.index_cast %484 : i32 to index
    %487 = memref.load %arg2[%485, %486] : memref<2x32xi32, #tpu.memory_space<smem>>
    %488 = arith.index_cast %487 : i32 to index
    %c0_129 = arith.constant 0 : index
    %489 = vector.load %arg3[%488, %c0_129] : memref<32x128xf32, #tpu.memory_space<vmem>>, vector<1x128xf32>
    %490 = tpu.concatenate %482, %489 in 0 : vector<1x128xf32>, vector<1x128xf32> -> vector<2x128xf32>
    %491 = arith.truncf %472 : vector<2x32xf32> to vector<2x32xbf16>
    %cst_130 = arith.constant dense<0.000000e+00> : vector<2x128xf32>
    %492 = tpu.matmul %491, %3, %cst_130 {dimension_numbers = #tpu.dot_dimension_numbers<[1], [1], [0], [0], [0, 0, 1, 0], [], []>} : vector<2x32xbf16>, vector<128x32xbf16>, vector<2x128xf32> -> vector<2x128xf32>
    %493 = arith.addf %490, %492 : vector<2x128xf32>
    %494 = arith.negf %493 : vector<2x128xf32>
    %495 = math.exp %494 : vector<2x128xf32>
    %cst_131 = arith.constant 1.000000e+00 : f32
    %496 = vector.broadcast %cst_131 : f32 to vector<2x128xf32>
    %497 = arith.addf %496, %495 : vector<2x128xf32>
    %498 = arith.divf %496, %497 : vector<2x128xf32>
    %499 = math.tanh %493 : vector<2x128xf32>
    %500 = vector.extract_strided_slice %498 {offsets = [0, 0], sizes = [2, 32], strides = [1, 1]} : vector<2x128xf32> to vector<2x32xf32>
    %501 = vector.extract_strided_slice %498 {offsets = [0, 32], sizes = [2, 32], strides = [1, 1]} : vector<2x128xf32> to vector<2x32xf32>
    %502 = vector.extract_strided_slice %499 {offsets = [0, 64], sizes = [2, 32], strides = [1, 1]} : vector<2x128xf32> to vector<2x32xf32>
    %503 = vector.extract_strided_slice %498 {offsets = [0, 96], sizes = [2, 32], strides = [1, 1]} : vector<2x128xf32> to vector<2x32xf32>
    %504 = arith.mulf %501, %470 : vector<2x32xf32>
    %505 = arith.mulf %500, %502 : vector<2x32xf32>
    %506 = arith.addf %504, %505 : vector<2x32xf32>
    %507 = math.tanh %506 : vector<2x32xf32>
    %508 = arith.mulf %503, %507 : vector<2x32xf32>
    %c0_132 = arith.constant 0 : index
    %c13 = arith.constant 13 : index
    %c0_133 = arith.constant 0 : index
    %509 = vector.load %arg5[%c0_132, %c13, %c0_133] : memref<2x32x32xf32, #tpu.memory_space<vmem>>, vector<2x1x32xf32>
    %510 = vector.shape_cast %509 : vector<2x1x32xf32> to vector<2x32xf32>
    %511 = vector.shape_cast %508 : vector<2x32xf32> to vector<2x1x32xf32>
    tpu.vector_store %arg5[%c0_132, %c13, %c0_133], %511 {strides = array<i32>} : memref<2x32x32xf32, #tpu.memory_space<vmem>>, vector<2x1x32xf32>,
    %c0_i32_134 = arith.constant 0 : i32
    %512 = arith.addi %6, %c0_i32_134 : i32
    %c14_i32 = arith.constant 14 : i32
    %513 = arith.addi %7, %c14_i32 : i32
    %514 = arith.index_cast %512 : i32 to index
    %515 = arith.index_cast %513 : i32 to index
    %516 = memref.load %arg2[%514, %515] : memref<2x32xi32, #tpu.memory_space<smem>>
    %517 = arith.index_cast %516 : i32 to index
    %c0_135 = arith.constant 0 : index
    %518 = vector.load %arg3[%517, %c0_135] : memref<32x128xf32, #tpu.memory_space<vmem>>, vector<1x128xf32>
    %c1_i32_136 = arith.constant 1 : i32
    %519 = arith.addi %6, %c1_i32_136 : i32
    %c14_i32_137 = arith.constant 14 : i32
    %520 = arith.addi %7, %c14_i32_137 : i32
    %521 = arith.index_cast %519 : i32 to index
    %522 = arith.index_cast %520 : i32 to index
    %523 = memref.load %arg2[%521, %522] : memref<2x32xi32, #tpu.memory_space<smem>>
    %524 = arith.index_cast %523 : i32 to index
    %c0_138 = arith.constant 0 : index
    %525 = vector.load %arg3[%524, %c0_138] : memref<32x128xf32, #tpu.memory_space<vmem>>, vector<1x128xf32>
    %526 = tpu.concatenate %518, %525 in 0 : vector<1x128xf32>, vector<1x128xf32> -> vector<2x128xf32>
    %527 = arith.truncf %508 : vector<2x32xf32> to vector<2x32xbf16>
    %cst_139 = arith.constant dense<0.000000e+00> : vector<2x128xf32>
    %528 = tpu.matmul %527, %3, %cst_139 {dimension_numbers = #tpu.dot_dimension_numbers<[1], [1], [0], [0], [0, 0, 1, 0], [], []>} : vector<2x32xbf16>, vector<128x32xbf16>, vector<2x128xf32> -> vector<2x128xf32>
    %529 = arith.addf %526, %528 : vector<2x128xf32>
    %530 = arith.negf %529 : vector<2x128xf32>
    %531 = math.exp %530 : vector<2x128xf32>
    %cst_140 = arith.constant 1.000000e+00 : f32
    %532 = vector.broadcast %cst_140 : f32 to vector<2x128xf32>
    %533 = arith.addf %532, %531 : vector<2x128xf32>
    %534 = arith.divf %532, %533 : vector<2x128xf32>
    %535 = math.tanh %529 : vector<2x128xf32>
    %536 = vector.extract_strided_slice %534 {offsets = [0, 0], sizes = [2, 32], strides = [1, 1]} : vector<2x128xf32> to vector<2x32xf32>
    %537 = vector.extract_strided_slice %534 {offsets = [0, 32], sizes = [2, 32], strides = [1, 1]} : vector<2x128xf32> to vector<2x32xf32>
    %538 = vector.extract_strided_slice %535 {offsets = [0, 64], sizes = [2, 32], strides = [1, 1]} : vector<2x128xf32> to vector<2x32xf32>
    %539 = vector.extract_strided_slice %534 {offsets = [0, 96], sizes = [2, 32], strides = [1, 1]} : vector<2x128xf32> to vector<2x32xf32>
    %540 = arith.mulf %537, %506 : vector<2x32xf32>
    %541 = arith.mulf %536, %538 : vector<2x32xf32>
    %542 = arith.addf %540, %541 : vector<2x32xf32>
    %543 = math.tanh %542 : vector<2x32xf32>
    %544 = arith.mulf %539, %543 : vector<2x32xf32>
    %c0_141 = arith.constant 0 : index
    %c14 = arith.constant 14 : index
    %c0_142 = arith.constant 0 : index
    %545 = vector.load %arg5[%c0_141, %c14, %c0_142] : memref<2x32x32xf32, #tpu.memory_space<vmem>>, vector<2x1x32xf32>
    %546 = vector.shape_cast %545 : vector<2x1x32xf32> to vector<2x32xf32>
    %547 = vector.shape_cast %544 : vector<2x32xf32> to vector<2x1x32xf32>
    tpu.vector_store %arg5[%c0_141, %c14, %c0_142], %547 {strides = array<i32>} : memref<2x32x32xf32, #tpu.memory_space<vmem>>, vector<2x1x32xf32>,
    %c0_i32_143 = arith.constant 0 : i32
    %548 = arith.addi %6, %c0_i32_143 : i32
    %c15_i32 = arith.constant 15 : i32
    %549 = arith.addi %7, %c15_i32 : i32
    %550 = arith.index_cast %548 : i32 to index
    %551 = arith.index_cast %549 : i32 to index
    %552 = memref.load %arg2[%550, %551] : memref<2x32xi32, #tpu.memory_space<smem>>
    %553 = arith.index_cast %552 : i32 to index
    %c0_144 = arith.constant 0 : index
    %554 = vector.load %arg3[%553, %c0_144] : memref<32x128xf32, #tpu.memory_space<vmem>>, vector<1x128xf32>
    %c1_i32_145 = arith.constant 1 : i32
    %555 = arith.addi %6, %c1_i32_145 : i32
    %c15_i32_146 = arith.constant 15 : i32
    %556 = arith.addi %7, %c15_i32_146 : i32
    %557 = arith.index_cast %555 : i32 to index
    %558 = arith.index_cast %556 : i32 to index
    %559 = memref.load %arg2[%557, %558] : memref<2x32xi32, #tpu.memory_space<smem>>
    %560 = arith.index_cast %559 : i32 to index
    %c0_147 = arith.constant 0 : index
    %561 = vector.load %arg3[%560, %c0_147] : memref<32x128xf32, #tpu.memory_space<vmem>>, vector<1x128xf32>
    %562 = tpu.concatenate %554, %561 in 0 : vector<1x128xf32>, vector<1x128xf32> -> vector<2x128xf32>
    %563 = arith.truncf %544 : vector<2x32xf32> to vector<2x32xbf16>
    %cst_148 = arith.constant dense<0.000000e+00> : vector<2x128xf32>
    %564 = tpu.matmul %563, %3, %cst_148 {dimension_numbers = #tpu.dot_dimension_numbers<[1], [1], [0], [0], [0, 0, 1, 0], [], []>} : vector<2x32xbf16>, vector<128x32xbf16>, vector<2x128xf32> -> vector<2x128xf32>
    %565 = arith.addf %562, %564 : vector<2x128xf32>
    %566 = arith.negf %565 : vector<2x128xf32>
    %567 = math.exp %566 : vector<2x128xf32>
    %cst_149 = arith.constant 1.000000e+00 : f32
    %568 = vector.broadcast %cst_149 : f32 to vector<2x128xf32>
    %569 = arith.addf %568, %567 : vector<2x128xf32>
    %570 = arith.divf %568, %569 : vector<2x128xf32>
    %571 = math.tanh %565 : vector<2x128xf32>
    %572 = vector.extract_strided_slice %570 {offsets = [0, 0], sizes = [2, 32], strides = [1, 1]} : vector<2x128xf32> to vector<2x32xf32>
    %573 = vector.extract_strided_slice %570 {offsets = [0, 32], sizes = [2, 32], strides = [1, 1]} : vector<2x128xf32> to vector<2x32xf32>
    %574 = vector.extract_strided_slice %571 {offsets = [0, 64], sizes = [2, 32], strides = [1, 1]} : vector<2x128xf32> to vector<2x32xf32>
    %575 = vector.extract_strided_slice %570 {offsets = [0, 96], sizes = [2, 32], strides = [1, 1]} : vector<2x128xf32> to vector<2x32xf32>
    %576 = arith.mulf %573, %542 : vector<2x32xf32>
    %577 = arith.mulf %572, %574 : vector<2x32xf32>
    %578 = arith.addf %576, %577 : vector<2x32xf32>
    %579 = math.tanh %578 : vector<2x32xf32>
    %580 = arith.mulf %575, %579 : vector<2x32xf32>
    %c0_150 = arith.constant 0 : index
    %c15 = arith.constant 15 : index
    %c0_151 = arith.constant 0 : index
    %581 = vector.load %arg5[%c0_150, %c15, %c0_151] : memref<2x32x32xf32, #tpu.memory_space<vmem>>, vector<2x1x32xf32>
    %582 = vector.shape_cast %581 : vector<2x1x32xf32> to vector<2x32xf32>
    %583 = vector.shape_cast %580 : vector<2x32xf32> to vector<2x1x32xf32>
    tpu.vector_store %arg5[%c0_150, %c15, %c0_151], %583 {strides = array<i32>} : memref<2x32x32xf32, #tpu.memory_space<vmem>>, vector<2x1x32xf32>,
    %c0_i32_152 = arith.constant 0 : i32
    %584 = arith.addi %6, %c0_i32_152 : i32
    %c16_i32 = arith.constant 16 : i32
    %585 = arith.addi %7, %c16_i32 : i32
    %586 = arith.index_cast %584 : i32 to index
    %587 = arith.index_cast %585 : i32 to index
    %588 = memref.load %arg2[%586, %587] : memref<2x32xi32, #tpu.memory_space<smem>>
    %589 = arith.index_cast %588 : i32 to index
    %c0_153 = arith.constant 0 : index
    %590 = vector.load %arg3[%589, %c0_153] : memref<32x128xf32, #tpu.memory_space<vmem>>, vector<1x128xf32>
    %c1_i32_154 = arith.constant 1 : i32
    %591 = arith.addi %6, %c1_i32_154 : i32
    %c16_i32_155 = arith.constant 16 : i32
    %592 = arith.addi %7, %c16_i32_155 : i32
    %593 = arith.index_cast %591 : i32 to index
    %594 = arith.index_cast %592 : i32 to index
    %595 = memref.load %arg2[%593, %594] : memref<2x32xi32, #tpu.memory_space<smem>>
    %596 = arith.index_cast %595 : i32 to index
    %c0_156 = arith.constant 0 : index
    %597 = vector.load %arg3[%596, %c0_156] : memref<32x128xf32, #tpu.memory_space<vmem>>, vector<1x128xf32>
    %598 = tpu.concatenate %590, %597 in 0 : vector<1x128xf32>, vector<1x128xf32> -> vector<2x128xf32>
    %599 = arith.truncf %580 : vector<2x32xf32> to vector<2x32xbf16>
    %cst_157 = arith.constant dense<0.000000e+00> : vector<2x128xf32>
    %600 = tpu.matmul %599, %3, %cst_157 {dimension_numbers = #tpu.dot_dimension_numbers<[1], [1], [0], [0], [0, 0, 1, 0], [], []>} : vector<2x32xbf16>, vector<128x32xbf16>, vector<2x128xf32> -> vector<2x128xf32>
    %601 = arith.addf %598, %600 : vector<2x128xf32>
    %602 = arith.negf %601 : vector<2x128xf32>
    %603 = math.exp %602 : vector<2x128xf32>
    %cst_158 = arith.constant 1.000000e+00 : f32
    %604 = vector.broadcast %cst_158 : f32 to vector<2x128xf32>
    %605 = arith.addf %604, %603 : vector<2x128xf32>
    %606 = arith.divf %604, %605 : vector<2x128xf32>
    %607 = math.tanh %601 : vector<2x128xf32>
    %608 = vector.extract_strided_slice %606 {offsets = [0, 0], sizes = [2, 32], strides = [1, 1]} : vector<2x128xf32> to vector<2x32xf32>
    %609 = vector.extract_strided_slice %606 {offsets = [0, 32], sizes = [2, 32], strides = [1, 1]} : vector<2x128xf32> to vector<2x32xf32>
    %610 = vector.extract_strided_slice %607 {offsets = [0, 64], sizes = [2, 32], strides = [1, 1]} : vector<2x128xf32> to vector<2x32xf32>
    %611 = vector.extract_strided_slice %606 {offsets = [0, 96], sizes = [2, 32], strides = [1, 1]} : vector<2x128xf32> to vector<2x32xf32>
    %612 = arith.mulf %609, %578 : vector<2x32xf32>
    %613 = arith.mulf %608, %610 : vector<2x32xf32>
    %614 = arith.addf %612, %613 : vector<2x32xf32>
    %615 = math.tanh %614 : vector<2x32xf32>
    %616 = arith.mulf %611, %615 : vector<2x32xf32>
    %c0_159 = arith.constant 0 : index
    %c16 = arith.constant 16 : index
    %c0_160 = arith.constant 0 : index
    %617 = vector.load %arg5[%c0_159, %c16, %c0_160] : memref<2x32x32xf32, #tpu.memory_space<vmem>>, vector<2x1x32xf32>
    %618 = vector.shape_cast %617 : vector<2x1x32xf32> to vector<2x32xf32>
    %619 = vector.shape_cast %616 : vector<2x32xf32> to vector<2x1x32xf32>
    tpu.vector_store %arg5[%c0_159, %c16, %c0_160], %619 {strides = array<i32>} : memref<2x32x32xf32, #tpu.memory_space<vmem>>, vector<2x1x32xf32>,
    %c0_i32_161 = arith.constant 0 : i32
    %620 = arith.addi %6, %c0_i32_161 : i32
    %c17_i32 = arith.constant 17 : i32
    %621 = arith.addi %7, %c17_i32 : i32
    %622 = arith.index_cast %620 : i32 to index
    %623 = arith.index_cast %621 : i32 to index
    %624 = memref.load %arg2[%622, %623] : memref<2x32xi32, #tpu.memory_space<smem>>
    %625 = arith.index_cast %624 : i32 to index
    %c0_162 = arith.constant 0 : index
    %626 = vector.load %arg3[%625, %c0_162] : memref<32x128xf32, #tpu.memory_space<vmem>>, vector<1x128xf32>
    %c1_i32_163 = arith.constant 1 : i32
    %627 = arith.addi %6, %c1_i32_163 : i32
    %c17_i32_164 = arith.constant 17 : i32
    %628 = arith.addi %7, %c17_i32_164 : i32
    %629 = arith.index_cast %627 : i32 to index
    %630 = arith.index_cast %628 : i32 to index
    %631 = memref.load %arg2[%629, %630] : memref<2x32xi32, #tpu.memory_space<smem>>
    %632 = arith.index_cast %631 : i32 to index
    %c0_165 = arith.constant 0 : index
    %633 = vector.load %arg3[%632, %c0_165] : memref<32x128xf32, #tpu.memory_space<vmem>>, vector<1x128xf32>
    %634 = tpu.concatenate %626, %633 in 0 : vector<1x128xf32>, vector<1x128xf32> -> vector<2x128xf32>
    %635 = arith.truncf %616 : vector<2x32xf32> to vector<2x32xbf16>
    %cst_166 = arith.constant dense<0.000000e+00> : vector<2x128xf32>
    %636 = tpu.matmul %635, %3, %cst_166 {dimension_numbers = #tpu.dot_dimension_numbers<[1], [1], [0], [0], [0, 0, 1, 0], [], []>} : vector<2x32xbf16>, vector<128x32xbf16>, vector<2x128xf32> -> vector<2x128xf32>
    %637 = arith.addf %634, %636 : vector<2x128xf32>
    %638 = arith.negf %637 : vector<2x128xf32>
    %639 = math.exp %638 : vector<2x128xf32>
    %cst_167 = arith.constant 1.000000e+00 : f32
    %640 = vector.broadcast %cst_167 : f32 to vector<2x128xf32>
    %641 = arith.addf %640, %639 : vector<2x128xf32>
    %642 = arith.divf %640, %641 : vector<2x128xf32>
    %643 = math.tanh %637 : vector<2x128xf32>
    %644 = vector.extract_strided_slice %642 {offsets = [0, 0], sizes = [2, 32], strides = [1, 1]} : vector<2x128xf32> to vector<2x32xf32>
    %645 = vector.extract_strided_slice %642 {offsets = [0, 32], sizes = [2, 32], strides = [1, 1]} : vector<2x128xf32> to vector<2x32xf32>
    %646 = vector.extract_strided_slice %643 {offsets = [0, 64], sizes = [2, 32], strides = [1, 1]} : vector<2x128xf32> to vector<2x32xf32>
    %647 = vector.extract_strided_slice %642 {offsets = [0, 96], sizes = [2, 32], strides = [1, 1]} : vector<2x128xf32> to vector<2x32xf32>
    %648 = arith.mulf %645, %614 : vector<2x32xf32>
    %649 = arith.mulf %644, %646 : vector<2x32xf32>
    %650 = arith.addf %648, %649 : vector<2x32xf32>
    %651 = math.tanh %650 : vector<2x32xf32>
    %652 = arith.mulf %647, %651 : vector<2x32xf32>
    %c0_168 = arith.constant 0 : index
    %c17 = arith.constant 17 : index
    %c0_169 = arith.constant 0 : index
    %653 = vector.load %arg5[%c0_168, %c17, %c0_169] : memref<2x32x32xf32, #tpu.memory_space<vmem>>, vector<2x1x32xf32>
    %654 = vector.shape_cast %653 : vector<2x1x32xf32> to vector<2x32xf32>
    %655 = vector.shape_cast %652 : vector<2x32xf32> to vector<2x1x32xf32>
    tpu.vector_store %arg5[%c0_168, %c17, %c0_169], %655 {strides = array<i32>} : memref<2x32x32xf32, #tpu.memory_space<vmem>>, vector<2x1x32xf32>,
    %c0_i32_170 = arith.constant 0 : i32
    %656 = arith.addi %6, %c0_i32_170 : i32
    %c18_i32 = arith.constant 18 : i32
    %657 = arith.addi %7, %c18_i32 : i32
    %658 = arith.index_cast %656 : i32 to index
    %659 = arith.index_cast %657 : i32 to index
    %660 = memref.load %arg2[%658, %659] : memref<2x32xi32, #tpu.memory_space<smem>>
    %661 = arith.index_cast %660 : i32 to index
    %c0_171 = arith.constant 0 : index
    %662 = vector.load %arg3[%661, %c0_171] : memref<32x128xf32, #tpu.memory_space<vmem>>, vector<1x128xf32>
    %c1_i32_172 = arith.constant 1 : i32
    %663 = arith.addi %6, %c1_i32_172 : i32
    %c18_i32_173 = arith.constant 18 : i32
    %664 = arith.addi %7, %c18_i32_173 : i32
    %665 = arith.index_cast %663 : i32 to index
    %666 = arith.index_cast %664 : i32 to index
    %667 = memref.load %arg2[%665, %666] : memref<2x32xi32, #tpu.memory_space<smem>>
    %668 = arith.index_cast %667 : i32 to index
    %c0_174 = arith.constant 0 : index
    %669 = vector.load %arg3[%668, %c0_174] : memref<32x128xf32, #tpu.memory_space<vmem>>, vector<1x128xf32>
    %670 = tpu.concatenate %662, %669 in 0 : vector<1x128xf32>, vector<1x128xf32> -> vector<2x128xf32>
    %671 = arith.truncf %652 : vector<2x32xf32> to vector<2x32xbf16>
    %cst_175 = arith.constant dense<0.000000e+00> : vector<2x128xf32>
    %672 = tpu.matmul %671, %3, %cst_175 {dimension_numbers = #tpu.dot_dimension_numbers<[1], [1], [0], [0], [0, 0, 1, 0], [], []>} : vector<2x32xbf16>, vector<128x32xbf16>, vector<2x128xf32> -> vector<2x128xf32>
    %673 = arith.addf %670, %672 : vector<2x128xf32>
    %674 = arith.negf %673 : vector<2x128xf32>
    %675 = math.exp %674 : vector<2x128xf32>
    %cst_176 = arith.constant 1.000000e+00 : f32
    %676 = vector.broadcast %cst_176 : f32 to vector<2x128xf32>
    %677 = arith.addf %676, %675 : vector<2x128xf32>
    %678 = arith.divf %676, %677 : vector<2x128xf32>
    %679 = math.tanh %673 : vector<2x128xf32>
    %680 = vector.extract_strided_slice %678 {offsets = [0, 0], sizes = [2, 32], strides = [1, 1]} : vector<2x128xf32> to vector<2x32xf32>
    %681 = vector.extract_strided_slice %678 {offsets = [0, 32], sizes = [2, 32], strides = [1, 1]} : vector<2x128xf32> to vector<2x32xf32>
    %682 = vector.extract_strided_slice %679 {offsets = [0, 64], sizes = [2, 32], strides = [1, 1]} : vector<2x128xf32> to vector<2x32xf32>
    %683 = vector.extract_strided_slice %678 {offsets = [0, 96], sizes = [2, 32], strides = [1, 1]} : vector<2x128xf32> to vector<2x32xf32>
    %684 = arith.mulf %681, %650 : vector<2x32xf32>
    %685 = arith.mulf %680, %682 : vector<2x32xf32>
    %686 = arith.addf %684, %685 : vector<2x32xf32>
    %687 = math.tanh %686 : vector<2x32xf32>
    %688 = arith.mulf %683, %687 : vector<2x32xf32>
    %c0_177 = arith.constant 0 : index
    %c18 = arith.constant 18 : index
    %c0_178 = arith.constant 0 : index
    %689 = vector.load %arg5[%c0_177, %c18, %c0_178] : memref<2x32x32xf32, #tpu.memory_space<vmem>>, vector<2x1x32xf32>
    %690 = vector.shape_cast %689 : vector<2x1x32xf32> to vector<2x32xf32>
    %691 = vector.shape_cast %688 : vector<2x32xf32> to vector<2x1x32xf32>
    tpu.vector_store %arg5[%c0_177, %c18, %c0_178], %691 {strides = array<i32>} : memref<2x32x32xf32, #tpu.memory_space<vmem>>, vector<2x1x32xf32>,
    %c0_i32_179 = arith.constant 0 : i32
    %692 = arith.addi %6, %c0_i32_179 : i32
    %c19_i32 = arith.constant 19 : i32
    %693 = arith.addi %7, %c19_i32 : i32
    %694 = arith.index_cast %692 : i32 to index
    %695 = arith.index_cast %693 : i32 to index
    %696 = memref.load %arg2[%694, %695] : memref<2x32xi32, #tpu.memory_space<smem>>
    %697 = arith.index_cast %696 : i32 to index
    %c0_180 = arith.constant 0 : index
    %698 = vector.load %arg3[%697, %c0_180] : memref<32x128xf32, #tpu.memory_space<vmem>>, vector<1x128xf32>
    %c1_i32_181 = arith.constant 1 : i32
    %699 = arith.addi %6, %c1_i32_181 : i32
    %c19_i32_182 = arith.constant 19 : i32
    %700 = arith.addi %7, %c19_i32_182 : i32
    %701 = arith.index_cast %699 : i32 to index
    %702 = arith.index_cast %700 : i32 to index
    %703 = memref.load %arg2[%701, %702] : memref<2x32xi32, #tpu.memory_space<smem>>
    %704 = arith.index_cast %703 : i32 to index
    %c0_183 = arith.constant 0 : index
    %705 = vector.load %arg3[%704, %c0_183] : memref<32x128xf32, #tpu.memory_space<vmem>>, vector<1x128xf32>
    %706 = tpu.concatenate %698, %705 in 0 : vector<1x128xf32>, vector<1x128xf32> -> vector<2x128xf32>
    %707 = arith.truncf %688 : vector<2x32xf32> to vector<2x32xbf16>
    %cst_184 = arith.constant dense<0.000000e+00> : vector<2x128xf32>
    %708 = tpu.matmul %707, %3, %cst_184 {dimension_numbers = #tpu.dot_dimension_numbers<[1], [1], [0], [0], [0, 0, 1, 0], [], []>} : vector<2x32xbf16>, vector<128x32xbf16>, vector<2x128xf32> -> vector<2x128xf32>
    %709 = arith.addf %706, %708 : vector<2x128xf32>
    %710 = arith.negf %709 : vector<2x128xf32>
    %711 = math.exp %710 : vector<2x128xf32>
    %cst_185 = arith.constant 1.000000e+00 : f32
    %712 = vector.broadcast %cst_185 : f32 to vector<2x128xf32>
    %713 = arith.addf %712, %711 : vector<2x128xf32>
    %714 = arith.divf %712, %713 : vector<2x128xf32>
    %715 = math.tanh %709 : vector<2x128xf32>
    %716 = vector.extract_strided_slice %714 {offsets = [0, 0], sizes = [2, 32], strides = [1, 1]} : vector<2x128xf32> to vector<2x32xf32>
    %717 = vector.extract_strided_slice %714 {offsets = [0, 32], sizes = [2, 32], strides = [1, 1]} : vector<2x128xf32> to vector<2x32xf32>
    %718 = vector.extract_strided_slice %715 {offsets = [0, 64], sizes = [2, 32], strides = [1, 1]} : vector<2x128xf32> to vector<2x32xf32>
    %719 = vector.extract_strided_slice %714 {offsets = [0, 96], sizes = [2, 32], strides = [1, 1]} : vector<2x128xf32> to vector<2x32xf32>
    %720 = arith.mulf %717, %686 : vector<2x32xf32>
    %721 = arith.mulf %716, %718 : vector<2x32xf32>
    %722 = arith.addf %720, %721 : vector<2x32xf32>
    %723 = math.tanh %722 : vector<2x32xf32>
    %724 = arith.mulf %719, %723 : vector<2x32xf32>
    %c0_186 = arith.constant 0 : index
    %c19 = arith.constant 19 : index
    %c0_187 = arith.constant 0 : index
    %725 = vector.load %arg5[%c0_186, %c19, %c0_187] : memref<2x32x32xf32, #tpu.memory_space<vmem>>, vector<2x1x32xf32>
    %726 = vector.shape_cast %725 : vector<2x1x32xf32> to vector<2x32xf32>
    %727 = vector.shape_cast %724 : vector<2x32xf32> to vector<2x1x32xf32>
    tpu.vector_store %arg5[%c0_186, %c19, %c0_187], %727 {strides = array<i32>} : memref<2x32x32xf32, #tpu.memory_space<vmem>>, vector<2x1x32xf32>,
    %c0_i32_188 = arith.constant 0 : i32
    %728 = arith.addi %6, %c0_i32_188 : i32
    %c20_i32 = arith.constant 20 : i32
    %729 = arith.addi %7, %c20_i32 : i32
    %730 = arith.index_cast %728 : i32 to index
    %731 = arith.index_cast %729 : i32 to index
    %732 = memref.load %arg2[%730, %731] : memref<2x32xi32, #tpu.memory_space<smem>>
    %733 = arith.index_cast %732 : i32 to index
    %c0_189 = arith.constant 0 : index
    %734 = vector.load %arg3[%733, %c0_189] : memref<32x128xf32, #tpu.memory_space<vmem>>, vector<1x128xf32>
    %c1_i32_190 = arith.constant 1 : i32
    %735 = arith.addi %6, %c1_i32_190 : i32
    %c20_i32_191 = arith.constant 20 : i32
    %736 = arith.addi %7, %c20_i32_191 : i32
    %737 = arith.index_cast %735 : i32 to index
    %738 = arith.index_cast %736 : i32 to index
    %739 = memref.load %arg2[%737, %738] : memref<2x32xi32, #tpu.memory_space<smem>>
    %740 = arith.index_cast %739 : i32 to index
    %c0_192 = arith.constant 0 : index
    %741 = vector.load %arg3[%740, %c0_192] : memref<32x128xf32, #tpu.memory_space<vmem>>, vector<1x128xf32>
    %742 = tpu.concatenate %734, %741 in 0 : vector<1x128xf32>, vector<1x128xf32> -> vector<2x128xf32>
    %743 = arith.truncf %724 : vector<2x32xf32> to vector<2x32xbf16>
    %cst_193 = arith.constant dense<0.000000e+00> : vector<2x128xf32>
    %744 = tpu.matmul %743, %3, %cst_193 {dimension_numbers = #tpu.dot_dimension_numbers<[1], [1], [0], [0], [0, 0, 1, 0], [], []>} : vector<2x32xbf16>, vector<128x32xbf16>, vector<2x128xf32> -> vector<2x128xf32>
    %745 = arith.addf %742, %744 : vector<2x128xf32>
    %746 = arith.negf %745 : vector<2x128xf32>
    %747 = math.exp %746 : vector<2x128xf32>
    %cst_194 = arith.constant 1.000000e+00 : f32
    %748 = vector.broadcast %cst_194 : f32 to vector<2x128xf32>
    %749 = arith.addf %748, %747 : vector<2x128xf32>
    %750 = arith.divf %748, %749 : vector<2x128xf32>
    %751 = math.tanh %745 : vector<2x128xf32>
    %752 = vector.extract_strided_slice %750 {offsets = [0, 0], sizes = [2, 32], strides = [1, 1]} : vector<2x128xf32> to vector<2x32xf32>
    %753 = vector.extract_strided_slice %750 {offsets = [0, 32], sizes = [2, 32], strides = [1, 1]} : vector<2x128xf32> to vector<2x32xf32>
    %754 = vector.extract_strided_slice %751 {offsets = [0, 64], sizes = [2, 32], strides = [1, 1]} : vector<2x128xf32> to vector<2x32xf32>
    %755 = vector.extract_strided_slice %750 {offsets = [0, 96], sizes = [2, 32], strides = [1, 1]} : vector<2x128xf32> to vector<2x32xf32>
    %756 = arith.mulf %753, %722 : vector<2x32xf32>
    %757 = arith.mulf %752, %754 : vector<2x32xf32>
    %758 = arith.addf %756, %757 : vector<2x32xf32>
    %759 = math.tanh %758 : vector<2x32xf32>
    %760 = arith.mulf %755, %759 : vector<2x32xf32>
    %c0_195 = arith.constant 0 : index
    %c20 = arith.constant 20 : index
    %c0_196 = arith.constant 0 : index
    %761 = vector.load %arg5[%c0_195, %c20, %c0_196] : memref<2x32x32xf32, #tpu.memory_space<vmem>>, vector<2x1x32xf32>
    %762 = vector.shape_cast %761 : vector<2x1x32xf32> to vector<2x32xf32>
    %763 = vector.shape_cast %760 : vector<2x32xf32> to vector<2x1x32xf32>
    tpu.vector_store %arg5[%c0_195, %c20, %c0_196], %763 {strides = array<i32>} : memref<2x32x32xf32, #tpu.memory_space<vmem>>, vector<2x1x32xf32>,
    %c0_i32_197 = arith.constant 0 : i32
    %764 = arith.addi %6, %c0_i32_197 : i32
    %c21_i32 = arith.constant 21 : i32
    %765 = arith.addi %7, %c21_i32 : i32
    %766 = arith.index_cast %764 : i32 to index
    %767 = arith.index_cast %765 : i32 to index
    %768 = memref.load %arg2[%766, %767] : memref<2x32xi32, #tpu.memory_space<smem>>
    %769 = arith.index_cast %768 : i32 to index
    %c0_198 = arith.constant 0 : index
    %770 = vector.load %arg3[%769, %c0_198] : memref<32x128xf32, #tpu.memory_space<vmem>>, vector<1x128xf32>
    %c1_i32_199 = arith.constant 1 : i32
    %771 = arith.addi %6, %c1_i32_199 : i32
    %c21_i32_200 = arith.constant 21 : i32
    %772 = arith.addi %7, %c21_i32_200 : i32
    %773 = arith.index_cast %771 : i32 to index
    %774 = arith.index_cast %772 : i32 to index
    %775 = memref.load %arg2[%773, %774] : memref<2x32xi32, #tpu.memory_space<smem>>
    %776 = arith.index_cast %775 : i32 to index
    %c0_201 = arith.constant 0 : index
    %777 = vector.load %arg3[%776, %c0_201] : memref<32x128xf32, #tpu.memory_space<vmem>>, vector<1x128xf32>
    %778 = tpu.concatenate %770, %777 in 0 : vector<1x128xf32>, vector<1x128xf32> -> vector<2x128xf32>
    %779 = arith.truncf %760 : vector<2x32xf32> to vector<2x32xbf16>
    %cst_202 = arith.constant dense<0.000000e+00> : vector<2x128xf32>
    %780 = tpu.matmul %779, %3, %cst_202 {dimension_numbers = #tpu.dot_dimension_numbers<[1], [1], [0], [0], [0, 0, 1, 0], [], []>} : vector<2x32xbf16>, vector<128x32xbf16>, vector<2x128xf32> -> vector<2x128xf32>
    %781 = arith.addf %778, %780 : vector<2x128xf32>
    %782 = arith.negf %781 : vector<2x128xf32>
    %783 = math.exp %782 : vector<2x128xf32>
    %cst_203 = arith.constant 1.000000e+00 : f32
    %784 = vector.broadcast %cst_203 : f32 to vector<2x128xf32>
    %785 = arith.addf %784, %783 : vector<2x128xf32>
    %786 = arith.divf %784, %785 : vector<2x128xf32>
    %787 = math.tanh %781 : vector<2x128xf32>
    %788 = vector.extract_strided_slice %786 {offsets = [0, 0], sizes = [2, 32], strides = [1, 1]} : vector<2x128xf32> to vector<2x32xf32>
    %789 = vector.extract_strided_slice %786 {offsets = [0, 32], sizes = [2, 32], strides = [1, 1]} : vector<2x128xf32> to vector<2x32xf32>
    %790 = vector.extract_strided_slice %787 {offsets = [0, 64], sizes = [2, 32], strides = [1, 1]} : vector<2x128xf32> to vector<2x32xf32>
    %791 = vector.extract_strided_slice %786 {offsets = [0, 96], sizes = [2, 32], strides = [1, 1]} : vector<2x128xf32> to vector<2x32xf32>
    %792 = arith.mulf %789, %758 : vector<2x32xf32>
    %793 = arith.mulf %788, %790 : vector<2x32xf32>
    %794 = arith.addf %792, %793 : vector<2x32xf32>
    %795 = math.tanh %794 : vector<2x32xf32>
    %796 = arith.mulf %791, %795 : vector<2x32xf32>
    %c0_204 = arith.constant 0 : index
    %c21 = arith.constant 21 : index
    %c0_205 = arith.constant 0 : index
    %797 = vector.load %arg5[%c0_204, %c21, %c0_205] : memref<2x32x32xf32, #tpu.memory_space<vmem>>, vector<2x1x32xf32>
    %798 = vector.shape_cast %797 : vector<2x1x32xf32> to vector<2x32xf32>
    %799 = vector.shape_cast %796 : vector<2x32xf32> to vector<2x1x32xf32>
    tpu.vector_store %arg5[%c0_204, %c21, %c0_205], %799 {strides = array<i32>} : memref<2x32x32xf32, #tpu.memory_space<vmem>>, vector<2x1x32xf32>,
    %c0_i32_206 = arith.constant 0 : i32
    %800 = arith.addi %6, %c0_i32_206 : i32
    %c22_i32 = arith.constant 22 : i32
    %801 = arith.addi %7, %c22_i32 : i32
    %802 = arith.index_cast %800 : i32 to index
    %803 = arith.index_cast %801 : i32 to index
    %804 = memref.load %arg2[%802, %803] : memref<2x32xi32, #tpu.memory_space<smem>>
    %805 = arith.index_cast %804 : i32 to index
    %c0_207 = arith.constant 0 : index
    %806 = vector.load %arg3[%805, %c0_207] : memref<32x128xf32, #tpu.memory_space<vmem>>, vector<1x128xf32>
    %c1_i32_208 = arith.constant 1 : i32
    %807 = arith.addi %6, %c1_i32_208 : i32
    %c22_i32_209 = arith.constant 22 : i32
    %808 = arith.addi %7, %c22_i32_209 : i32
    %809 = arith.index_cast %807 : i32 to index
    %810 = arith.index_cast %808 : i32 to index
    %811 = memref.load %arg2[%809, %810] : memref<2x32xi32, #tpu.memory_space<smem>>
    %812 = arith.index_cast %811 : i32 to index
    %c0_210 = arith.constant 0 : index
    %813 = vector.load %arg3[%812, %c0_210] : memref<32x128xf32, #tpu.memory_space<vmem>>, vector<1x128xf32>
    %814 = tpu.concatenate %806, %813 in 0 : vector<1x128xf32>, vector<1x128xf32> -> vector<2x128xf32>
    %815 = arith.truncf %796 : vector<2x32xf32> to vector<2x32xbf16>
    %cst_211 = arith.constant dense<0.000000e+00> : vector<2x128xf32>
    %816 = tpu.matmul %815, %3, %cst_211 {dimension_numbers = #tpu.dot_dimension_numbers<[1], [1], [0], [0], [0, 0, 1, 0], [], []>} : vector<2x32xbf16>, vector<128x32xbf16>, vector<2x128xf32> -> vector<2x128xf32>
    %817 = arith.addf %814, %816 : vector<2x128xf32>
    %818 = arith.negf %817 : vector<2x128xf32>
    %819 = math.exp %818 : vector<2x128xf32>
    %cst_212 = arith.constant 1.000000e+00 : f32
    %820 = vector.broadcast %cst_212 : f32 to vector<2x128xf32>
    %821 = arith.addf %820, %819 : vector<2x128xf32>
    %822 = arith.divf %820, %821 : vector<2x128xf32>
    %823 = math.tanh %817 : vector<2x128xf32>
    %824 = vector.extract_strided_slice %822 {offsets = [0, 0], sizes = [2, 32], strides = [1, 1]} : vector<2x128xf32> to vector<2x32xf32>
    %825 = vector.extract_strided_slice %822 {offsets = [0, 32], sizes = [2, 32], strides = [1, 1]} : vector<2x128xf32> to vector<2x32xf32>
    %826 = vector.extract_strided_slice %823 {offsets = [0, 64], sizes = [2, 32], strides = [1, 1]} : vector<2x128xf32> to vector<2x32xf32>
    %827 = vector.extract_strided_slice %822 {offsets = [0, 96], sizes = [2, 32], strides = [1, 1]} : vector<2x128xf32> to vector<2x32xf32>
    %828 = arith.mulf %825, %794 : vector<2x32xf32>
    %829 = arith.mulf %824, %826 : vector<2x32xf32>
    %830 = arith.addf %828, %829 : vector<2x32xf32>
    %831 = math.tanh %830 : vector<2x32xf32>
    %832 = arith.mulf %827, %831 : vector<2x32xf32>
    %c0_213 = arith.constant 0 : index
    %c22 = arith.constant 22 : index
    %c0_214 = arith.constant 0 : index
    %833 = vector.load %arg5[%c0_213, %c22, %c0_214] : memref<2x32x32xf32, #tpu.memory_space<vmem>>, vector<2x1x32xf32>
    %834 = vector.shape_cast %833 : vector<2x1x32xf32> to vector<2x32xf32>
    %835 = vector.shape_cast %832 : vector<2x32xf32> to vector<2x1x32xf32>
    tpu.vector_store %arg5[%c0_213, %c22, %c0_214], %835 {strides = array<i32>} : memref<2x32x32xf32, #tpu.memory_space<vmem>>, vector<2x1x32xf32>,
    %c0_i32_215 = arith.constant 0 : i32
    %836 = arith.addi %6, %c0_i32_215 : i32
    %c23_i32 = arith.constant 23 : i32
    %837 = arith.addi %7, %c23_i32 : i32
    %838 = arith.index_cast %836 : i32 to index
    %839 = arith.index_cast %837 : i32 to index
    %840 = memref.load %arg2[%838, %839] : memref<2x32xi32, #tpu.memory_space<smem>>
    %841 = arith.index_cast %840 : i32 to index
    %c0_216 = arith.constant 0 : index
    %842 = vector.load %arg3[%841, %c0_216] : memref<32x128xf32, #tpu.memory_space<vmem>>, vector<1x128xf32>
    %c1_i32_217 = arith.constant 1 : i32
    %843 = arith.addi %6, %c1_i32_217 : i32
    %c23_i32_218 = arith.constant 23 : i32
    %844 = arith.addi %7, %c23_i32_218 : i32
    %845 = arith.index_cast %843 : i32 to index
    %846 = arith.index_cast %844 : i32 to index
    %847 = memref.load %arg2[%845, %846] : memref<2x32xi32, #tpu.memory_space<smem>>
    %848 = arith.index_cast %847 : i32 to index
    %c0_219 = arith.constant 0 : index
    %849 = vector.load %arg3[%848, %c0_219] : memref<32x128xf32, #tpu.memory_space<vmem>>, vector<1x128xf32>
    %850 = tpu.concatenate %842, %849 in 0 : vector<1x128xf32>, vector<1x128xf32> -> vector<2x128xf32>
    %851 = arith.truncf %832 : vector<2x32xf32> to vector<2x32xbf16>
    %cst_220 = arith.constant dense<0.000000e+00> : vector<2x128xf32>
    %852 = tpu.matmul %851, %3, %cst_220 {dimension_numbers = #tpu.dot_dimension_numbers<[1], [1], [0], [0], [0, 0, 1, 0], [], []>} : vector<2x32xbf16>, vector<128x32xbf16>, vector<2x128xf32> -> vector<2x128xf32>
    %853 = arith.addf %850, %852 : vector<2x128xf32>
    %854 = arith.negf %853 : vector<2x128xf32>
    %855 = math.exp %854 : vector<2x128xf32>
    %cst_221 = arith.constant 1.000000e+00 : f32
    %856 = vector.broadcast %cst_221 : f32 to vector<2x128xf32>
    %857 = arith.addf %856, %855 : vector<2x128xf32>
    %858 = arith.divf %856, %857 : vector<2x128xf32>
    %859 = math.tanh %853 : vector<2x128xf32>
    %860 = vector.extract_strided_slice %858 {offsets = [0, 0], sizes = [2, 32], strides = [1, 1]} : vector<2x128xf32> to vector<2x32xf32>
    %861 = vector.extract_strided_slice %858 {offsets = [0, 32], sizes = [2, 32], strides = [1, 1]} : vector<2x128xf32> to vector<2x32xf32>
    %862 = vector.extract_strided_slice %859 {offsets = [0, 64], sizes = [2, 32], strides = [1, 1]} : vector<2x128xf32> to vector<2x32xf32>
    %863 = vector.extract_strided_slice %858 {offsets = [0, 96], sizes = [2, 32], strides = [1, 1]} : vector<2x128xf32> to vector<2x32xf32>
    %864 = arith.mulf %861, %830 : vector<2x32xf32>
    %865 = arith.mulf %860, %862 : vector<2x32xf32>
    %866 = arith.addf %864, %865 : vector<2x32xf32>
    %867 = math.tanh %866 : vector<2x32xf32>
    %868 = arith.mulf %863, %867 : vector<2x32xf32>
    %c0_222 = arith.constant 0 : index
    %c23 = arith.constant 23 : index
    %c0_223 = arith.constant 0 : index
    %869 = vector.load %arg5[%c0_222, %c23, %c0_223] : memref<2x32x32xf32, #tpu.memory_space<vmem>>, vector<2x1x32xf32>
    %870 = vector.shape_cast %869 : vector<2x1x32xf32> to vector<2x32xf32>
    %871 = vector.shape_cast %868 : vector<2x32xf32> to vector<2x1x32xf32>
    tpu.vector_store %arg5[%c0_222, %c23, %c0_223], %871 {strides = array<i32>} : memref<2x32x32xf32, #tpu.memory_space<vmem>>, vector<2x1x32xf32>,
    %c0_i32_224 = arith.constant 0 : i32
    %872 = arith.addi %6, %c0_i32_224 : i32
    %c24_i32 = arith.constant 24 : i32
    %873 = arith.addi %7, %c24_i32 : i32
    %874 = arith.index_cast %872 : i32 to index
    %875 = arith.index_cast %873 : i32 to index
    %876 = memref.load %arg2[%874, %875] : memref<2x32xi32, #tpu.memory_space<smem>>
    %877 = arith.index_cast %876 : i32 to index
    %c0_225 = arith.constant 0 : index
    %878 = vector.load %arg3[%877, %c0_225] : memref<32x128xf32, #tpu.memory_space<vmem>>, vector<1x128xf32>
    %c1_i32_226 = arith.constant 1 : i32
    %879 = arith.addi %6, %c1_i32_226 : i32
    %c24_i32_227 = arith.constant 24 : i32
    %880 = arith.addi %7, %c24_i32_227 : i32
    %881 = arith.index_cast %879 : i32 to index
    %882 = arith.index_cast %880 : i32 to index
    %883 = memref.load %arg2[%881, %882] : memref<2x32xi32, #tpu.memory_space<smem>>
    %884 = arith.index_cast %883 : i32 to index
    %c0_228 = arith.constant 0 : index
    %885 = vector.load %arg3[%884, %c0_228] : memref<32x128xf32, #tpu.memory_space<vmem>>, vector<1x128xf32>
    %886 = tpu.concatenate %878, %885 in 0 : vector<1x128xf32>, vector<1x128xf32> -> vector<2x128xf32>
    %887 = arith.truncf %868 : vector<2x32xf32> to vector<2x32xbf16>
    %cst_229 = arith.constant dense<0.000000e+00> : vector<2x128xf32>
    %888 = tpu.matmul %887, %3, %cst_229 {dimension_numbers = #tpu.dot_dimension_numbers<[1], [1], [0], [0], [0, 0, 1, 0], [], []>} : vector<2x32xbf16>, vector<128x32xbf16>, vector<2x128xf32> -> vector<2x128xf32>
    %889 = arith.addf %886, %888 : vector<2x128xf32>
    %890 = arith.negf %889 : vector<2x128xf32>
    %891 = math.exp %890 : vector<2x128xf32>
    %cst_230 = arith.constant 1.000000e+00 : f32
    %892 = vector.broadcast %cst_230 : f32 to vector<2x128xf32>
    %893 = arith.addf %892, %891 : vector<2x128xf32>
    %894 = arith.divf %892, %893 : vector<2x128xf32>
    %895 = math.tanh %889 : vector<2x128xf32>
    %896 = vector.extract_strided_slice %894 {offsets = [0, 0], sizes = [2, 32], strides = [1, 1]} : vector<2x128xf32> to vector<2x32xf32>
    %897 = vector.extract_strided_slice %894 {offsets = [0, 32], sizes = [2, 32], strides = [1, 1]} : vector<2x128xf32> to vector<2x32xf32>
    %898 = vector.extract_strided_slice %895 {offsets = [0, 64], sizes = [2, 32], strides = [1, 1]} : vector<2x128xf32> to vector<2x32xf32>
    %899 = vector.extract_strided_slice %894 {offsets = [0, 96], sizes = [2, 32], strides = [1, 1]} : vector<2x128xf32> to vector<2x32xf32>
    %900 = arith.mulf %897, %866 : vector<2x32xf32>
    %901 = arith.mulf %896, %898 : vector<2x32xf32>
    %902 = arith.addf %900, %901 : vector<2x32xf32>
    %903 = math.tanh %902 : vector<2x32xf32>
    %904 = arith.mulf %899, %903 : vector<2x32xf32>
    %c0_231 = arith.constant 0 : index
    %c24 = arith.constant 24 : index
    %c0_232 = arith.constant 0 : index
    %905 = vector.load %arg5[%c0_231, %c24, %c0_232] : memref<2x32x32xf32, #tpu.memory_space<vmem>>, vector<2x1x32xf32>
    %906 = vector.shape_cast %905 : vector<2x1x32xf32> to vector<2x32xf32>
    %907 = vector.shape_cast %904 : vector<2x32xf32> to vector<2x1x32xf32>
    tpu.vector_store %arg5[%c0_231, %c24, %c0_232], %907 {strides = array<i32>} : memref<2x32x32xf32, #tpu.memory_space<vmem>>, vector<2x1x32xf32>,
    %c0_i32_233 = arith.constant 0 : i32
    %908 = arith.addi %6, %c0_i32_233 : i32
    %c25_i32 = arith.constant 25 : i32
    %909 = arith.addi %7, %c25_i32 : i32
    %910 = arith.index_cast %908 : i32 to index
    %911 = arith.index_cast %909 : i32 to index
    %912 = memref.load %arg2[%910, %911] : memref<2x32xi32, #tpu.memory_space<smem>>
    %913 = arith.index_cast %912 : i32 to index
    %c0_234 = arith.constant 0 : index
    %914 = vector.load %arg3[%913, %c0_234] : memref<32x128xf32, #tpu.memory_space<vmem>>, vector<1x128xf32>
    %c1_i32_235 = arith.constant 1 : i32
    %915 = arith.addi %6, %c1_i32_235 : i32
    %c25_i32_236 = arith.constant 25 : i32
    %916 = arith.addi %7, %c25_i32_236 : i32
    %917 = arith.index_cast %915 : i32 to index
    %918 = arith.index_cast %916 : i32 to index
    %919 = memref.load %arg2[%917, %918] : memref<2x32xi32, #tpu.memory_space<smem>>
    %920 = arith.index_cast %919 : i32 to index
    %c0_237 = arith.constant 0 : index
    %921 = vector.load %arg3[%920, %c0_237] : memref<32x128xf32, #tpu.memory_space<vmem>>, vector<1x128xf32>
    %922 = tpu.concatenate %914, %921 in 0 : vector<1x128xf32>, vector<1x128xf32> -> vector<2x128xf32>
    %923 = arith.truncf %904 : vector<2x32xf32> to vector<2x32xbf16>
    %cst_238 = arith.constant dense<0.000000e+00> : vector<2x128xf32>
    %924 = tpu.matmul %923, %3, %cst_238 {dimension_numbers = #tpu.dot_dimension_numbers<[1], [1], [0], [0], [0, 0, 1, 0], [], []>} : vector<2x32xbf16>, vector<128x32xbf16>, vector<2x128xf32> -> vector<2x128xf32>
    %925 = arith.addf %922, %924 : vector<2x128xf32>
    %926 = arith.negf %925 : vector<2x128xf32>
    %927 = math.exp %926 : vector<2x128xf32>
    %cst_239 = arith.constant 1.000000e+00 : f32
    %928 = vector.broadcast %cst_239 : f32 to vector<2x128xf32>
    %929 = arith.addf %928, %927 : vector<2x128xf32>
    %930 = arith.divf %928, %929 : vector<2x128xf32>
    %931 = math.tanh %925 : vector<2x128xf32>
    %932 = vector.extract_strided_slice %930 {offsets = [0, 0], sizes = [2, 32], strides = [1, 1]} : vector<2x128xf32> to vector<2x32xf32>
    %933 = vector.extract_strided_slice %930 {offsets = [0, 32], sizes = [2, 32], strides = [1, 1]} : vector<2x128xf32> to vector<2x32xf32>
    %934 = vector.extract_strided_slice %931 {offsets = [0, 64], sizes = [2, 32], strides = [1, 1]} : vector<2x128xf32> to vector<2x32xf32>
    %935 = vector.extract_strided_slice %930 {offsets = [0, 96], sizes = [2, 32], strides = [1, 1]} : vector<2x128xf32> to vector<2x32xf32>
    %936 = arith.mulf %933, %902 : vector<2x32xf32>
    %937 = arith.mulf %932, %934 : vector<2x32xf32>
    %938 = arith.addf %936, %937 : vector<2x32xf32>
    %939 = math.tanh %938 : vector<2x32xf32>
    %940 = arith.mulf %935, %939 : vector<2x32xf32>
    %c0_240 = arith.constant 0 : index
    %c25 = arith.constant 25 : index
    %c0_241 = arith.constant 0 : index
    %941 = vector.load %arg5[%c0_240, %c25, %c0_241] : memref<2x32x32xf32, #tpu.memory_space<vmem>>, vector<2x1x32xf32>
    %942 = vector.shape_cast %941 : vector<2x1x32xf32> to vector<2x32xf32>
    %943 = vector.shape_cast %940 : vector<2x32xf32> to vector<2x1x32xf32>
    tpu.vector_store %arg5[%c0_240, %c25, %c0_241], %943 {strides = array<i32>} : memref<2x32x32xf32, #tpu.memory_space<vmem>>, vector<2x1x32xf32>,
    %c0_i32_242 = arith.constant 0 : i32
    %944 = arith.addi %6, %c0_i32_242 : i32
    %c26_i32 = arith.constant 26 : i32
    %945 = arith.addi %7, %c26_i32 : i32
    %946 = arith.index_cast %944 : i32 to index
    %947 = arith.index_cast %945 : i32 to index
    %948 = memref.load %arg2[%946, %947] : memref<2x32xi32, #tpu.memory_space<smem>>
    %949 = arith.index_cast %948 : i32 to index
    %c0_243 = arith.constant 0 : index
    %950 = vector.load %arg3[%949, %c0_243] : memref<32x128xf32, #tpu.memory_space<vmem>>, vector<1x128xf32>
    %c1_i32_244 = arith.constant 1 : i32
    %951 = arith.addi %6, %c1_i32_244 : i32
    %c26_i32_245 = arith.constant 26 : i32
    %952 = arith.addi %7, %c26_i32_245 : i32
    %953 = arith.index_cast %951 : i32 to index
    %954 = arith.index_cast %952 : i32 to index
    %955 = memref.load %arg2[%953, %954] : memref<2x32xi32, #tpu.memory_space<smem>>
    %956 = arith.index_cast %955 : i32 to index
    %c0_246 = arith.constant 0 : index
    %957 = vector.load %arg3[%956, %c0_246] : memref<32x128xf32, #tpu.memory_space<vmem>>, vector<1x128xf32>
    %958 = tpu.concatenate %950, %957 in 0 : vector<1x128xf32>, vector<1x128xf32> -> vector<2x128xf32>
    %959 = arith.truncf %940 : vector<2x32xf32> to vector<2x32xbf16>
    %cst_247 = arith.constant dense<0.000000e+00> : vector<2x128xf32>
    %960 = tpu.matmul %959, %3, %cst_247 {dimension_numbers = #tpu.dot_dimension_numbers<[1], [1], [0], [0], [0, 0, 1, 0], [], []>} : vector<2x32xbf16>, vector<128x32xbf16>, vector<2x128xf32> -> vector<2x128xf32>
    %961 = arith.addf %958, %960 : vector<2x128xf32>
    %962 = arith.negf %961 : vector<2x128xf32>
    %963 = math.exp %962 : vector<2x128xf32>
    %cst_248 = arith.constant 1.000000e+00 : f32
    %964 = vector.broadcast %cst_248 : f32 to vector<2x128xf32>
    %965 = arith.addf %964, %963 : vector<2x128xf32>
    %966 = arith.divf %964, %965 : vector<2x128xf32>
    %967 = math.tanh %961 : vector<2x128xf32>
    %968 = vector.extract_strided_slice %966 {offsets = [0, 0], sizes = [2, 32], strides = [1, 1]} : vector<2x128xf32> to vector<2x32xf32>
    %969 = vector.extract_strided_slice %966 {offsets = [0, 32], sizes = [2, 32], strides = [1, 1]} : vector<2x128xf32> to vector<2x32xf32>
    %970 = vector.extract_strided_slice %967 {offsets = [0, 64], sizes = [2, 32], strides = [1, 1]} : vector<2x128xf32> to vector<2x32xf32>
    %971 = vector.extract_strided_slice %966 {offsets = [0, 96], sizes = [2, 32], strides = [1, 1]} : vector<2x128xf32> to vector<2x32xf32>
    %972 = arith.mulf %969, %938 : vector<2x32xf32>
    %973 = arith.mulf %968, %970 : vector<2x32xf32>
    %974 = arith.addf %972, %973 : vector<2x32xf32>
    %975 = math.tanh %974 : vector<2x32xf32>
    %976 = arith.mulf %971, %975 : vector<2x32xf32>
    %c0_249 = arith.constant 0 : index
    %c26 = arith.constant 26 : index
    %c0_250 = arith.constant 0 : index
    %977 = vector.load %arg5[%c0_249, %c26, %c0_250] : memref<2x32x32xf32, #tpu.memory_space<vmem>>, vector<2x1x32xf32>
    %978 = vector.shape_cast %977 : vector<2x1x32xf32> to vector<2x32xf32>
    %979 = vector.shape_cast %976 : vector<2x32xf32> to vector<2x1x32xf32>
    tpu.vector_store %arg5[%c0_249, %c26, %c0_250], %979 {strides = array<i32>} : memref<2x32x32xf32, #tpu.memory_space<vmem>>, vector<2x1x32xf32>,
    %c0_i32_251 = arith.constant 0 : i32
    %980 = arith.addi %6, %c0_i32_251 : i32
    %c27_i32 = arith.constant 27 : i32
    %981 = arith.addi %7, %c27_i32 : i32
    %982 = arith.index_cast %980 : i32 to index
    %983 = arith.index_cast %981 : i32 to index
    %984 = memref.load %arg2[%982, %983] : memref<2x32xi32, #tpu.memory_space<smem>>
    %985 = arith.index_cast %984 : i32 to index
    %c0_252 = arith.constant 0 : index
    %986 = vector.load %arg3[%985, %c0_252] : memref<32x128xf32, #tpu.memory_space<vmem>>, vector<1x128xf32>
    %c1_i32_253 = arith.constant 1 : i32
    %987 = arith.addi %6, %c1_i32_253 : i32
    %c27_i32_254 = arith.constant 27 : i32
    %988 = arith.addi %7, %c27_i32_254 : i32
    %989 = arith.index_cast %987 : i32 to index
    %990 = arith.index_cast %988 : i32 to index
    %991 = memref.load %arg2[%989, %990] : memref<2x32xi32, #tpu.memory_space<smem>>
    %992 = arith.index_cast %991 : i32 to index
    %c0_255 = arith.constant 0 : index
    %993 = vector.load %arg3[%992, %c0_255] : memref<32x128xf32, #tpu.memory_space<vmem>>, vector<1x128xf32>
    %994 = tpu.concatenate %986, %993 in 0 : vector<1x128xf32>, vector<1x128xf32> -> vector<2x128xf32>
    %995 = arith.truncf %976 : vector<2x32xf32> to vector<2x32xbf16>
    %cst_256 = arith.constant dense<0.000000e+00> : vector<2x128xf32>
    %996 = tpu.matmul %995, %3, %cst_256 {dimension_numbers = #tpu.dot_dimension_numbers<[1], [1], [0], [0], [0, 0, 1, 0], [], []>} : vector<2x32xbf16>, vector<128x32xbf16>, vector<2x128xf32> -> vector<2x128xf32>
    %997 = arith.addf %994, %996 : vector<2x128xf32>
    %998 = arith.negf %997 : vector<2x128xf32>
    %999 = math.exp %998 : vector<2x128xf32>
    %cst_257 = arith.constant 1.000000e+00 : f32
    %1000 = vector.broadcast %cst_257 : f32 to vector<2x128xf32>
    %1001 = arith.addf %1000, %999 : vector<2x128xf32>
    %1002 = arith.divf %1000, %1001 : vector<2x128xf32>
    %1003 = math.tanh %997 : vector<2x128xf32>
    %1004 = vector.extract_strided_slice %1002 {offsets = [0, 0], sizes = [2, 32], strides = [1, 1]} : vector<2x128xf32> to vector<2x32xf32>
    %1005 = vector.extract_strided_slice %1002 {offsets = [0, 32], sizes = [2, 32], strides = [1, 1]} : vector<2x128xf32> to vector<2x32xf32>
    %1006 = vector.extract_strided_slice %1003 {offsets = [0, 64], sizes = [2, 32], strides = [1, 1]} : vector<2x128xf32> to vector<2x32xf32>
    %1007 = vector.extract_strided_slice %1002 {offsets = [0, 96], sizes = [2, 32], strides = [1, 1]} : vector<2x128xf32> to vector<2x32xf32>
    %1008 = arith.mulf %1005, %974 : vector<2x32xf32>
    %1009 = arith.mulf %1004, %1006 : vector<2x32xf32>
    %1010 = arith.addf %1008, %1009 : vector<2x32xf32>
    %1011 = math.tanh %1010 : vector<2x32xf32>
    %1012 = arith.mulf %1007, %1011 : vector<2x32xf32>
    %c0_258 = arith.constant 0 : index
    %c27 = arith.constant 27 : index
    %c0_259 = arith.constant 0 : index
    %1013 = vector.load %arg5[%c0_258, %c27, %c0_259] : memref<2x32x32xf32, #tpu.memory_space<vmem>>, vector<2x1x32xf32>
    %1014 = vector.shape_cast %1013 : vector<2x1x32xf32> to vector<2x32xf32>
    %1015 = vector.shape_cast %1012 : vector<2x32xf32> to vector<2x1x32xf32>
    tpu.vector_store %arg5[%c0_258, %c27, %c0_259], %1015 {strides = array<i32>} : memref<2x32x32xf32, #tpu.memory_space<vmem>>, vector<2x1x32xf32>,
    %c0_i32_260 = arith.constant 0 : i32
    %1016 = arith.addi %6, %c0_i32_260 : i32
    %c28_i32 = arith.constant 28 : i32
    %1017 = arith.addi %7, %c28_i32 : i32
    %1018 = arith.index_cast %1016 : i32 to index
    %1019 = arith.index_cast %1017 : i32 to index
    %1020 = memref.load %arg2[%1018, %1019] : memref<2x32xi32, #tpu.memory_space<smem>>
    %1021 = arith.index_cast %1020 : i32 to index
    %c0_261 = arith.constant 0 : index
    %1022 = vector.load %arg3[%1021, %c0_261] : memref<32x128xf32, #tpu.memory_space<vmem>>, vector<1x128xf32>
    %c1_i32_262 = arith.constant 1 : i32
    %1023 = arith.addi %6, %c1_i32_262 : i32
    %c28_i32_263 = arith.constant 28 : i32
    %1024 = arith.addi %7, %c28_i32_263 : i32
    %1025 = arith.index_cast %1023 : i32 to index
    %1026 = arith.index_cast %1024 : i32 to index
    %1027 = memref.load %arg2[%1025, %1026] : memref<2x32xi32, #tpu.memory_space<smem>>
    %1028 = arith.index_cast %1027 : i32 to index
    %c0_264 = arith.constant 0 : index
    %1029 = vector.load %arg3[%1028, %c0_264] : memref<32x128xf32, #tpu.memory_space<vmem>>, vector<1x128xf32>
    %1030 = tpu.concatenate %1022, %1029 in 0 : vector<1x128xf32>, vector<1x128xf32> -> vector<2x128xf32>
    %1031 = arith.truncf %1012 : vector<2x32xf32> to vector<2x32xbf16>
    %cst_265 = arith.constant dense<0.000000e+00> : vector<2x128xf32>
    %1032 = tpu.matmul %1031, %3, %cst_265 {dimension_numbers = #tpu.dot_dimension_numbers<[1], [1], [0], [0], [0, 0, 1, 0], [], []>} : vector<2x32xbf16>, vector<128x32xbf16>, vector<2x128xf32> -> vector<2x128xf32>
    %1033 = arith.addf %1030, %1032 : vector<2x128xf32>
    %1034 = arith.negf %1033 : vector<2x128xf32>
    %1035 = math.exp %1034 : vector<2x128xf32>
    %cst_266 = arith.constant 1.000000e+00 : f32
    %1036 = vector.broadcast %cst_266 : f32 to vector<2x128xf32>
    %1037 = arith.addf %1036, %1035 : vector<2x128xf32>
    %1038 = arith.divf %1036, %1037 : vector<2x128xf32>
    %1039 = math.tanh %1033 : vector<2x128xf32>
    %1040 = vector.extract_strided_slice %1038 {offsets = [0, 0], sizes = [2, 32], strides = [1, 1]} : vector<2x128xf32> to vector<2x32xf32>
    %1041 = vector.extract_strided_slice %1038 {offsets = [0, 32], sizes = [2, 32], strides = [1, 1]} : vector<2x128xf32> to vector<2x32xf32>
    %1042 = vector.extract_strided_slice %1039 {offsets = [0, 64], sizes = [2, 32], strides = [1, 1]} : vector<2x128xf32> to vector<2x32xf32>
    %1043 = vector.extract_strided_slice %1038 {offsets = [0, 96], sizes = [2, 32], strides = [1, 1]} : vector<2x128xf32> to vector<2x32xf32>
    %1044 = arith.mulf %1041, %1010 : vector<2x32xf32>
    %1045 = arith.mulf %1040, %1042 : vector<2x32xf32>
    %1046 = arith.addf %1044, %1045 : vector<2x32xf32>
    %1047 = math.tanh %1046 : vector<2x32xf32>
    %1048 = arith.mulf %1043, %1047 : vector<2x32xf32>
    %c0_267 = arith.constant 0 : index
    %c28 = arith.constant 28 : index
    %c0_268 = arith.constant 0 : index
    %1049 = vector.load %arg5[%c0_267, %c28, %c0_268] : memref<2x32x32xf32, #tpu.memory_space<vmem>>, vector<2x1x32xf32>
    %1050 = vector.shape_cast %1049 : vector<2x1x32xf32> to vector<2x32xf32>
    %1051 = vector.shape_cast %1048 : vector<2x32xf32> to vector<2x1x32xf32>
    tpu.vector_store %arg5[%c0_267, %c28, %c0_268], %1051 {strides = array<i32>} : memref<2x32x32xf32, #tpu.memory_space<vmem>>, vector<2x1x32xf32>,
    %c0_i32_269 = arith.constant 0 : i32
    %1052 = arith.addi %6, %c0_i32_269 : i32
    %c29_i32 = arith.constant 29 : i32
    %1053 = arith.addi %7, %c29_i32 : i32
    %1054 = arith.index_cast %1052 : i32 to index
    %1055 = arith.index_cast %1053 : i32 to index
    %1056 = memref.load %arg2[%1054, %1055] : memref<2x32xi32, #tpu.memory_space<smem>>
    %1057 = arith.index_cast %1056 : i32 to index
    %c0_270 = arith.constant 0 : index
    %1058 = vector.load %arg3[%1057, %c0_270] : memref<32x128xf32, #tpu.memory_space<vmem>>, vector<1x128xf32>
    %c1_i32_271 = arith.constant 1 : i32
    %1059 = arith.addi %6, %c1_i32_271 : i32
    %c29_i32_272 = arith.constant 29 : i32
    %1060 = arith.addi %7, %c29_i32_272 : i32
    %1061 = arith.index_cast %1059 : i32 to index
    %1062 = arith.index_cast %1060 : i32 to index
    %1063 = memref.load %arg2[%1061, %1062] : memref<2x32xi32, #tpu.memory_space<smem>>
    %1064 = arith.index_cast %1063 : i32 to index
    %c0_273 = arith.constant 0 : index
    %1065 = vector.load %arg3[%1064, %c0_273] : memref<32x128xf32, #tpu.memory_space<vmem>>, vector<1x128xf32>
    %1066 = tpu.concatenate %1058, %1065 in 0 : vector<1x128xf32>, vector<1x128xf32> -> vector<2x128xf32>
    %1067 = arith.truncf %1048 : vector<2x32xf32> to vector<2x32xbf16>
    %cst_274 = arith.constant dense<0.000000e+00> : vector<2x128xf32>
    %1068 = tpu.matmul %1067, %3, %cst_274 {dimension_numbers = #tpu.dot_dimension_numbers<[1], [1], [0], [0], [0, 0, 1, 0], [], []>} : vector<2x32xbf16>, vector<128x32xbf16>, vector<2x128xf32> -> vector<2x128xf32>
    %1069 = arith.addf %1066, %1068 : vector<2x128xf32>
    %1070 = arith.negf %1069 : vector<2x128xf32>
    %1071 = math.exp %1070 : vector<2x128xf32>
    %cst_275 = arith.constant 1.000000e+00 : f32
    %1072 = vector.broadcast %cst_275 : f32 to vector<2x128xf32>
    %1073 = arith.addf %1072, %1071 : vector<2x128xf32>
    %1074 = arith.divf %1072, %1073 : vector<2x128xf32>
    %1075 = math.tanh %1069 : vector<2x128xf32>
    %1076 = vector.extract_strided_slice %1074 {offsets = [0, 0], sizes = [2, 32], strides = [1, 1]} : vector<2x128xf32> to vector<2x32xf32>
    %1077 = vector.extract_strided_slice %1074 {offsets = [0, 32], sizes = [2, 32], strides = [1, 1]} : vector<2x128xf32> to vector<2x32xf32>
    %1078 = vector.extract_strided_slice %1075 {offsets = [0, 64], sizes = [2, 32], strides = [1, 1]} : vector<2x128xf32> to vector<2x32xf32>
    %1079 = vector.extract_strided_slice %1074 {offsets = [0, 96], sizes = [2, 32], strides = [1, 1]} : vector<2x128xf32> to vector<2x32xf32>
    %1080 = arith.mulf %1077, %1046 : vector<2x32xf32>
    %1081 = arith.mulf %1076, %1078 : vector<2x32xf32>
    %1082 = arith.addf %1080, %1081 : vector<2x32xf32>
    %1083 = math.tanh %1082 : vector<2x32xf32>
    %1084 = arith.mulf %1079, %1083 : vector<2x32xf32>
    %c0_276 = arith.constant 0 : index
    %c29 = arith.constant 29 : index
    %c0_277 = arith.constant 0 : index
    %1085 = vector.load %arg5[%c0_276, %c29, %c0_277] : memref<2x32x32xf32, #tpu.memory_space<vmem>>, vector<2x1x32xf32>
    %1086 = vector.shape_cast %1085 : vector<2x1x32xf32> to vector<2x32xf32>
    %1087 = vector.shape_cast %1084 : vector<2x32xf32> to vector<2x1x32xf32>
    tpu.vector_store %arg5[%c0_276, %c29, %c0_277], %1087 {strides = array<i32>} : memref<2x32x32xf32, #tpu.memory_space<vmem>>, vector<2x1x32xf32>,
    %c0_i32_278 = arith.constant 0 : i32
    %1088 = arith.addi %6, %c0_i32_278 : i32
    %c30_i32 = arith.constant 30 : i32
    %1089 = arith.addi %7, %c30_i32 : i32
    %1090 = arith.index_cast %1088 : i32 to index
    %1091 = arith.index_cast %1089 : i32 to index
    %1092 = memref.load %arg2[%1090, %1091] : memref<2x32xi32, #tpu.memory_space<smem>>
    %1093 = arith.index_cast %1092 : i32 to index
    %c0_279 = arith.constant 0 : index
    %1094 = vector.load %arg3[%1093, %c0_279] : memref<32x128xf32, #tpu.memory_space<vmem>>, vector<1x128xf32>
    %c1_i32_280 = arith.constant 1 : i32
    %1095 = arith.addi %6, %c1_i32_280 : i32
    %c30_i32_281 = arith.constant 30 : i32
    %1096 = arith.addi %7, %c30_i32_281 : i32
    %1097 = arith.index_cast %1095 : i32 to index
    %1098 = arith.index_cast %1096 : i32 to index
    %1099 = memref.load %arg2[%1097, %1098] : memref<2x32xi32, #tpu.memory_space<smem>>
    %1100 = arith.index_cast %1099 : i32 to index
    %c0_282 = arith.constant 0 : index
    %1101 = vector.load %arg3[%1100, %c0_282] : memref<32x128xf32, #tpu.memory_space<vmem>>, vector<1x128xf32>
    %1102 = tpu.concatenate %1094, %1101 in 0 : vector<1x128xf32>, vector<1x128xf32> -> vector<2x128xf32>
    %1103 = arith.truncf %1084 : vector<2x32xf32> to vector<2x32xbf16>
    %cst_283 = arith.constant dense<0.000000e+00> : vector<2x128xf32>
    %1104 = tpu.matmul %1103, %3, %cst_283 {dimension_numbers = #tpu.dot_dimension_numbers<[1], [1], [0], [0], [0, 0, 1, 0], [], []>} : vector<2x32xbf16>, vector<128x32xbf16>, vector<2x128xf32> -> vector<2x128xf32>
    %1105 = arith.addf %1102, %1104 : vector<2x128xf32>
    %1106 = arith.negf %1105 : vector<2x128xf32>
    %1107 = math.exp %1106 : vector<2x128xf32>
    %cst_284 = arith.constant 1.000000e+00 : f32
    %1108 = vector.broadcast %cst_284 : f32 to vector<2x128xf32>
    %1109 = arith.addf %1108, %1107 : vector<2x128xf32>
    %1110 = arith.divf %1108, %1109 : vector<2x128xf32>
    %1111 = math.tanh %1105 : vector<2x128xf32>
    %1112 = vector.extract_strided_slice %1110 {offsets = [0, 0], sizes = [2, 32], strides = [1, 1]} : vector<2x128xf32> to vector<2x32xf32>
    %1113 = vector.extract_strided_slice %1110 {offsets = [0, 32], sizes = [2, 32], strides = [1, 1]} : vector<2x128xf32> to vector<2x32xf32>
    %1114 = vector.extract_strided_slice %1111 {offsets = [0, 64], sizes = [2, 32], strides = [1, 1]} : vector<2x128xf32> to vector<2x32xf32>
    %1115 = vector.extract_strided_slice %1110 {offsets = [0, 96], sizes = [2, 32], strides = [1, 1]} : vector<2x128xf32> to vector<2x32xf32>
    %1116 = arith.mulf %1113, %1082 : vector<2x32xf32>
    %1117 = arith.mulf %1112, %1114 : vector<2x32xf32>
    %1118 = arith.addf %1116, %1117 : vector<2x32xf32>
    %1119 = math.tanh %1118 : vector<2x32xf32>
    %1120 = arith.mulf %1115, %1119 : vector<2x32xf32>
    %c0_285 = arith.constant 0 : index
    %c30 = arith.constant 30 : index
    %c0_286 = arith.constant 0 : index
    %1121 = vector.load %arg5[%c0_285, %c30, %c0_286] : memref<2x32x32xf32, #tpu.memory_space<vmem>>, vector<2x1x32xf32>
    %1122 = vector.shape_cast %1121 : vector<2x1x32xf32> to vector<2x32xf32>
    %1123 = vector.shape_cast %1120 : vector<2x32xf32> to vector<2x1x32xf32>
    tpu.vector_store %arg5[%c0_285, %c30, %c0_286], %1123 {strides = array<i32>} : memref<2x32x32xf32, #tpu.memory_space<vmem>>, vector<2x1x32xf32>,
    %c0_i32_287 = arith.constant 0 : i32
    %1124 = arith.addi %6, %c0_i32_287 : i32
    %c31_i32 = arith.constant 31 : i32
    %1125 = arith.addi %7, %c31_i32 : i32
    %1126 = arith.index_cast %1124 : i32 to index
    %1127 = arith.index_cast %1125 : i32 to index
    %1128 = memref.load %arg2[%1126, %1127] : memref<2x32xi32, #tpu.memory_space<smem>>
    %1129 = arith.index_cast %1128 : i32 to index
    %c0_288 = arith.constant 0 : index
    %1130 = vector.load %arg3[%1129, %c0_288] : memref<32x128xf32, #tpu.memory_space<vmem>>, vector<1x128xf32>
    %c1_i32_289 = arith.constant 1 : i32
    %1131 = arith.addi %6, %c1_i32_289 : i32
    %c31_i32_290 = arith.constant 31 : i32
    %1132 = arith.addi %7, %c31_i32_290 : i32
    %1133 = arith.index_cast %1131 : i32 to index
    %1134 = arith.index_cast %1132 : i32 to index
    %1135 = memref.load %arg2[%1133, %1134] : memref<2x32xi32, #tpu.memory_space<smem>>
    %1136 = arith.index_cast %1135 : i32 to index
    %c0_291 = arith.constant 0 : index
    %1137 = vector.load %arg3[%1136, %c0_291] : memref<32x128xf32, #tpu.memory_space<vmem>>, vector<1x128xf32>
    %1138 = tpu.concatenate %1130, %1137 in 0 : vector<1x128xf32>, vector<1x128xf32> -> vector<2x128xf32>
    %1139 = arith.truncf %1120 : vector<2x32xf32> to vector<2x32xbf16>
    %cst_292 = arith.constant dense<0.000000e+00> : vector<2x128xf32>
    %1140 = tpu.matmul %1139, %3, %cst_292 {dimension_numbers = #tpu.dot_dimension_numbers<[1], [1], [0], [0], [0, 0, 1, 0], [], []>} : vector<2x32xbf16>, vector<128x32xbf16>, vector<2x128xf32> -> vector<2x128xf32>
    %1141 = arith.addf %1138, %1140 : vector<2x128xf32>
    %1142 = arith.negf %1141 : vector<2x128xf32>
    %1143 = math.exp %1142 : vector<2x128xf32>
    %cst_293 = arith.constant 1.000000e+00 : f32
    %1144 = vector.broadcast %cst_293 : f32 to vector<2x128xf32>
    %1145 = arith.addf %1144, %1143 : vector<2x128xf32>
    %1146 = arith.divf %1144, %1145 : vector<2x128xf32>
    %1147 = math.tanh %1141 : vector<2x128xf32>
    %1148 = vector.extract_strided_slice %1146 {offsets = [0, 0], sizes = [2, 32], strides = [1, 1]} : vector<2x128xf32> to vector<2x32xf32>
    %1149 = vector.extract_strided_slice %1146 {offsets = [0, 32], sizes = [2, 32], strides = [1, 1]} : vector<2x128xf32> to vector<2x32xf32>
    %1150 = vector.extract_strided_slice %1147 {offsets = [0, 64], sizes = [2, 32], strides = [1, 1]} : vector<2x128xf32> to vector<2x32xf32>
    %1151 = vector.extract_strided_slice %1146 {offsets = [0, 96], sizes = [2, 32], strides = [1, 1]} : vector<2x128xf32> to vector<2x32xf32>
    %1152 = arith.mulf %1149, %1118 : vector<2x32xf32>
    %1153 = arith.mulf %1148, %1150 : vector<2x32xf32>
    %1154 = arith.addf %1152, %1153 : vector<2x32xf32>
    %1155 = math.tanh %1154 : vector<2x32xf32>
    %1156 = arith.mulf %1151, %1155 : vector<2x32xf32>
    %c0_294 = arith.constant 0 : index
    %c31 = arith.constant 31 : index
    %c0_295 = arith.constant 0 : index
    %1157 = vector.load %arg5[%c0_294, %c31, %c0_295] : memref<2x32x32xf32, #tpu.memory_space<vmem>>, vector<2x1x32xf32>
    %1158 = vector.shape_cast %1157 : vector<2x1x32xf32> to vector<2x32xf32>
    %1159 = vector.shape_cast %1156 : vector<2x32xf32> to vector<2x1x32xf32>
    tpu.vector_store %arg5[%c0_294, %c31, %c0_295], %1159 {strides = array<i32>} : memref<2x32x32xf32, #tpu.memory_space<vmem>>, vector<2x1x32xf32>,
    %c0_296 = arith.constant 0 : index
    %c0_297 = arith.constant 0 : index
    %1160 = vector.load %arg8[%c0_296, %c0_297] : memref<2x32xf32, #tpu.memory_space<vmem>>, vector<2x32xf32>
    tpu.vector_store %arg8[%c0_296, %c0_297], %1156 {strides = array<i32>} : memref<2x32xf32, #tpu.memory_space<vmem>>, vector<2x32xf32>,
    %c0_298 = arith.constant 0 : index
    %c0_299 = arith.constant 0 : index
    %1161 = vector.load %arg9[%c0_298, %c0_299] : memref<2x32xf32, #tpu.memory_space<vmem>>, vector<2x32xf32>
    tpu.vector_store %arg9[%c0_298, %c0_299], %1154 {strides = array<i32>} : memref<2x32xf32, #tpu.memory_space<vmem>>, vector<2x32xf32>,
    %c0_i32_300 = arith.constant 0 : i32
    %1162 = arith.cmpi eq, %arg1, %c0_i32_300 : i32
    %1163 = arith.extui %1162 : i1 to i32
    %c0_i32_301 = arith.constant 0 : i32
    %1164 = arith.cmpi ne, %1163, %c0_i32_301 : i32
    scf.if %1164 {
      %1165 = vector.shape_cast %1156 : vector<2x32xf32> to vector<1x2x32xf32>
      %c0_302 = arith.constant 0 : index
      %c0_303 = arith.constant 0 : index
      %c0_304 = arith.constant 0 : index
      %1166 = vector.load %arg6[%c0_302, %c0_303, %c0_304] : memref<1x2x32xf32, #tpu.memory_space<vmem>>, vector<1x2x32xf32>
      tpu.vector_store %arg6[%c0_302, %c0_303, %c0_304], %1165 {strides = array<i32>} : memref<1x2x32xf32, #tpu.memory_space<vmem>>, vector<1x2x32xf32>,
      %1167 = vector.shape_cast %1154 : vector<2x32xf32> to vector<1x2x32xf32>
      %c0_305 = arith.constant 0 : index
      %c0_306 = arith.constant 0 : index
      %c0_307 = arith.constant 0 : index
      %1168 = vector.load %arg7[%c0_305, %c0_306, %c0_307] : memref<1x2x32xf32, #tpu.memory_space<vmem>>, vector<1x2x32xf32>
      tpu.vector_store %arg7[%c0_305, %c0_306, %c0_307], %1167 {strides = array<i32>} : memref<1x2x32xf32, #tpu.memory_space<vmem>>, vector<1x2x32xf32>,
    } else {
    }
    return
  }
  func.func @transform_0(%arg0: i32, %arg1: i32, %arg2: memref<2x32xi32, #tpu.memory_space<smem>>) -> (i32, i32) {
    %c0_i32 = arith.constant 0 : i32
    %c0_i32_0 = arith.constant 0 : i32
    %c0_i32_1 = arith.constant 0 : i32
    return %c0_i32, %c0_i32_0 : i32, i32
  }
  func.func @transform_1(%arg0: i32, %arg1: i32, %arg2: memref<2x32xi32, #tpu.memory_space<smem>>) -> (i32, i32) {
    %c0_i32 = arith.constant 0 : i32
    %c0_i32_0 = arith.constant 0 : i32
    %c0_i32_1 = arith.constant 0 : i32
    return %c0_i32, %c0_i32_0 : i32, i32
  }
  func.func @transform_2(%arg0: i32, %arg1: i32, %arg2: memref<2x32xi32, #tpu.memory_space<smem>>) -> (i32, i32, i32) {
    %c0_i32 = arith.constant 0 : i32
    %c0_i32_0 = arith.constant 0 : i32
    return %arg0, %arg1, %c0_i32 : i32, i32, i32
  }
  func.func @transform_3(%arg0: i32, %arg1: i32, %arg2: memref<2x32xi32, #tpu.memory_space<smem>>) -> (i32, i32, i32) {
    %c0_i32 = arith.constant 0 : i32
    %c0_i32_0 = arith.constant 0 : i32
    %c0_i32_1 = arith.constant 0 : i32
    return %arg0, %c0_i32, %c0_i32_0 : i32, i32, i32
  }
  func.func @transform_4(%arg0: i32, %arg1: i32, %arg2: memref<2x32xi32, #tpu.memory_space<smem>>) -> (i32, i32, i32) {
    %c0_i32 = arith.constant 0 : i32
    %c0_i32_0 = arith.constant 0 : i32
    %c0_i32_1 = arith.constant 0 : i32
    return %arg0, %c0_i32, %c0_i32_0 : i32, i32, i32
  }
}

</mosaic_0001>

<bundles_post_ra>
// kernel: encoder_forward.2
= control target key start
LH: loop header
LB: loop body
LE: loop exit
PB: predicated region body
PF: predicated region fallthrough
CT: control target
= control target key end

     0   :  { %vm52_vm0 = vcmask 130048   ;;  %s294_s1 = inlined_call_operand.vmem [shape: f32[128,16], index: 1, kind: input, shape index: {}]   ;;  %s295_s0 = inlined_call_operand.vmem [shape: f32[32,16], index: 0, kind: input, shape index: {}]   ;;  %s296_s2 = inlined_call_operand.vmem [shape: f32[1,128], index: 2, kind: input, shape index: {}]   ;;  %s297_s3 = inlined_call_operand.vmem [shape: f32[32,128], index: 3, kind: output, shape index: {}]  }
   0x1   :  { %v21_v0 = vld [vmem:[%s294_s1] sm:$0xff]  ;;  %v22_v1 = vld [vmem:[%s294_s1 + $0x8] sm:$0xff]  ;;  %v23_v2 = vld [vmem:[%s294_s1 + $0x10] sm:$0xff] }
   0x2   :  { %v37_v3 = vpack.c.bf16 %v22_v1, %v21_v0  ;;  %v24_v4 = vld [vmem:[%s294_s1 + $0x18] sm:$0xff]  ;;  %v15_v7 = vld [vmem:[%s295_s0] sm:$0xff]  ;;  %v16_v8 = vld [vmem:[%s295_s0 + $0x8] sm:$0xff] }
   0x3   :  { %v38_v5 = vpack.c.bf16 %v24_v4, %v23_v2  ;;  %v25_v9 = vld [vmem:[%s294_s1 + $0x20] sm:$0xff]  ;;  %v26_v10 = vld [vmem:[%s294_s1 + $0x28] sm:$0xff]  ;;  %v19_v11 = vpack.c.bf16 %v16_v8, %v15_v7  ;;  %v27_v14 = vld [vmem:[%s294_s1 + $0x30] sm:$0xff] }
   0x4   :  { %173 = vmatprep.subr.msk.bf16.mxu0 %vm52_vm0, %v37_v3  ;;  %v60_v6 = vsel %vm52_vm0, %v37_v3, 0  ;;  %v39_v13 = vpack.c.bf16 %v26_v10, %v25_v9  ;;  %v28_v15 = vld [vmem:[%s294_s1 + $0x38] sm:$0xff]  ;;  %v29_v18 = vld [vmem:[%s294_s1 + $0x40] sm:$0xff]  ;;  %v30_v19 = vld [vmem:[%s294_s1 + $0x48] sm:$0xff] }
   0x5   :  { %154 = vmatpush3.bf16.xpose.msra.mxu0 %v60_v6  ;;  %169 = vmatprep.mubr.msk.bf16.mxu0 %vm52_vm0, %v19_v11  ;;  %v63_v12 = vsel %vm52_vm0, %v38_v5, 0  ;;  %v40_v17 = vpack.c.bf16 %v28_v15, %v27_v14  ;;  %v41_v21 = vpack.c.bf16 %v30_v19, %v29_v18  ;;  %v31_v22 = vld [vmem:[%s294_s1 + $0x50] sm:$0xff]  ;;  %v32_v23 = vld [vmem:[%s294_s1 + $0x58] sm:$0xff]  ;;  %v33_v26 = vld [vmem:[%s294_s1 + $0x60] sm:$0xff] }
   0x6   :  { %174 = vmatprep.subr.msk.bf16.mxu0 %vm52_vm0, %v38_v5  ;;  %v66_v16 = vsel %vm52_vm0, %v39_v13, 0  ;;  %v42_v25 = vpack.c.bf16 %v32_v23, %v31_v22  ;;  %v34_v27 = vld [vmem:[%s294_s1 + $0x68] sm:$0xff]  ;;  %v35_v30 = vld [vmem:[%s294_s1 + $0x70] sm:$0xff]  ;;  %v36_v31 = vld [vmem:[%s294_s1 + $0x78] sm:$0xff] }
   0x7   :  { %v69_v20 = vsel %vm52_vm0, %v40_v17, 0  ;;  %v72_v24 = vsel %vm52_vm0, %v41_v21, 0  ;;  %v43_v29 = vpack.c.bf16 %v34_v27, %v33_v26  ;;  %v44_v33 = vpack.c.bf16 %v36_v31, %v35_v30  ;;  %v17_v35 = vld [vmem:[%s295_s0 + $0x10] sm:$0xff]  ;;  %v18_v36 = vld [vmem:[%s295_s0 + $0x18] sm:$0xff]  ;;  %v140_v38 = vld [vmem:[%s296_s2] ss:$0 sm:$0xff] }
   0x8   :  { %v75_v28 = vsel %vm52_vm0, %v42_v25, 0  ;;  %v20_v37 = vpack.c.bf16 %v18_v36, %v17_v35 }
   0x9   :  { %v78_v32 = vsel %vm52_vm0, %v43_v29, 0  ;;  %v81_v34 = vsel %vm52_vm0, %v44_v33, 0 }
   0xd   :  { %156 = vmatpush3.bf16.xpose.msra.mxu0 %v63_v12 }
   0xe   :  { %175 = vmatprep.subr.msk.bf16.mxu0 %vm52_vm0, %v39_v13 }
  0x15   :  { %158 = vmatpush3.bf16.xpose.msra.mxu0 %v66_v16 }
  0x16   :  { %176 = vmatprep.subr.msk.bf16.mxu0 %vm52_vm0, %v40_v17 }
  0x1d   :  { %160 = vmatpush3.bf16.xpose.msra.mxu0 %v69_v20 }
  0x1e   :  { %177 = vmatprep.subr.msk.bf16.mxu0 %vm52_vm0, %v41_v21 }
  0x25   :  { %162 = vmatpush3.bf16.xpose.msra.mxu0 %v72_v24 }
  0x26   :  { %178 = vmatprep.subr.msk.bf16.mxu0 %vm52_vm0, %v42_v25 }
  0x2d   :  { %164 = vmatpush3.bf16.xpose.msra.mxu0 %v75_v28 }
  0x2e   :  { %179 = vmatprep.subr.msk.bf16.mxu0 %vm52_vm0, %v43_v29 }
  0x35   :  { %166 = vmatpush3.bf16.xpose.msra.mxu0 %v78_v32 }
  0x36   :  { %180 = vmatprep.subr.msk.bf16.mxu0 %vm52_vm0, %v44_v33 }
  0x3d   :  { %168 = vmatpush3.bf16.xpose.msra.mxu0 %v81_v34 }
  0x44   :  { %170 = vmatmul.mubr.msk.bf16.vlgmr.msra.gmra.mrb[0].mxu0 %vm52_vm0, %v20_v37 }
 0x117   :  { %v171_v39 = vpop.f32.mrb[0].mxu0 }
 0x118   :  { %v126_v40 = vadd.f32 %v171_v39, %v140_v38  ;;  %v117_v41 = vpop.f32.mrb[1].mxu0 }
 0x119   :  { %v118_v42 = vadd.f32 %v140_v38, %v117_v41  ;;  %v172_v43 = vpop.f32.mrb[2].mxu0 }
 0x11a   :  { %134 = vst [vmem:[%s297_s3 + $0x10] sm:$0xff] %v126_v40  ;;  %v129_v44 = vadd.f32 %v172_v43, %v140_v38  ;;  %v120_v45 = vpop.f32.mrb[3].mxu0 }
 0x11b   :  { %132 = vst [vmem:[%s297_s3] sm:$0xff] %v118_v42  ;;  %v121_v46 = vadd.f32 %v140_v38, %v120_v45 }
 0x11c   :  { %135 = vst [vmem:[%s297_s3 + $0x18] sm:$0xff] %v129_v44 }
 0x11d   :  { %133 = vst [vmem:[%s297_s3 + $0x8] sm:$0xff] %v121_v46 }

// kernel: encoder_forward.3
= control target key start
LH: loop header
LB: loop body
LE: loop exit
PB: predicated region body
PF: predicated region fallthrough
CT: control target
= control target key end

     0   :  { %s7612_s0 = inlined_call_operand.vmem [shape: s32[2,32], index: 0, kind: input, shape index: {}]   ;;  %s7613_s1 = inlined_call_operand.vmem [shape: f32[32,128], index: 1, kind: input, shape index: {}]   ;;  %s7614_s2 = inlined_call_operand.vmem [shape: bf16[128,32], index: 2, kind: input, shape index: {}]   ;;  %s7615_s3 = inlined_call_operand.hbm [shape: f32[2,32,32], index: 3, kind: output, shape index: {0}]   ;;  %s7616_s4 = inlined_call_operand.hbm [shape: f32[1,2,32], index: 4, kind: output, shape index: {1}]   ;;  %s7617_s5 = inlined_call_operand.hbm [shape: f32[1,2,32], index: 5, kind: output, shape index: {2}]  }
   0x1   :  { %s11_s20 = sshll.u32 %s7612_s0, 4  ;;  %s12_s20 = int_to_ptr.vmem [resolvable:$true] %s11_s20 }
   0x2   :  { %s5804_s21 = scalar_lea.vmem %s12_s20, 32  ;;  %p5809_p1 = scmp.lt.s32.totalorder %s12_s20, %s12_s20 }
   0x3   :  { %p5805_p0 = scmp.ne.s32.totalorder %s12_s20, %s5804_s21  ;;  %p5810_p2 = scmp.lt.s32.totalorder %s5804_s21, %s5804_s21 }
   0x5   :  { %p5811_p3 = por %p5810_p2, %p5809_p1 }
   0x7   :  { %p5812_p4 = pnand %p5811_p3, %p5805_p0 }
   0x9   :  { %5815 = shalt.err (!%p5812_p4)  }
   0xa   :  { %s5888_s22 = smov [#allocation5]  }
   0xb   :  { %14 = dma.vmem_to_smem %s12_s20, 32, %s5888_s22, [#allocation4] }
   0xc   :  { %5882 = dma.done.wait [#allocation4], 32 }
   0xd   :  { %5883 = vsyncadd [#allocation4], 4294967264 }
   0xe   :  { %16 = sfence }
   0xf   :  { %17 = vsyncpa [#allocation7], 0  ;;  %v5540_v0 = vld [vmem:[%s7614_s2] sm:$0xff]   ;;  %v5889_v1 = vmov 0.0   ;;  %vm114_vm0 = vcmask 261120   ;;  %v5541_v3 = vld [vmem:[%s7614_s2 + $0x8] sm:$0xff]  }
  0x10   :  { %4888 = vmatprep.subr.bf16.mxu0 %v5889_v1  ;;  %4908 = vmatprep.subr.bf16.mxu1 %v5889_v1  ;;  %v5939_v2 = vsel %vm114_vm0, %v5540_v0, 0  ;;  %v5949_v4 = vsel %vm114_vm0, %v5541_v3, 0  ;;  %vm28_vm1 = vcmask 254976   ;;  %vm5890_vm2 = vmmov 0  }
  0x11   :  { %4889 = vmatpush3.bf16.xpose.msra.mxu0 %v5939_v2  ;;  %4909 = vmatpush3.bf16.xpose.msra.mxu1 %v5939_v2  ;;  %29 = vst.msk [vmem:[#allocation2] sm:$0x3] %vm28_vm1, %v5889_v1  ;;  %30 = vst.msk [vmem:[#allocation3] sm:$0x3] %vm28_vm1, %v5889_v1 }
  0x12   :  { %4890 = vmatprep.subr.bf16.mxu0 %v5889_v1  ;;  %4910 = vmatprep.subr.bf16.mxu1 %v5889_v1 }
  0x13   :  { %4904 = vmatprep.mubr.msk.bf16.mxu0 %vm5890_vm2, %v5889_v1  ;;  %4924 = vmatprep.mubr.msk.bf16.mxu1 %vm5890_vm2, %v5889_v1 }
  0x14   :  { %18 = vsyncpa [#allocation9], 0  ;;  %v5542_v5 = vld [vmem:[%s7614_s2 + $0x10] sm:$0xff]   ;;  %v5543_v7 = vld [vmem:[%s7614_s2 + $0x18] sm:$0xff]   ;;  %s58_s13 = sld [smem:[#allocation5]]  ;;  %vm71_vm3 = vcmask 1040384  }
  0x15   :  { %v5967_v6 = vsel %vm114_vm0, %v5542_v5, 0  ;;  %v5977_v8 = vsel %vm114_vm0, %v5543_v7, 0  ;;  %v5544_v9 = vld [vmem:[%s7614_s2 + $0x20] sm:$0xff]   ;;  %v5545_v11 = vld [vmem:[%s7614_s2 + $0x28] sm:$0xff]   ;;  %v5546_v13 = vld [vmem:[%s7614_s2 + $0x30] sm:$0xff]   ;;  %s5891_s20 = smov 64  }
  0x16   :  { %v5987_v10 = vsel %vm114_vm0, %v5544_v9, 0  ;;  %v5997_v12 = vsel %vm114_vm0, %v5545_v11, 0  ;;  %v6007_v14 = vsel %vm114_vm0, %v5546_v13, 0  ;;  %v5547_v15 = vld [vmem:[%s7614_s2 + $0x38] sm:$0xff]   ;;  %s4465_s2 = sld [smem:[#allocation5 + $0x80]]  ;;  %s5892_s21 = smov 32  }
  0x17   :  { %v6017_v16 = vsel %vm114_vm0, %v5547_v15, 0  ;;  %s4477_s22 = sld [smem:[#allocation5 + $0x81]]  ;;  %s4481_s29 = sld [smem:[#allocation5 + $0x82]]  ;;  %vm248_vm4 = vcmask 253952  }
  0x18   :  { %v47_v17 = vld [vmem:[#allocation2] sm:$0x3]  ;;  %v48_v29 = vld [vmem:[#allocation3] sm:$0x3]  ;;  %s4476_s23 = sld [smem:[#allocation5 + $0x1]]  ;;  %s4480_s30 = sld [smem:[#allocation5 + $0x2]] }
  0x19   :  { %4891 = vmatpush3.bf16.xpose.msra.mxu0 %v5949_v4  ;;  %4911 = vmatpush3.bf16.xpose.msra.mxu1 %v5949_v4  ;;  %v73_v18 = vpack.c.bf16 %v47_v17, %v47_v17  ;;  %s4485_s12 = sld [smem:[#allocation5 + $0x83]] }
  0x1a   :  { %4892 = vmatprep.subr.bf16.mxu0 %v5889_v1  ;;  %4912 = vmatprep.subr.bf16.mxu1 %v5889_v1  ;;  %s59_s19 = scalar_lea.vmem %s7613_s1, %s58_s13 }
  0x1b   :  { %v60_v21 = vld [vmem:[%s59_s19] sm:$0x1]  ;;  %s4489_s19 = sld [smem:[#allocation5 + $0x84]] }
  0x1c   :  { %s66_s16 = scalar_lea.vmem %s7613_s1, %s4465_s2  ;;  %s4484_s2 = sld [smem:[#allocation5 + $0x3]] }
  0x1d   :  { %v67_v19 = vld [vmem:[%s66_s16] sm:$0x1]  ;;  %s266_s25 = scalar_lea.vmem %s7613_s1, %s4477_s22  ;;  %s398_s8 = scalar_lea.vmem %s7613_s1, %s4481_s29 }
  0x1e   :  { %v69_v20 = vrot.slane %v67_v19, 7  ;;  %v267_v45 = vld [vmem:[%s266_s25] sm:$0x1]  ;;  %s260_s28 = scalar_lea.vmem %s7613_s1, %s4476_s23  ;;  %s392_s11 = scalar_lea.vmem %s7613_s1, %s4480_s30 }
  0x1f   :  { %v269_v46 = vrot.slane %v267_v45, 7  ;;  %v261_v47 = vld [vmem:[%s260_s28] sm:$0x1]  ;;  %s530_s15 = scalar_lea.vmem %s7613_s1, %s4485_s12  ;;  %s4488_s22 = sld [smem:[#allocation5 + $0x4]] }
  0x20   :  { %v72_v22 = vsel %vm71_vm3, %v60_v21, %v69_v20  ;;  %v399_v11 = vld [vmem:[%s398_s8] sm:$0x1]  ;;  %s4493_s28 = sld [smem:[#allocation5 + $0x85]]  ;;  %s4496_s12 = sld [smem:[#allocation5 + $0x6]] }
  0x21   :  { %4893 = vmatpush3.bf16.xpose.msra.mxu0 %v5967_v6  ;;  %4913 = vmatpush3.bf16.xpose.msra.mxu1 %v5967_v6  ;;  %v271_v48 = vsel %vm71_vm3, %v261_v47, %v269_v46  ;;  %v401_v13 = vrot.slane %v399_v11, 7  ;;  %v393_v15 = vld [vmem:[%s392_s11] sm:$0x1]  ;;  %s662_s0 = scalar_lea.vmem %s7613_s1, %s4489_s19  ;;  %s4492_s29 = sld [smem:[#allocation5 + $0x5]] }
  0x22   :  { %4894 = vmatprep.subr.bf16.mxu0 %v5889_v1  ;;  %4914 = vmatprep.subr.bf16.mxu1 %v5889_v1  ;;  %s524_s18 = scalar_lea.vmem %s7613_s1, %s4484_s2  ;;  %s4497_s11 = sld [smem:[#allocation5 + $0x86]] }
  0x23   :  { %v403_v17 = vsel %vm71_vm3, %v393_v15, %v401_v13  ;;  %s4500_s19 = sld [smem:[#allocation5 + $0x7]] }
  0x25   :  { %s656_s27 = scalar_lea.vmem %s7613_s1, %s4488_s22 }
  0x26   :  { %s794_s7 = scalar_lea.vmem %s7613_s1, %s4493_s28  ;;  %s920_s17 = scalar_lea.vmem %s7613_s1, %s4496_s12 }
  0x27   :  { %s788_s10 = scalar_lea.vmem %s7613_s1, %s4492_s29  ;;  %s4504_s28 = sld [smem:[#allocation5 + $0x8]] }
  0x28   :  { %s926_s14 = scalar_lea.vmem %s7613_s1, %s4497_s11  ;;  %s4508_s11 = sld [smem:[#allocation5 + $0x9]] }
  0x29   :  { %4895 = vmatpush3.bf16.xpose.msra.mxu0 %v5977_v8  ;;  %4915 = vmatpush3.bf16.xpose.msra.mxu1 %v5977_v8  ;;  %s1052_s26 = scalar_lea.vmem %s7613_s1, %s4500_s19 }
  0x2a   :  { %4896 = vmatprep.subr.bf16.mxu0 %v5889_v1  ;;  %4916 = vmatprep.subr.bf16.mxu1 %v5889_v1 }
  0x2d   :  { %s1184_s9 = scalar_lea.vmem %s7613_s1, %s4504_s28 }
  0x2e   :  { %s1316_s16 = scalar_lea.vmem %s7613_s1, %s4508_s11 }
  0x31   :  { %4897 = vmatpush3.bf16.xpose.msra.mxu0 %v5987_v10  ;;  %4917 = vmatpush3.bf16.xpose.msra.mxu1 %v5987_v10 }
  0x32   :  { %4898 = vmatprep.subr.bf16.mxu0 %v5889_v1  ;;  %4918 = vmatprep.subr.bf16.mxu1 %v5889_v1 }
  0x39   :  { %4899 = vmatpush3.bf16.xpose.msra.mxu0 %v5997_v12  ;;  %4919 = vmatpush3.bf16.xpose.msra.mxu1 %v5997_v12 }
  0x3a   :  { %4900 = vmatprep.subr.bf16.mxu0 %v5889_v1  ;;  %4920 = vmatprep.subr.bf16.mxu1 %v5889_v1 }
  0x41   :  { %4901 = vmatpush3.bf16.xpose.msra.mxu0 %v6007_v14  ;;  %4921 = vmatpush3.bf16.xpose.msra.mxu1 %v6007_v14 }
  0x42   :  { %4902 = vmatprep.subr.bf16.mxu0 %v5889_v1  ;;  %4922 = vmatprep.subr.bf16.mxu1 %v5889_v1 }
  0x49   :  { %4903 = vmatpush3.bf16.xpose.msra.mxu0 %v6017_v16  ;;  %4923 = vmatpush3.bf16.xpose.msra.mxu1 %v6017_v16 }
  0x4a   :  { %4928 = vmatprep.subr.bf16.mxu0 %v5889_v1  ;;  %4948 = vmatprep.subr.bf16.mxu1 %v5889_v1 }
  0x50   :  { %4905 = vmatmul.mubr.msk.bf16.vlgmr.msra.gmra.mrb[0].mxu0 %vm114_vm0, %v73_v18 }
  0x51   :  { %4929 = vmatpush3.bf16.xpose.msra.mxu0 %v5939_v2  ;;  %4944 = vmatprep.mubr.msk.bf16.mxu0 %vm5890_vm2, %v5889_v1 }
  0x52   :  { %4930 = vmatprep.subr.bf16.mxu0 %v5889_v1 }
  0x59   :  { %4931 = vmatpush3.bf16.xpose.msra.mxu0 %v5949_v4 }
  0x5a   :  { %4932 = vmatprep.subr.bf16.mxu0 %v5889_v1 }
  0x61   :  { %4933 = vmatpush3.bf16.xpose.msra.mxu0 %v5967_v6 }
  0x62   :  { %4934 = vmatprep.subr.bf16.mxu0 %v5889_v1 }
  0x69   :  { %4935 = vmatpush3.bf16.xpose.msra.mxu0 %v5977_v8 }
  0x6a   :  { %4936 = vmatprep.subr.bf16.mxu0 %v5889_v1 }
  0x71   :  { %4937 = vmatpush3.bf16.xpose.msra.mxu0 %v5987_v10 }
  0x72   :  { %4938 = vmatprep.subr.bf16.mxu0 %v5889_v1 }
  0x79   :  { %4939 = vmatpush3.bf16.xpose.msra.mxu0 %v5997_v12 }
  0x7a   :  { %4940 = vmatprep.subr.bf16.mxu0 %v5889_v1 }
  0x81   :  { %4941 = vmatpush3.bf16.xpose.msra.mxu0 %v6007_v14 }
  0x82   :  { %4942 = vmatprep.subr.bf16.mxu0 %v5889_v1 }
  0x89   :  { %4943 = vmatpush3.bf16.xpose.msra.mxu0 %v6017_v16 }
  0x8a   :  { %4968 = vmatprep.subr.bf16.mxu0 %v5889_v1 }
 0x123   :  { %v176_v23 = vpop.f32.mrb[0].mxu0 }
 0x124   :  { %v182_v24 = vadd.f32 %v176_v23, %v72_v22  ;;  %v4906_v25 = vpop.f32.mrb[1].mxu0 }
 0x125   :  { %v179_v26 = vpop.f32.mrb[2].mxu0 }
 0x126   :  { %5548 = vtanh.f32 %v182_v24  ;;  %v4907_v27 = vpop.f32.mrb[3].mxu0  ;;  %v4475_v30 = vmul.f32 -1.442695, %v182_v24 }
 0x128   :  { %5550 = vpow2.f32 %v4475_v30 }
 0x130   :  { %v5549_v28 = vpop.eup %5548 }
 0x131   :  { %196 = vrot.lane.b32.xlu0 %v5549_v28, %s5891_s20 }
 0x132   :  { %v5551_v31 = vpop.eup %5550 }
 0x133   :  { %v186_v32 = vadd.f32 1.0, %v5551_v31 }
 0x135   :  { %191 = vrot.lane.b32.xlu0 %v48_v29, %s5892_s21  ;;  %5552 = vrcp.f32 %v186_v32 }
 0x13f   :  { %v5553_v33 = vpop.eup %5552 }
 0x1a3   :  { %v197_v34 = vpop.permute.xlu0 %196 }
 0x1a4   :  { %v199_v35 = vmul.f32 %v5553_v33, %v197_v34 }
 0x1a6   :  { %201 = vrot.lane.b32.xlu1 %v199_v35, %s5892_s21 }
 0x1a7   :  { %v192_v36 = vpop.permute.xlu0 %191 }
 0x1a8   :  { %v194_v37 = vmul.f32 %v5553_v33, %v192_v36 }
 0x218   :  { %v202_v38 = vpop.permute.xlu1 %201 }
 0x219   :  { %v204_v39 = vadd.f32 %v202_v38, %v194_v37  ;;  %v531_v38 = vld [vmem:[%s530_s15] sm:$0x1] }
 0x21b   :  { %5554 = vtanh.f32 %v204_v39 }
 0x225   :  { %v5555_v40 = vpop.eup %5554 }
 0x226   :  { %207 = vrot.lane.b32.xlu1 %v5555_v40, %s5891_s20  ;;  %v525_v40 = vld [vmem:[%s524_s18] sm:$0x1]  ;;  %s4501_s18 = sld [smem:[#allocation5 + $0x87]] }
 0x22c   :  { %s1058_s24 = scalar_lea.vmem %s7613_s1, %s4501_s18  ;;  %s4512_s18 = sld [smem:[#allocation5 + $0xa]] }
 0x232   :  { %s1448_s25 = scalar_lea.vmem %s7613_s1, %s4512_s18 }
 0x298   :  { %v208_v41 = vpop.permute.xlu1 %207 }
 0x299   :  { %v6053_v42 = vmul.f32 %v5553_v33, %v208_v41 }
 0x29b   :  { %v272_v43 = vpack.c.bf16 %v6053_v42, %v6053_v42 }
 0x29d   :  { %274 = vrot.lane.b32.xlu0 %v272_v43, %s5892_s21 }
 0x30f   :  { %v275_v44 = vpop.permute.xlu0 %274 }
 0x310   :  { %4925 = vmatmul.mubr.msk.bf16.vlgmr.msra.gmra.mrb[0].mxu1 %vm114_vm0, %v275_v44 }
 0x311   :  { %4949 = vmatpush3.bf16.xpose.msra.mxu1 %v5939_v2  ;;  %4964 = vmatprep.mubr.msk.bf16.mxu1 %vm5890_vm2, %v5889_v1 }
 0x312   :  { %4950 = vmatprep.subr.bf16.mxu1 %v5889_v1 }
 0x319   :  { %4951 = vmatpush3.bf16.xpose.msra.mxu1 %v5949_v4 }
 0x31a   :  { %4952 = vmatprep.subr.bf16.mxu1 %v5889_v1 }
 0x321   :  { %4953 = vmatpush3.bf16.xpose.msra.mxu1 %v5967_v6 }
 0x322   :  { %4954 = vmatprep.subr.bf16.mxu1 %v5889_v1 }
 0x329   :  { %4955 = vmatpush3.bf16.xpose.msra.mxu1 %v5977_v8 }
 0x32a   :  { %4956 = vmatprep.subr.bf16.mxu1 %v5889_v1 }
 0x331   :  { %4957 = vmatpush3.bf16.xpose.msra.mxu1 %v5987_v10 }
 0x332   :  { %4958 = vmatprep.subr.bf16.mxu1 %v5889_v1 }
 0x339   :  { %4959 = vmatpush3.bf16.xpose.msra.mxu1 %v5997_v12 }
 0x33a   :  { %4960 = vmatprep.subr.bf16.mxu1 %v5889_v1 }
 0x341   :  { %4961 = vmatpush3.bf16.xpose.msra.mxu1 %v6007_v14 }
 0x342   :  { %4962 = vmatprep.subr.bf16.mxu1 %v5889_v1 }
 0x349   :  { %4963 = vmatpush3.bf16.xpose.msra.mxu1 %v6017_v16 }
 0x34a   :  { %4988 = vmatprep.subr.bf16.mxu1 %v5889_v1 }
 0x3e3   :  { %v313_v49 = vpop.f32.mrb[0].mxu1 }
 0x3e4   :  { %v319_v50 = vadd.f32 %v313_v49, %v271_v48  ;;  %v4926_v51 = vpop.f32.mrb[1].mxu1 }
 0x3e5   :  { %v316_v52 = vpop.f32.mrb[2].mxu1 }
 0x3e6   :  { %5556 = vtanh.f32 %v319_v50  ;;  %v4927_v53 = vpop.f32.mrb[3].mxu1  ;;  %v4479_v55 = vmul.f32 -1.442695, %v319_v50 }
 0x3e8   :  { %5558 = vpow2.f32 %v4479_v55 }
 0x3f0   :  { %v5557_v54 = vpop.eup %5556 }
 0x3f1   :  { %329 = vrot.lane.b32.xlu1 %v5557_v54, %s5891_s20 }
 0x3f2   :  { %v5559_v56 = vpop.eup %5558 }
 0x3f3   :  { %v323_v57 = vadd.f32 1.0, %v5559_v56 }
 0x3f5   :  { %5560 = vrcp.f32 %v323_v57 }
 0x3ff   :  { %v5561_v58 = vpop.eup %5560 }
 0x400   :  { %v327_v61 = vmul.f32 %v5561_v58, %v204_v39  ;;  %v533_v39 = vrot.slane %v531_v38, 7 }
 0x402   :  { %v535_v41 = vsel %vm71_vm3, %v525_v40, %v533_v39 }
 0x463   :  { %v330_v59 = vpop.permute.xlu1 %329 }
 0x464   :  { %v332_v60 = vmul.f32 %v5561_v58, %v330_v59 }
 0x466   :  { %334 = vrot.lane.b32.xlu0 %v332_v60, %s5892_s21 }
 0x4d8   :  { %v335_v62 = vpop.permute.xlu0 %334 }
 0x4d9   :  { %v337_v63 = vadd.f32 %v335_v62, %v327_v61 }
 0x4db   :  { %5562 = vtanh.f32 %v337_v63 }
 0x4e5   :  { %v5563_v0 = vpop.eup %5562 }
 0x4e6   :  { %340 = vrot.lane.b32.xlu1 %v5563_v0, %s5891_s20 }
 0x558   :  { %v341_v3 = vpop.permute.xlu1 %340 }
 0x559   :  { %v6087_v5 = vmul.f32 %v5561_v58, %v341_v3  ;;  %v657_v3 = vld [vmem:[%s656_s27] sm:$0x1]  ;;  %s4505_s27 = sld [smem:[#allocation5 + $0x88]] }
 0x55b   :  { %v404_v7 = vpack.c.bf16 %v6087_v5, %v6087_v5 }
 0x55d   :  { %406 = vrot.lane.b32.xlu0 %v404_v7, %s5892_s21 }
 0x55f   :  { %s1190_s6 = scalar_lea.vmem %s7613_s1, %s4505_s27  ;;  %s4516_s27 = sld [smem:[#allocation5 + $0xb]] }
 0x565   :  { %s1580_s8 = scalar_lea.vmem %s7613_s1, %s4516_s27 }
 0x5cf   :  { %v407_v9 = vpop.permute.xlu0 %406 }
 0x5d0   :  { %4945 = vmatmul.mubr.msk.bf16.vlgmr.msra.gmra.mrb[4].mxu0 %vm114_vm0, %v407_v9 }
 0x5d1   :  { %4969 = vmatpush3.bf16.xpose.msra.mxu0 %v5939_v2  ;;  %4984 = vmatprep.mubr.msk.bf16.mxu0 %vm5890_vm2, %v5889_v1 }
 0x5d2   :  { %4970 = vmatprep.subr.bf16.mxu0 %v5889_v1 }
 0x5d9   :  { %4971 = vmatpush3.bf16.xpose.msra.mxu0 %v5949_v4 }
 0x5da   :  { %4972 = vmatprep.subr.bf16.mxu0 %v5889_v1 }
 0x5e1   :  { %4973 = vmatpush3.bf16.xpose.msra.mxu0 %v5967_v6 }
 0x5e2   :  { %4974 = vmatprep.subr.bf16.mxu0 %v5889_v1 }
 0x5e9   :  { %4975 = vmatpush3.bf16.xpose.msra.mxu0 %v5977_v8 }
 0x5ea   :  { %4976 = vmatprep.subr.bf16.mxu0 %v5889_v1 }
 0x5f1   :  { %4977 = vmatpush3.bf16.xpose.msra.mxu0 %v5987_v10 }
 0x5f2   :  { %4978 = vmatprep.subr.bf16.mxu0 %v5889_v1 }
 0x5f9   :  { %4979 = vmatpush3.bf16.xpose.msra.mxu0 %v5997_v12 }
 0x5fa   :  { %4980 = vmatprep.subr.bf16.mxu0 %v5889_v1 }
 0x601   :  { %4981 = vmatpush3.bf16.xpose.msra.mxu0 %v6007_v14 }
 0x602   :  { %4982 = vmatprep.subr.bf16.mxu0 %v5889_v1 }
 0x609   :  { %4983 = vmatpush3.bf16.xpose.msra.mxu0 %v6017_v16 }
 0x60a   :  { %5008 = vmatprep.subr.bf16.mxu0 %v5889_v1 }
 0x6a3   :  { %v445_v18 = vpop.f32.mrb[4].mxu0 }
 0x6a4   :  { %v451_v19 = vadd.f32 %v445_v18, %v403_v17  ;;  %v4946_v20 = vpop.f32.mrb[5].mxu0 }
 0x6a5   :  { %v448_v21 = vpop.f32.mrb[6].mxu0 }
 0x6a6   :  { %5564 = vtanh.f32 %v451_v19  ;;  %v4947_v22 = vpop.f32.mrb[7].mxu0  ;;  %v4483_v24 = vmul.f32 -1.442695, %v451_v19 }
 0x6a8   :  { %5566 = vpow2.f32 %v4483_v24 }
 0x6b0   :  { %v5565_v23 = vpop.eup %5564 }
 0x6b1   :  { %461 = vrot.lane.b32.xlu1 %v5565_v23, %s5891_s20 }
 0x6b2   :  { %v5567_v25 = vpop.eup %5566 }
 0x6b3   :  { %v455_v26 = vadd.f32 1.0, %v5567_v25 }
 0x6b5   :  { %5568 = vrcp.f32 %v455_v26 }
 0x6bf   :  { %v5569_v27 = vpop.eup %5568 }
 0x6c0   :  { %v459_v30 = vmul.f32 %v5569_v27, %v337_v63  ;;  %v663_v63 = vld [vmem:[%s662_s0] sm:$0x1] }
 0x6c1   :  { %v665_v0 = vrot.slane %v663_v63, 7 }
 0x6c3   :  { %v667_v7 = vsel %vm71_vm3, %v657_v3, %v665_v0 }
 0x723   :  { %v462_v28 = vpop.permute.xlu1 %461 }
 0x724   :  { %v464_v29 = vmul.f32 %v5569_v27, %v462_v28 }
 0x726   :  { %466 = vrot.lane.b32.xlu0 %v464_v29, %s5892_s21 }
 0x798   :  { %v467_v31 = vpop.permute.xlu0 %466 }
 0x799   :  { %v469_v32 = vadd.f32 %v467_v31, %v459_v30 }
 0x79b   :  { %5570 = vtanh.f32 %v469_v32 }
 0x7a5   :  { %v5571_v33 = vpop.eup %5570 }
 0x7a6   :  { %472 = vrot.lane.b32.xlu1 %v5571_v33, %s5891_s20  ;;  %v795_v33 = vld [vmem:[%s794_s7] sm:$0x1] }
 0x818   :  { %v473_v34 = vpop.permute.xlu1 %472 }
 0x819   :  { %v6121_v35 = vmul.f32 %v5569_v27, %v473_v34  ;;  %v797_v34 = vrot.slane %v795_v33, 7  ;;  %v1053_v33 = vld [vmem:[%s1052_s26] sm:$0x1]  ;;  %s4517_s26 = sld [smem:[#allocation5 + $0x8b]] }
 0x81b   :  { %v536_v36 = vpack.c.bf16 %v6121_v35, %v6121_v35 }
 0x81d   :  { %538 = vrot.lane.b32.xlu0 %v536_v36, %s5892_s21  ;;  %v789_v36 = vld [vmem:[%s788_s10] sm:$0x1]  ;;  %s4509_s10 = sld [smem:[#allocation5 + $0x89]] }
 0x81f   :  { %s1586_s30 = scalar_lea.vmem %s7613_s1, %s4517_s26  ;;  %s4528_s26 = sld [smem:[#allocation5 + $0xe]] }
 0x823   :  { %s1322_s13 = scalar_lea.vmem %s7613_s1, %s4509_s10  ;;  %s4520_s10 = sld [smem:[#allocation5 + $0xc]] }
 0x825   :  { %s1976_s7 = scalar_lea.vmem %s7613_s1, %s4528_s26 }
 0x829   :  { %s1712_s15 = scalar_lea.vmem %s7613_s1, %s4520_s10 }
 0x88f   :  { %v539_v37 = vpop.permute.xlu0 %538 }
 0x890   :  { %4965 = vmatmul.mubr.msk.bf16.vlgmr.msra.gmra.mrb[4].mxu1 %vm114_vm0, %v539_v37  ;;  %v799_v37 = vsel %vm71_vm3, %v789_v36, %v797_v34 }
 0x891   :  { %4989 = vmatpush3.bf16.xpose.msra.mxu1 %v5939_v2  ;;  %5004 = vmatprep.mubr.msk.bf16.mxu1 %vm5890_vm2, %v5889_v1 }
 0x892   :  { %4990 = vmatprep.subr.bf16.mxu1 %v5889_v1 }
 0x899   :  { %4991 = vmatpush3.bf16.xpose.msra.mxu1 %v5949_v4 }
 0x89a   :  { %4992 = vmatprep.subr.bf16.mxu1 %v5889_v1 }
 0x8a1   :  { %4993 = vmatpush3.bf16.xpose.msra.mxu1 %v5967_v6 }
 0x8a2   :  { %4994 = vmatprep.subr.bf16.mxu1 %v5889_v1 }
 0x8a9   :  { %4995 = vmatpush3.bf16.xpose.msra.mxu1 %v5977_v8 }
 0x8aa   :  { %4996 = vmatprep.subr.bf16.mxu1 %v5889_v1 }
 0x8b1   :  { %4997 = vmatpush3.bf16.xpose.msra.mxu1 %v5987_v10 }
 0x8b2   :  { %4998 = vmatprep.subr.bf16.mxu1 %v5889_v1 }
 0x8b9   :  { %4999 = vmatpush3.bf16.xpose.msra.mxu1 %v5997_v12 }
 0x8ba   :  { %5000 = vmatprep.subr.bf16.mxu1 %v5889_v1 }
 0x8c1   :  { %5001 = vmatpush3.bf16.xpose.msra.mxu1 %v6007_v14 }
 0x8c2   :  { %5002 = vmatprep.subr.bf16.mxu1 %v5889_v1 }
 0x8c9   :  { %5003 = vmatpush3.bf16.xpose.msra.mxu1 %v6017_v16 }
 0x8ca   :  { %5028 = vmatprep.subr.bf16.mxu1 %v5889_v1 }
 0x963   :  { %v577_v43 = vpop.f32.mrb[4].mxu1 }
 0x964   :  { %v583_v44 = vadd.f32 %v577_v43, %v535_v41  ;;  %v4966_v45 = vpop.f32.mrb[5].mxu1 }
 0x965   :  { %v580_v46 = vpop.f32.mrb[6].mxu1 }
 0x966   :  { %5572 = vtanh.f32 %v583_v44  ;;  %v4967_v47 = vpop.f32.mrb[7].mxu1  ;;  %v4487_v49 = vmul.f32 -1.442695, %v583_v44 }
 0x968   :  { %5574 = vpow2.f32 %v4487_v49 }
 0x970   :  { %v5573_v48 = vpop.eup %5572 }
 0x971   :  { %593 = vrot.lane.b32.xlu1 %v5573_v48, %s5891_s20 }
 0x972   :  { %v5575_v50 = vpop.eup %5574 }
 0x973   :  { %v587_v51 = vadd.f32 1.0, %v5575_v50 }
 0x975   :  { %5576 = vrcp.f32 %v587_v51 }
 0x97f   :  { %v5577_v52 = vpop.eup %5576 }
 0x980   :  { %v591_v55 = vmul.f32 %v5577_v52, %v469_v32 }
 0x9e3   :  { %v594_v53 = vpop.permute.xlu1 %593 }
 0x9e4   :  { %v596_v54 = vmul.f32 %v5577_v52, %v594_v53 }
 0x9e6   :  { %598 = vrot.lane.b32.xlu0 %v596_v54, %s5892_s21 }
 0xa58   :  { %v599_v56 = vpop.permute.xlu0 %598 }
 0xa59   :  { %v601_v57 = vadd.f32 %v599_v56, %v591_v55 }
 0xa5b   :  { %5578 = vtanh.f32 %v601_v57 }
 0xa65   :  { %v5579_v58 = vpop.eup %5578 }
 0xa66   :  { %604 = vrot.lane.b32.xlu1 %v5579_v58, %s5891_s20 }
 0xad8   :  { %v605_v59 = vpop.permute.xlu1 %604 }
 0xad9   :  { %v6155_v60 = vmul.f32 %v5577_v52, %v605_v59  ;;  %v927_v59 = vld [vmem:[%s926_s14] sm:$0x1] }
 0xadb   :  { %v668_v61 = vpack.c.bf16 %v6155_v60, %v6155_v60 }
 0xadd   :  { %670 = vrot.lane.b32.xlu0 %v668_v61, %s5892_s21  ;;  %v929_v61 = vrot.slane %v927_v59, 7 }
 0xb4f   :  { %v671_v62 = vpop.permute.xlu0 %670 }
 0xb50   :  { %4985 = vmatmul.mubr.msk.bf16.vlgmr.msra.gmra.mrb[8].mxu0 %vm114_vm0, %v671_v62  ;;  %v921_v62 = vld [vmem:[%s920_s17] sm:$0x1]  ;;  %s4513_s17 = sld [smem:[#allocation5 + $0x8a]] }
 0xb51   :  { %5009 = vmatpush3.bf16.xpose.msra.mxu0 %v5939_v2  ;;  %5024 = vmatprep.mubr.msk.bf16.mxu0 %vm5890_vm2, %v5889_v1  ;;  %v931_v63 = vsel %vm71_vm3, %v921_v62, %v929_v61  ;;  %v1185_v61 = vld [vmem:[%s1184_s9] sm:$0x1]  ;;  %s4521_s9 = sld [smem:[#allocation5 + $0x8c]] }
 0xb52   :  { %5010 = vmatprep.subr.bf16.mxu0 %v5889_v1 }
 0xb56   :  { %s1454_s23 = scalar_lea.vmem %s7613_s1, %s4513_s17  ;;  %s4524_s17 = sld [smem:[#allocation5 + $0xd]] }
 0xb57   :  { %s1718_s2 = scalar_lea.vmem %s7613_s1, %s4521_s9  ;;  %s4532_s9 = sld [smem:[#allocation5 + $0xf]] }
 0xb59   :  { %5011 = vmatpush3.bf16.xpose.msra.mxu0 %v5949_v4 }
 0xb5a   :  { %5012 = vmatprep.subr.bf16.mxu0 %v5889_v1 }
 0xb5c   :  { %s1844_s0 = scalar_lea.vmem %s7613_s1, %s4524_s17 }
 0xb5d   :  { %s2108_s14 = scalar_lea.vmem %s7613_s1, %s4532_s9 }
 0xb61   :  { %5013 = vmatpush3.bf16.xpose.msra.mxu0 %v5967_v6 }
 0xb62   :  { %5014 = vmatprep.subr.bf16.mxu0 %v5889_v1 }
 0xb69   :  { %5015 = vmatpush3.bf16.xpose.msra.mxu0 %v5977_v8 }
 0xb6a   :  { %5016 = vmatprep.subr.bf16.mxu0 %v5889_v1 }
 0xb71   :  { %5017 = vmatpush3.bf16.xpose.msra.mxu0 %v5987_v10 }
 0xb72   :  { %5018 = vmatprep.subr.bf16.mxu0 %v5889_v1 }
 0xb79   :  { %5019 = vmatpush3.bf16.xpose.msra.mxu0 %v5997_v12 }
 0xb7a   :  { %5020 = vmatprep.subr.bf16.mxu0 %v5889_v1 }
 0xb81   :  { %5021 = vmatpush3.bf16.xpose.msra.mxu0 %v6007_v14 }
 0xb82   :  { %5022 = vmatprep.subr.bf16.mxu0 %v5889_v1 }
 0xb89   :  { %5023 = vmatpush3.bf16.xpose.msra.mxu0 %v6017_v16 }
 0xb8a   :  { %5048 = vmatprep.subr.bf16.mxu0 %v5889_v1 }
 0xc23   :  { %v709_v9 = vpop.f32.mrb[8].mxu0 }
 0xc24   :  { %v715_v11 = vadd.f32 %v709_v9, %v667_v7  ;;  %v4986_v13 = vpop.f32.mrb[9].mxu0 }
 0xc25   :  { %v712_v15 = vpop.f32.mrb[10].mxu0 }
 0xc26   :  { %5580 = vtanh.f32 %v715_v11  ;;  %v4987_v17 = vpop.f32.mrb[11].mxu0  ;;  %v4491_v19 = vmul.f32 -1.442695, %v715_v11 }
 0xc28   :  { %5582 = vpow2.f32 %v4491_v19 }
 0xc30   :  { %v5581_v18 = vpop.eup %5580 }
 0xc31   :  { %725 = vrot.lane.b32.xlu1 %v5581_v18, %s5891_s20 }
 0xc32   :  { %v5583_v20 = vpop.eup %5582 }
 0xc33   :  { %v719_v21 = vadd.f32 1.0, %v5583_v20 }
 0xc35   :  { %5584 = vrcp.f32 %v719_v21 }
 0xc3f   :  { %v5585_v22 = vpop.eup %5584 }
 0xc40   :  { %v723_v25 = vmul.f32 %v5585_v22, %v601_v57 }
 0xca3   :  { %v726_v23 = vpop.permute.xlu1 %725 }
 0xca4   :  { %v728_v24 = vmul.f32 %v5585_v22, %v726_v23 }
 0xca6   :  { %730 = vrot.lane.b32.xlu0 %v728_v24, %s5892_s21 }
 0xd18   :  { %v731_v26 = vpop.permute.xlu0 %730 }
 0xd19   :  { %v733_v27 = vadd.f32 %v731_v26, %v723_v25 }
 0xd1b   :  { %5586 = vtanh.f32 %v733_v27 }
 0xd25   :  { %v5587_v28 = vpop.eup %5586 }
 0xd26   :  { %736 = vrot.lane.b32.xlu1 %v5587_v28, %s5891_s20 }
 0xd98   :  { %v737_v29 = vpop.permute.xlu1 %736 }
 0xd99   :  { %v6189_v30 = vmul.f32 %v5585_v22, %v737_v29 }
 0xd9b   :  { %v800_v31 = vpack.c.bf16 %v6189_v30, %v6189_v30 }
 0xd9d   :  { %802 = vrot.lane.b32.xlu0 %v800_v31, %s5892_s21  ;;  %v1059_v31 = vld [vmem:[%s1058_s24] sm:$0x1] }
 0xe0f   :  { %v803_v32 = vpop.permute.xlu0 %802 }
 0xe10   :  { %5005 = vmatmul.mubr.msk.bf16.vlgmr.msra.gmra.mrb[8].mxu1 %vm114_vm0, %v803_v32  ;;  %v1061_v32 = vrot.slane %v1059_v31, 7  ;;  %v1323_v31 = vld [vmem:[%s1322_s13] sm:$0x1] }
 0xe11   :  { %5029 = vmatpush3.bf16.xpose.msra.mxu1 %v5939_v2  ;;  %5044 = vmatprep.mubr.msk.bf16.mxu1 %vm5890_vm2, %v5889_v1 }
 0xe12   :  { %5030 = vmatprep.subr.bf16.mxu1 %v5889_v1  ;;  %v1063_v34 = vsel %vm71_vm3, %v1053_v33, %v1061_v32  ;;  %v1325_v32 = vrot.slane %v1323_v31, 7  ;;  %v1317_v33 = vld [vmem:[%s1316_s16] sm:$0x1]  ;;  %s4525_s16 = sld [smem:[#allocation5 + $0x8d]] }
 0xe18   :  { %s1850_s22 = scalar_lea.vmem %s7613_s1, %s4525_s16  ;;  %s4536_s16 = sld [smem:[#allocation5 + $0x10]] }
 0xe19   :  { %5031 = vmatpush3.bf16.xpose.msra.mxu1 %v5949_v4 }
 0xe1a   :  { %5032 = vmatprep.subr.bf16.mxu1 %v5889_v1 }
 0xe1e   :  { %s2240_s24 = scalar_lea.vmem %s7613_s1, %s4536_s16 }
 0xe21   :  { %5033 = vmatpush3.bf16.xpose.msra.mxu1 %v5967_v6 }
 0xe22   :  { %5034 = vmatprep.subr.bf16.mxu1 %v5889_v1 }
 0xe29   :  { %5035 = vmatpush3.bf16.xpose.msra.mxu1 %v5977_v8 }
 0xe2a   :  { %5036 = vmatprep.subr.bf16.mxu1 %v5889_v1 }
 0xe31   :  { %5037 = vmatpush3.bf16.xpose.msra.mxu1 %v5987_v10 }
 0xe32   :  { %5038 = vmatprep.subr.bf16.mxu1 %v5889_v1 }
 0xe39   :  { %5039 = vmatpush3.bf16.xpose.msra.mxu1 %v5997_v12 }
 0xe3a   :  { %5040 = vmatprep.subr.bf16.mxu1 %v5889_v1 }
 0xe41   :  { %5041 = vmatpush3.bf16.xpose.msra.mxu1 %v6007_v14 }
 0xe42   :  { %5042 = vmatprep.subr.bf16.mxu1 %v5889_v1 }
 0xe49   :  { %5043 = vmatpush3.bf16.xpose.msra.mxu1 %v6017_v16 }
 0xe4a   :  { %5068 = vmatprep.subr.bf16.mxu1 %v5889_v1 }
 0xee3   :  { %v841_v38 = vpop.f32.mrb[8].mxu1 }
 0xee4   :  { %v847_v39 = vadd.f32 %v841_v38, %v799_v37  ;;  %v5006_v40 = vpop.f32.mrb[9].mxu1 }
 0xee5   :  { %v844_v41 = vpop.f32.mrb[10].mxu1 }
 0xee6   :  { %5588 = vtanh.f32 %v847_v39  ;;  %v5007_v43 = vpop.f32.mrb[11].mxu1  ;;  %v4495_v45 = vmul.f32 -1.442695, %v847_v39 }
 0xee8   :  { %5590 = vpow2.f32 %v4495_v45 }
 0xef0   :  { %v5589_v44 = vpop.eup %5588 }
 0xef1   :  { %857 = vrot.lane.b32.xlu1 %v5589_v44, %s5891_s20 }
 0xef2   :  { %v5591_v46 = vpop.eup %5590 }
 0xef3   :  { %v851_v47 = vadd.f32 1.0, %v5591_v46 }
 0xef5   :  { %5592 = vrcp.f32 %v851_v47 }
 0xeff   :  { %v5593_v48 = vpop.eup %5592 }
 0xf00   :  { %v855_v51 = vmul.f32 %v5593_v48, %v733_v27 }
 0xf63   :  { %v858_v49 = vpop.permute.xlu1 %857 }
 0xf64   :  { %v860_v50 = vmul.f32 %v5593_v48, %v858_v49 }
 0xf66   :  { %862 = vrot.lane.b32.xlu0 %v860_v50, %s5892_s21 }
 0xfd8   :  { %v863_v52 = vpop.permute.xlu0 %862 }
 0xfd9   :  { %v865_v53 = vadd.f32 %v863_v52, %v855_v51 }
 0xfdb   :  { %5594 = vtanh.f32 %v865_v53 }
 0xfe5   :  { %v5595_v54 = vpop.eup %5594 }
 0xfe6   :  { %868 = vrot.lane.b32.xlu1 %v5595_v54, %s5891_s20 }
0x1058   :  { %v869_v55 = vpop.permute.xlu1 %868 }
0x1059   :  { %v6223_v56 = vmul.f32 %v5593_v48, %v869_v55 }
0x105b   :  { %v932_v57 = vpack.c.bf16 %v6223_v56, %v6223_v56 }
0x105d   :  { %934 = vrot.lane.b32.xlu0 %v932_v57, %s5892_s21 }
0x10cf   :  { %v935_v58 = vpop.permute.xlu0 %934 }
0x10d0   :  { %5025 = vmatmul.mubr.msk.bf16.vlgmr.msra.gmra.mrb[12].mxu0 %vm114_vm0, %v935_v58  ;;  %v1191_v58 = vld [vmem:[%s1190_s6] sm:$0x1] }
0x10d1   :  { %5049 = vmatpush3.bf16.xpose.msra.mxu0 %v5939_v2  ;;  %5064 = vmatprep.mubr.msk.bf16.mxu0 %vm5890_vm2, %v5889_v1  ;;  %v1193_v59 = vrot.slane %v1191_v58, 7 }
0x10d2   :  { %5050 = vmatprep.subr.bf16.mxu0 %v5889_v1 }
0x10d3   :  { %v1195_v62 = vsel %vm71_vm3, %v1185_v61, %v1193_v59  ;;  %v1455_v59 = vld [vmem:[%s1454_s23] sm:$0x1] }
0x10d4   :  { %v1457_v61 = vrot.slane %v1455_v59, 7 }
0x10d9   :  { %5051 = vmatpush3.bf16.xpose.msra.mxu0 %v5949_v4 }
0x10da   :  { %5052 = vmatprep.subr.bf16.mxu0 %v5889_v1 }
0x10e1   :  { %5053 = vmatpush3.bf16.xpose.msra.mxu0 %v5967_v6 }
0x10e2   :  { %5054 = vmatprep.subr.bf16.mxu0 %v5889_v1 }
0x10e9   :  { %5055 = vmatpush3.bf16.xpose.msra.mxu0 %v5977_v8 }
0x10ea   :  { %5056 = vmatprep.subr.bf16.mxu0 %v5889_v1 }
0x10f1   :  { %5057 = vmatpush3.bf16.xpose.msra.mxu0 %v5987_v10 }
0x10f2   :  { %5058 = vmatprep.subr.bf16.mxu0 %v5889_v1 }
0x10f9   :  { %5059 = vmatpush3.bf16.xpose.msra.mxu0 %v5997_v12 }
0x10fa   :  { %5060 = vmatprep.subr.bf16.mxu0 %v5889_v1 }
0x1101   :  { %5061 = vmatpush3.bf16.xpose.msra.mxu0 %v6007_v14 }
0x1102   :  { %5062 = vmatprep.subr.bf16.mxu0 %v5889_v1 }
0x1109   :  { %5063 = vmatpush3.bf16.xpose.msra.mxu0 %v6017_v16 }
0x110a   :  { %5088 = vmatprep.subr.bf16.mxu0 %v5889_v1 }
0x11a3   :  { %v973_v0 = vpop.f32.mrb[12].mxu0 }
0x11a4   :  { %v979_v3 = vadd.f32 %v973_v0, %v931_v63  ;;  %v5026_v7 = vpop.f32.mrb[13].mxu0 }
0x11a5   :  { %v976_v9 = vpop.f32.mrb[14].mxu0 }
0x11a6   :  { %5596 = vtanh.f32 %v979_v3  ;;  %v5027_v11 = vpop.f32.mrb[15].mxu0  ;;  %v4499_v15 = vmul.f32 -1.442695, %v979_v3 }
0x11a8   :  { %5598 = vpow2.f32 %v4499_v15 }
0x11b0   :  { %v5597_v13 = vpop.eup %5596 }
0x11b1   :  { %989 = vrot.lane.b32.xlu1 %v5597_v13, %s5891_s20 }
0x11b2   :  { %v5599_v17 = vpop.eup %5598 }
0x11b3   :  { %v983_v18 = vadd.f32 1.0, %v5599_v17 }
0x11b5   :  { %5600 = vrcp.f32 %v983_v18 }
0x11bf   :  { %v5601_v19 = vpop.eup %5600 }
0x11c0   :  { %v987_v22 = vmul.f32 %v5601_v19, %v865_v53 }
0x1223   :  { %v990_v20 = vpop.permute.xlu1 %989 }
0x1224   :  { %v992_v21 = vmul.f32 %v5601_v19, %v990_v20 }
0x1226   :  { %994 = vrot.lane.b32.xlu0 %v992_v21, %s5892_s21 }
0x1298   :  { %v995_v23 = vpop.permute.xlu0 %994 }
0x1299   :  { %v997_v24 = vadd.f32 %v995_v23, %v987_v22 }
0x129b   :  { %5602 = vtanh.f32 %v997_v24 }
0x12a5   :  { %v5603_v25 = vpop.eup %5602 }
0x12a6   :  { %1000 = vrot.lane.b32.xlu1 %v5603_v25, %s5891_s20 }
0x1318   :  { %v1001_v26 = vpop.permute.xlu1 %1000 }
0x1319   :  { %v6257_v27 = vmul.f32 %v5601_v19, %v1001_v26 }
0x131b   :  { %v1064_v28 = vpack.c.bf16 %v6257_v27, %v6257_v27 }
0x131d   :  { %1066 = vrot.lane.b32.xlu0 %v1064_v28, %s5892_s21 }
0x138f   :  { %v1067_v29 = vpop.permute.xlu0 %1066 }
0x1390   :  { %5045 = vmatmul.mubr.msk.bf16.vlgmr.msra.gmra.mrb[12].mxu1 %vm114_vm0, %v1067_v29 }
0x1391   :  { %5069 = vmatpush3.bf16.xpose.msra.mxu1 %v5939_v2  ;;  %5084 = vmatprep.mubr.msk.bf16.mxu1 %vm5890_vm2, %v5889_v1 }
0x1392   :  { %5070 = vmatprep.subr.bf16.mxu1 %v5889_v1 }
0x1399   :  { %5071 = vmatpush3.bf16.xpose.msra.mxu1 %v5949_v4 }
0x139a   :  { %5072 = vmatprep.subr.bf16.mxu1 %v5889_v1 }
0x13a1   :  { %5073 = vmatpush3.bf16.xpose.msra.mxu1 %v5967_v6 }
0x13a2   :  { %5074 = vmatprep.subr.bf16.mxu1 %v5889_v1 }
0x13a9   :  { %5075 = vmatpush3.bf16.xpose.msra.mxu1 %v5977_v8 }
0x13aa   :  { %5076 = vmatprep.subr.bf16.mxu1 %v5889_v1 }
0x13b1   :  { %5077 = vmatpush3.bf16.xpose.msra.mxu1 %v5987_v10 }
0x13b2   :  { %5078 = vmatprep.subr.bf16.mxu1 %v5889_v1 }
0x13b9   :  { %5079 = vmatpush3.bf16.xpose.msra.mxu1 %v5997_v12 }
0x13ba   :  { %5080 = vmatprep.subr.bf16.mxu1 %v5889_v1 }
0x13c1   :  { %5081 = vmatpush3.bf16.xpose.msra.mxu1 %v6007_v14 }
0x13c2   :  { %5082 = vmatprep.subr.bf16.mxu1 %v5889_v1 }
0x13c9   :  { %5083 = vmatpush3.bf16.xpose.msra.mxu1 %v6017_v16 }
0x13ca   :  { %5108 = vmatprep.subr.bf16.mxu1 %v5889_v1 }
0x1463   :  { %v1105_v36 = vpop.f32.mrb[12].mxu1 }
0x1464   :  { %v1111_v37 = vadd.f32 %v1105_v36, %v1063_v34  ;;  %v5046_v38 = vpop.f32.mrb[13].mxu1  ;;  %v1327_v34 = vsel %vm71_vm3, %v1317_v33, %v1325_v32  ;;  %v1587_v33 = vld [vmem:[%s1586_s30] sm:$0x1] }
0x1465   :  { %v1108_v39 = vpop.f32.mrb[14].mxu1 }
0x1466   :  { %5604 = vtanh.f32 %v1111_v37  ;;  %v5047_v40 = vpop.f32.mrb[15].mxu1  ;;  %v4503_v43 = vmul.f32 -1.442695, %v1111_v37 }
0x1468   :  { %5606 = vpow2.f32 %v4503_v43 }
0x1470   :  { %v5605_v41 = vpop.eup %5604 }
0x1471   :  { %1121 = vrot.lane.b32.xlu1 %v5605_v41, %s5891_s20 }
0x1472   :  { %v5607_v44 = vpop.eup %5606 }
0x1473   :  { %v1115_v45 = vadd.f32 1.0, %v5607_v44 }
0x1475   :  { %5608 = vrcp.f32 %v1115_v45 }
0x147f   :  { %v5609_v46 = vpop.eup %5608 }
0x1480   :  { %v1119_v49 = vmul.f32 %v5609_v46, %v997_v24 }
0x14e3   :  { %v1122_v47 = vpop.permute.xlu1 %1121 }
0x14e4   :  { %v1124_v48 = vmul.f32 %v5609_v46, %v1122_v47 }
0x14e6   :  { %1126 = vrot.lane.b32.xlu0 %v1124_v48, %s5892_s21 }
0x1558   :  { %v1127_v50 = vpop.permute.xlu0 %1126 }
0x1559   :  { %v1129_v51 = vadd.f32 %v1127_v50, %v1119_v49 }
0x155b   :  { %5610 = vtanh.f32 %v1129_v51 }
0x1565   :  { %v5611_v52 = vpop.eup %5610 }
0x1566   :  { %1132 = vrot.lane.b32.xlu1 %v5611_v52, %s5891_s20 }
0x15d8   :  { %v1133_v53 = vpop.permute.xlu1 %1132 }
0x15d9   :  { %v6291_v54 = vmul.f32 %v5609_v46, %v1133_v53 }
0x15db   :  { %v1196_v55 = vpack.c.bf16 %v6291_v54, %v6291_v54 }
0x15dd   :  { %1198 = vrot.lane.b32.xlu0 %v1196_v55, %s5892_s21 }
0x164f   :  { %v1199_v57 = vpop.permute.xlu0 %1198 }
0x1650   :  { %5065 = vmatmul.mubr.msk.bf16.vlgmr.msra.gmra.mrb[16].mxu0 %vm114_vm0, %v1199_v57 }
0x1651   :  { %5089 = vmatpush3.bf16.xpose.msra.mxu0 %v5939_v2  ;;  %5104 = vmatprep.mubr.msk.bf16.mxu0 %vm5890_vm2, %v5889_v1 }
0x1652   :  { %5090 = vmatprep.subr.bf16.mxu0 %v5889_v1 }
0x1659   :  { %5091 = vmatpush3.bf16.xpose.msra.mxu0 %v5949_v4 }
0x165a   :  { %5092 = vmatprep.subr.bf16.mxu0 %v5889_v1 }
0x1661   :  { %5093 = vmatpush3.bf16.xpose.msra.mxu0 %v5967_v6 }
0x1662   :  { %5094 = vmatprep.subr.bf16.mxu0 %v5889_v1 }
0x1669   :  { %5095 = vmatpush3.bf16.xpose.msra.mxu0 %v5977_v8 }
0x166a   :  { %5096 = vmatprep.subr.bf16.mxu0 %v5889_v1 }
0x1671   :  { %5097 = vmatpush3.bf16.xpose.msra.mxu0 %v5987_v10 }
0x1672   :  { %5098 = vmatprep.subr.bf16.mxu0 %v5889_v1 }
0x1679   :  { %5099 = vmatpush3.bf16.xpose.msra.mxu0 %v5997_v12 }
0x167a   :  { %5100 = vmatprep.subr.bf16.mxu0 %v5889_v1 }
0x1681   :  { %5101 = vmatpush3.bf16.xpose.msra.mxu0 %v6007_v14 }
0x1682   :  { %5102 = vmatprep.subr.bf16.mxu0 %v5889_v1 }
0x1689   :  { %5103 = vmatpush3.bf16.xpose.msra.mxu0 %v6017_v16 }
0x168a   :  { %5128 = vmatprep.subr.bf16.mxu0 %v5889_v1 }
0x1723   :  { %v1237_v63 = vpop.f32.mrb[16].mxu0 }
0x1724   :  { %v1243_v0 = vadd.f32 %v1237_v63, %v1195_v62  ;;  %v5066_v3 = vpop.f32.mrb[17].mxu0  ;;  %v1449_v62 = vld [vmem:[%s1448_s25] sm:$0x1]  ;;  %s4529_s25 = sld [smem:[#allocation5 + $0x8e]] }
0x1725   :  { %v1240_v7 = vpop.f32.mrb[18].mxu0  ;;  %v1459_v63 = vsel %vm71_vm3, %v1449_v62, %v1457_v61 }
0x1726   :  { %5612 = vtanh.f32 %v1243_v0  ;;  %v5067_v9 = vpop.f32.mrb[19].mxu0  ;;  %v4507_v13 = vmul.f32 -1.442695, %v1243_v0 }
0x1728   :  { %5614 = vpow2.f32 %v4507_v13 }
0x172a   :  { %s1982_s29 = scalar_lea.vmem %s7613_s1, %s4529_s25  ;;  %s4540_s25 = sld [smem:[#allocation5 + $0x11]] }
0x1730   :  { %v5613_v11 = vpop.eup %5612  ;;  %s2372_s6 = scalar_lea.vmem %s7613_s1, %s4540_s25 }
0x1731   :  { %1253 = vrot.lane.b32.xlu1 %v5613_v11, %s5891_s20 }
0x1732   :  { %v5615_v15 = vpop.eup %5614 }
0x1733   :  { %v1247_v17 = vadd.f32 1.0, %v5615_v15 }
0x1735   :  { %5616 = vrcp.f32 %v1247_v17 }
0x173f   :  { %v5617_v18 = vpop.eup %5616 }
0x1740   :  { %v1251_v21 = vmul.f32 %v5617_v18, %v1129_v51 }
0x17a3   :  { %v1254_v19 = vpop.permute.xlu1 %1253 }
0x17a4   :  { %v1256_v20 = vmul.f32 %v5617_v18, %v1254_v19 }
0x17a6   :  { %1258 = vrot.lane.b32.xlu0 %v1256_v20, %s5892_s21 }
0x1818   :  { %v1259_v22 = vpop.permute.xlu0 %1258 }
0x1819   :  { %v1261_v23 = vadd.f32 %v1259_v22, %v1251_v21 }
0x181b   :  { %5618 = vtanh.f32 %v1261_v23 }
0x1825   :  { %v5619_v24 = vpop.eup %5618 }
0x1826   :  { %1264 = vrot.lane.b32.xlu1 %v5619_v24, %s5891_s20 }
0x1898   :  { %v1265_v25 = vpop.permute.xlu1 %1264 }
0x1899   :  { %v6325_v26 = vmul.f32 %v5617_v18, %v1265_v25 }
0x189b   :  { %v1328_v28 = vpack.c.bf16 %v6325_v26, %v6325_v26 }
0x189d   :  { %1330 = vrot.lane.b32.xlu0 %v1328_v28, %s5892_s21 }
0x190f   :  { %v1331_v29 = vpop.permute.xlu0 %1330 }
0x1910   :  { %5085 = vmatmul.mubr.msk.bf16.vlgmr.msra.gmra.mrb[16].mxu1 %vm114_vm0, %v1331_v29 }
0x1911   :  { %5109 = vmatpush3.bf16.xpose.msra.mxu1 %v5939_v2  ;;  %5124 = vmatprep.mubr.msk.bf16.mxu1 %vm5890_vm2, %v5889_v1 }
0x1912   :  { %5110 = vmatprep.subr.bf16.mxu1 %v5889_v1 }
0x1919   :  { %5111 = vmatpush3.bf16.xpose.msra.mxu1 %v5949_v4 }
0x191a   :  { %5112 = vmatprep.subr.bf16.mxu1 %v5889_v1 }
0x1921   :  { %5113 = vmatpush3.bf16.xpose.msra.mxu1 %v5967_v6 }
0x1922   :  { %5114 = vmatprep.subr.bf16.mxu1 %v5889_v1 }
0x1929   :  { %5115 = vmatpush3.bf16.xpose.msra.mxu1 %v5977_v8 }
0x192a   :  { %5116 = vmatprep.subr.bf16.mxu1 %v5889_v1 }
0x1931   :  { %5117 = vmatpush3.bf16.xpose.msra.mxu1 %v5987_v10 }
0x1932   :  { %5118 = vmatprep.subr.bf16.mxu1 %v5889_v1 }
0x1939   :  { %5119 = vmatpush3.bf16.xpose.msra.mxu1 %v5997_v12 }
0x193a   :  { %5120 = vmatprep.subr.bf16.mxu1 %v5889_v1 }
0x1941   :  { %5121 = vmatpush3.bf16.xpose.msra.mxu1 %v6007_v14 }
0x1942   :  { %5122 = vmatprep.subr.bf16.mxu1 %v5889_v1 }
0x1949   :  { %5123 = vmatpush3.bf16.xpose.msra.mxu1 %v6017_v16 }
0x194a   :  { %5148 = vmatprep.subr.bf16.mxu1 %v5889_v1 }
0x19e3   :  { %v1369_v36 = vpop.f32.mrb[16].mxu1 }
0x19e4   :  { %v1375_v37 = vadd.f32 %v1369_v36, %v1327_v34  ;;  %v5086_v38 = vpop.f32.mrb[17].mxu1  ;;  %v1589_v34 = vrot.slane %v1587_v33, 7  ;;  %v1581_v36 = vld [vmem:[%s1580_s8] sm:$0x1]  ;;  %s4533_s8 = sld [smem:[#allocation5 + $0x8f]] }
0x19e5   :  { %v1372_v39 = vpop.f32.mrb[18].mxu1 }
0x19e6   :  { %5620 = vtanh.f32 %v1375_v37  ;;  %v5087_v40 = vpop.f32.mrb[19].mxu1  ;;  %v4511_v43 = vmul.f32 -1.442695, %v1375_v37  ;;  %v1591_v37 = vsel %vm71_vm3, %v1581_v36, %v1589_v34 }
0x19e8   :  { %5622 = vpow2.f32 %v4511_v43 }
0x19ea   :  { %s2114_s12 = scalar_lea.vmem %s7613_s1, %s4533_s8  ;;  %s4544_s8 = sld [smem:[#allocation5 + $0x12]] }
0x19f0   :  { %v5621_v41 = vpop.eup %5620  ;;  %s2504_s13 = scalar_lea.vmem %s7613_s1, %s4544_s8 }
0x19f1   :  { %1385 = vrot.lane.b32.xlu1 %v5621_v41, %s5891_s20 }
0x19f2   :  { %v5623_v44 = vpop.eup %5622 }
0x19f3   :  { %v1379_v45 = vadd.f32 1.0, %v5623_v44 }
0x19f5   :  { %5624 = vrcp.f32 %v1379_v45 }
0x19ff   :  { %v5625_v46 = vpop.eup %5624 }
0x1a00   :  { %v1383_v49 = vmul.f32 %v5625_v46, %v1261_v23 }
0x1a63   :  { %v1386_v47 = vpop.permute.xlu1 %1385 }
0x1a64   :  { %v1388_v48 = vmul.f32 %v5625_v46, %v1386_v47 }
0x1a66   :  { %1390 = vrot.lane.b32.xlu0 %v1388_v48, %s5892_s21 }
0x1ad8   :  { %v1391_v50 = vpop.permute.xlu0 %1390 }
0x1ad9   :  { %v1393_v51 = vadd.f32 %v1391_v50, %v1383_v49 }
0x1adb   :  { %5626 = vtanh.f32 %v1393_v51 }
0x1ae5   :  { %v5627_v52 = vpop.eup %5626 }
0x1ae6   :  { %1396 = vrot.lane.b32.xlu1 %v5627_v52, %s5891_s20 }
0x1b58   :  { %v1397_v53 = vpop.permute.xlu1 %1396 }
0x1b59   :  { %v6359_v55 = vmul.f32 %v5625_v46, %v1397_v53 }
0x1b5b   :  { %v1460_v57 = vpack.c.bf16 %v6359_v55, %v6359_v55 }
0x1b5d   :  { %1462 = vrot.lane.b32.xlu0 %v1460_v57, %s5892_s21 }
0x1bcf   :  { %v1463_v58 = vpop.permute.xlu0 %1462 }
0x1bd0   :  { %5105 = vmatmul.mubr.msk.bf16.vlgmr.msra.gmra.mrb[20].mxu0 %vm114_vm0, %v1463_v58 }
0x1bd1   :  { %5129 = vmatpush3.bf16.xpose.msra.mxu0 %v5939_v2  ;;  %5144 = vmatprep.mubr.msk.bf16.mxu0 %vm5890_vm2, %v5889_v1 }
0x1bd2   :  { %5130 = vmatprep.subr.bf16.mxu0 %v5889_v1 }
0x1bd9   :  { %5131 = vmatpush3.bf16.xpose.msra.mxu0 %v5949_v4 }
0x1bda   :  { %5132 = vmatprep.subr.bf16.mxu0 %v5889_v1 }
0x1be1   :  { %5133 = vmatpush3.bf16.xpose.msra.mxu0 %v5967_v6 }
0x1be2   :  { %5134 = vmatprep.subr.bf16.mxu0 %v5889_v1 }
0x1be9   :  { %5135 = vmatpush3.bf16.xpose.msra.mxu0 %v5977_v8 }
0x1bea   :  { %5136 = vmatprep.subr.bf16.mxu0 %v5889_v1 }
0x1bf1   :  { %5137 = vmatpush3.bf16.xpose.msra.mxu0 %v5987_v10 }
0x1bf2   :  { %5138 = vmatprep.subr.bf16.mxu0 %v5889_v1 }
0x1bf9   :  { %5139 = vmatpush3.bf16.xpose.msra.mxu0 %v5997_v12 }
0x1bfa   :  { %5140 = vmatprep.subr.bf16.mxu0 %v5889_v1 }
0x1c01   :  { %5141 = vmatpush3.bf16.xpose.msra.mxu0 %v6007_v14 }
0x1c02   :  { %5142 = vmatprep.subr.bf16.mxu0 %v5889_v1 }
0x1c09   :  { %5143 = vmatpush3.bf16.xpose.msra.mxu0 %v6017_v16 }
0x1c0a   :  { %5168 = vmatprep.subr.bf16.mxu0 %v5889_v1 }
0x1ca3   :  { %v1501_v0 = vpop.f32.mrb[20].mxu0 }
0x1ca4   :  { %v1507_v3 = vadd.f32 %v1501_v0, %v1459_v63  ;;  %v5106_v7 = vpop.f32.mrb[21].mxu0  ;;  %v1719_v63 = vld [vmem:[%s1718_s2] sm:$0x1] }
0x1ca5   :  { %v1504_v9 = vpop.f32.mrb[22].mxu0  ;;  %v1721_v0 = vrot.slane %v1719_v63, 7 }
0x1ca6   :  { %5628 = vtanh.f32 %v1507_v3  ;;  %v5107_v11 = vpop.f32.mrb[23].mxu0  ;;  %v4515_v15 = vmul.f32 -1.442695, %v1507_v3  ;;  %v1713_v3 = vld [vmem:[%s1712_s15] sm:$0x1]  ;;  %s4537_s15 = sld [smem:[#allocation5 + $0x90]] }
0x1ca7   :  { %v1723_v7 = vsel %vm71_vm3, %v1713_v3, %v1721_v0 }
0x1ca8   :  { %5630 = vpow2.f32 %v4515_v15 }
0x1cac   :  { %s2246_s19 = scalar_lea.vmem %s7613_s1, %s4537_s15  ;;  %s4548_s15 = sld [smem:[#allocation5 + $0x13]] }
0x1cb0   :  { %v5629_v13 = vpop.eup %5628 }
0x1cb1   :  { %1517 = vrot.lane.b32.xlu1 %v5629_v13, %s5891_s20 }
0x1cb2   :  { %v5631_v17 = vpop.eup %5630  ;;  %s2636_s23 = scalar_lea.vmem %s7613_s1, %s4548_s15 }
0x1cb3   :  { %v1511_v18 = vadd.f32 1.0, %v5631_v17 }
0x1cb5   :  { %5632 = vrcp.f32 %v1511_v18 }
0x1cbf   :  { %v5633_v19 = vpop.eup %5632 }
0x1cc0   :  { %v1515_v22 = vmul.f32 %v5633_v19, %v1393_v51 }
0x1d23   :  { %v1518_v20 = vpop.permute.xlu1 %1517 }
0x1d24   :  { %v1520_v21 = vmul.f32 %v5633_v19, %v1518_v20 }
0x1d26   :  { %1522 = vrot.lane.b32.xlu0 %v1520_v21, %s5892_s21 }
0x1d98   :  { %v1523_v23 = vpop.permute.xlu0 %1522 }
0x1d99   :  { %v1525_v24 = vadd.f32 %v1523_v23, %v1515_v22 }
0x1d9b   :  { %5634 = vtanh.f32 %v1525_v24 }
0x1da5   :  { %v5635_v25 = vpop.eup %5634 }
0x1da6   :  { %1528 = vrot.lane.b32.xlu1 %v5635_v25, %s5891_s20 }
0x1e18   :  { %v1529_v28 = vpop.permute.xlu1 %1528 }
0x1e19   :  { %v6393_v29 = vmul.f32 %v5633_v19, %v1529_v28 }
0x1e1b   :  { %v1592_v31 = vpack.c.bf16 %v6393_v29, %v6393_v29 }
0x1e1d   :  { %1594 = vrot.lane.b32.xlu0 %v1592_v31, %s5892_s21 }
0x1e8f   :  { %v1595_v32 = vpop.permute.xlu0 %1594 }
0x1e90   :  { %5125 = vmatmul.mubr.msk.bf16.vlgmr.msra.gmra.mrb[20].mxu1 %vm114_vm0, %v1595_v32 }
0x1e91   :  { %5149 = vmatpush3.bf16.xpose.msra.mxu1 %v5939_v2  ;;  %5164 = vmatprep.mubr.msk.bf16.mxu1 %vm5890_vm2, %v5889_v1 }
0x1e92   :  { %5150 = vmatprep.subr.bf16.mxu1 %v5889_v1 }
0x1e99   :  { %5151 = vmatpush3.bf16.xpose.msra.mxu1 %v5949_v4 }
0x1e9a   :  { %5152 = vmatprep.subr.bf16.mxu1 %v5889_v1 }
0x1ea1   :  { %5153 = vmatpush3.bf16.xpose.msra.mxu1 %v5967_v6 }
0x1ea2   :  { %5154 = vmatprep.subr.bf16.mxu1 %v5889_v1 }
0x1ea9   :  { %5155 = vmatpush3.bf16.xpose.msra.mxu1 %v5977_v8 }
0x1eaa   :  { %5156 = vmatprep.subr.bf16.mxu1 %v5889_v1 }
0x1eb1   :  { %5157 = vmatpush3.bf16.xpose.msra.mxu1 %v5987_v10 }
0x1eb2   :  { %5158 = vmatprep.subr.bf16.mxu1 %v5889_v1 }
0x1eb9   :  { %5159 = vmatpush3.bf16.xpose.msra.mxu1 %v5997_v12 }
0x1eba   :  { %5160 = vmatprep.subr.bf16.mxu1 %v5889_v1 }
0x1ec1   :  { %5161 = vmatpush3.bf16.xpose.msra.mxu1 %v6007_v14 }
0x1ec2   :  { %5162 = vmatprep.subr.bf16.mxu1 %v5889_v1 }
0x1ec9   :  { %5163 = vmatpush3.bf16.xpose.msra.mxu1 %v6017_v16 }
0x1eca   :  { %5188 = vmatprep.subr.bf16.mxu1 %v5889_v1 }
0x1f63   :  { %v1633_v38 = vpop.f32.mrb[20].mxu1 }
0x1f64   :  { %v1639_v39 = vadd.f32 %v1633_v38, %v1591_v37  ;;  %v5126_v40 = vpop.f32.mrb[21].mxu1  ;;  %v1851_v38 = vld [vmem:[%s1850_s22] sm:$0x1] }
0x1f65   :  { %v1636_v41 = vpop.f32.mrb[22].mxu1  ;;  %v1845_v40 = vld [vmem:[%s1844_s0] sm:$0x1]  ;;  %s4541_s0 = sld [smem:[#allocation5 + $0x91]] }
0x1f66   :  { %5636 = vtanh.f32 %v1639_v39  ;;  %v5127_v43 = vpop.f32.mrb[23].mxu1  ;;  %v4519_v45 = vmul.f32 -1.442695, %v1639_v39  ;;  %v1853_v39 = vrot.slane %v1851_v38, 7 }
0x1f68   :  { %5638 = vpow2.f32 %v4519_v45  ;;  %v1855_v41 = vsel %vm71_vm3, %v1845_v40, %v1853_v39 }
0x1f6b   :  { %s2378_s28 = scalar_lea.vmem %s7613_s1, %s4541_s0  ;;  %s4552_s0 = sld [smem:[#allocation5 + $0x14]] }
0x1f70   :  { %v5637_v44 = vpop.eup %5636 }
0x1f71   :  { %1649 = vrot.lane.b32.xlu1 %v5637_v44, %s5891_s20  ;;  %s2768_s30 = scalar_lea.vmem %s7613_s1, %s4552_s0 }
0x1f72   :  { %v5639_v46 = vpop.eup %5638 }
0x1f73   :  { %v1643_v47 = vadd.f32 1.0, %v5639_v46 }
0x1f75   :  { %5640 = vrcp.f32 %v1643_v47 }
0x1f7f   :  { %v5641_v48 = vpop.eup %5640 }
0x1f80   :  { %v1647_v51 = vmul.f32 %v5641_v48, %v1525_v24 }
0x1fe3   :  { %v1650_v49 = vpop.permute.xlu1 %1649 }
0x1fe4   :  { %v1652_v50 = vmul.f32 %v5641_v48, %v1650_v49 }
0x1fe6   :  { %1654 = vrot.lane.b32.xlu0 %v1652_v50, %s5892_s21 }
0x2058   :  { %v1655_v52 = vpop.permute.xlu0 %1654 }
0x2059   :  { %v1657_v53 = vadd.f32 %v1655_v52, %v1647_v51 }
0x205b   :  { %5642 = vtanh.f32 %v1657_v53 }
0x2065   :  { %v5643_v57 = vpop.eup %5642 }
0x2066   :  { %1660 = vrot.lane.b32.xlu1 %v5643_v57, %s5891_s20 }
0x20d8   :  { %v1661_v58 = vpop.permute.xlu1 %1660 }
0x20d9   :  { %v6427_v59 = vmul.f32 %v5641_v48, %v1661_v58 }
0x20db   :  { %v1724_v61 = vpack.c.bf16 %v6427_v59, %v6427_v59 }
0x20dd   :  { %1726 = vrot.lane.b32.xlu0 %v1724_v61, %s5892_s21 }
0x214f   :  { %v1727_v62 = vpop.permute.xlu0 %1726 }
0x2150   :  { %5145 = vmatmul.mubr.msk.bf16.vlgmr.msra.gmra.mrb[24].mxu0 %vm114_vm0, %v1727_v62 }
0x2151   :  { %5169 = vmatpush3.bf16.xpose.msra.mxu0 %v5939_v2  ;;  %5184 = vmatprep.mubr.msk.bf16.mxu0 %vm5890_vm2, %v5889_v1 }
0x2152   :  { %5170 = vmatprep.subr.bf16.mxu0 %v5889_v1 }
0x2159   :  { %5171 = vmatpush3.bf16.xpose.msra.mxu0 %v5949_v4 }
0x215a   :  { %5172 = vmatprep.subr.bf16.mxu0 %v5889_v1 }
0x2161   :  { %5173 = vmatpush3.bf16.xpose.msra.mxu0 %v5967_v6 }
0x2162   :  { %5174 = vmatprep.subr.bf16.mxu0 %v5889_v1 }
0x2169   :  { %5175 = vmatpush3.bf16.xpose.msra.mxu0 %v5977_v8 }
0x216a   :  { %5176 = vmatprep.subr.bf16.mxu0 %v5889_v1 }
0x2171   :  { %5177 = vmatpush3.bf16.xpose.msra.mxu0 %v5987_v10 }
0x2172   :  { %5178 = vmatprep.subr.bf16.mxu0 %v5889_v1 }
0x2179   :  { %5179 = vmatpush3.bf16.xpose.msra.mxu0 %v5997_v12 }
0x217a   :  { %5180 = vmatprep.subr.bf16.mxu0 %v5889_v1 }
0x2181   :  { %5181 = vmatpush3.bf16.xpose.msra.mxu0 %v6007_v14 }
0x2182   :  { %5182 = vmatprep.subr.bf16.mxu0 %v5889_v1 }
0x2189   :  { %5183 = vmatpush3.bf16.xpose.msra.mxu0 %v6017_v16 }
0x218a   :  { %5208 = vmatprep.subr.bf16.mxu0 %v5889_v1 }
0x2223   :  { %v1765_v9 = vpop.f32.mrb[24].mxu0 }
0x2224   :  { %v1771_v11 = vadd.f32 %v1765_v9, %v1723_v7  ;;  %v5146_v13 = vpop.f32.mrb[25].mxu0 }
0x2225   :  { %v1768_v15 = vpop.f32.mrb[26].mxu0 }
0x2226   :  { %5644 = vtanh.f32 %v1771_v11  ;;  %v5147_v17 = vpop.f32.mrb[27].mxu0  ;;  %v4523_v19 = vmul.f32 -1.442695, %v1771_v11  ;;  %v1983_v11 = vld [vmem:[%s1982_s29] sm:$0x1] }
0x2227   :  { %v1985_v13 = vrot.slane %v1983_v11, 7  ;;  %v1977_v15 = vld [vmem:[%s1976_s7] sm:$0x1]  ;;  %s4545_s7 = sld [smem:[#allocation5 + $0x92]] }
0x2228   :  { %5646 = vpow2.f32 %v4523_v19 }
0x2229   :  { %v1987_v17 = vsel %vm71_vm3, %v1977_v15, %v1985_v13 }
0x222d   :  { %s2510_s11 = scalar_lea.vmem %s7613_s1, %s4545_s7  ;;  %s4556_s7 = sld [smem:[#allocation5 + $0x15]] }
0x2230   :  { %v5645_v18 = vpop.eup %5644 }
0x2231   :  { %1781 = vrot.lane.b32.xlu1 %v5645_v18, %s5891_s20 }
0x2232   :  { %v5647_v20 = vpop.eup %5646 }
0x2233   :  { %v1775_v21 = vadd.f32 1.0, %v5647_v20  ;;  %s2900_s2 = scalar_lea.vmem %s7613_s1, %s4556_s7 }
0x2235   :  { %5648 = vrcp.f32 %v1775_v21 }
0x223f   :  { %v5649_v22 = vpop.eup %5648 }
0x2240   :  { %v1779_v25 = vmul.f32 %v5649_v22, %v1657_v53 }
0x22a3   :  { %v1782_v23 = vpop.permute.xlu1 %1781 }
0x22a4   :  { %v1784_v24 = vmul.f32 %v5649_v22, %v1782_v23 }
0x22a6   :  { %1786 = vrot.lane.b32.xlu0 %v1784_v24, %s5892_s21 }
0x2318   :  { %v1787_v28 = vpop.permute.xlu0 %1786 }
0x2319   :  { %v1789_v31 = vadd.f32 %v1787_v28, %v1779_v25 }
0x231b   :  { %5650 = vtanh.f32 %v1789_v31 }
0x2325   :  { %v5651_v32 = vpop.eup %5650 }
0x2326   :  { %1792 = vrot.lane.b32.xlu1 %v5651_v32, %s5891_s20 }
0x2398   :  { %v1793_v33 = vpop.permute.xlu1 %1792 }
0x2399   :  { %v6461_v34 = vmul.f32 %v5649_v22, %v1793_v33 }
0x239b   :  { %v1856_v36 = vpack.c.bf16 %v6461_v34, %v6461_v34 }
0x239d   :  { %1858 = vrot.lane.b32.xlu0 %v1856_v36, %s5892_s21 }
0x240f   :  { %v1859_v37 = vpop.permute.xlu0 %1858 }
0x2410   :  { %5165 = vmatmul.mubr.msk.bf16.vlgmr.msra.gmra.mrb[24].mxu1 %vm114_vm0, %v1859_v37 }
0x2411   :  { %5189 = vmatpush3.bf16.xpose.msra.mxu1 %v5939_v2  ;;  %5204 = vmatprep.mubr.msk.bf16.mxu1 %vm5890_vm2, %v5889_v1 }
0x2412   :  { %5190 = vmatprep.subr.bf16.mxu1 %v5889_v1 }
0x2419   :  { %5191 = vmatpush3.bf16.xpose.msra.mxu1 %v5949_v4 }
0x241a   :  { %5192 = vmatprep.subr.bf16.mxu1 %v5889_v1 }
0x2421   :  { %5193 = vmatpush3.bf16.xpose.msra.mxu1 %v5967_v6 }
0x2422   :  { %5194 = vmatprep.subr.bf16.mxu1 %v5889_v1 }
0x2429   :  { %5195 = vmatpush3.bf16.xpose.msra.mxu1 %v5977_v8 }
0x242a   :  { %5196 = vmatprep.subr.bf16.mxu1 %v5889_v1 }
0x2431   :  { %5197 = vmatpush3.bf16.xpose.msra.mxu1 %v5987_v10 }
0x2432   :  { %5198 = vmatprep.subr.bf16.mxu1 %v5889_v1 }
0x2439   :  { %5199 = vmatpush3.bf16.xpose.msra.mxu1 %v5997_v12 }
0x243a   :  { %5200 = vmatprep.subr.bf16.mxu1 %v5889_v1 }
0x2441   :  { %5201 = vmatpush3.bf16.xpose.msra.mxu1 %v6007_v14 }
0x2442   :  { %5202 = vmatprep.subr.bf16.mxu1 %v5889_v1 }
0x2449   :  { %5203 = vmatpush3.bf16.xpose.msra.mxu1 %v6017_v16 }
0x244a   :  { %5228 = vmatprep.subr.bf16.mxu1 %v5889_v1 }
0x24e3   :  { %v1897_v43 = vpop.f32.mrb[24].mxu1 }
0x24e4   :  { %v1903_v44 = vadd.f32 %v1897_v43, %v1855_v41  ;;  %v5166_v45 = vpop.f32.mrb[25].mxu1 }
0x24e5   :  { %v1900_v46 = vpop.f32.mrb[26].mxu1  ;;  %v2115_v45 = vld [vmem:[%s2114_s12] sm:$0x1] }
0x24e6   :  { %5652 = vtanh.f32 %v1903_v44  ;;  %v5167_v47 = vpop.f32.mrb[27].mxu1  ;;  %v4527_v49 = vmul.f32 -1.442695, %v1903_v44  ;;  %v2117_v46 = vrot.slane %v2115_v45, 7 }
0x24e7   :  { %v2109_v47 = vld [vmem:[%s2108_s14] sm:$0x1]  ;;  %s4549_s14 = sld [smem:[#allocation5 + $0x93]] }
0x24e8   :  { %5654 = vpow2.f32 %v4527_v49 }
0x24ed   :  { %s2642_s18 = scalar_lea.vmem %s7613_s1, %s4549_s14  ;;  %s4560_s14 = sld [smem:[#allocation5 + $0x16]] }
0x24f0   :  { %v5653_v48 = vpop.eup %5652 }
0x24f1   :  { %1913 = vrot.lane.b32.xlu1 %v5653_v48, %s5891_s20  ;;  %v2119_v48 = vsel %vm71_vm3, %v2109_v47, %v2117_v46 }
0x24f2   :  { %v5655_v50 = vpop.eup %5654 }
0x24f3   :  { %v1907_v51 = vadd.f32 1.0, %v5655_v50  ;;  %s3032_s22 = scalar_lea.vmem %s7613_s1, %s4560_s14 }
0x24f5   :  { %5656 = vrcp.f32 %v1907_v51 }
0x24ff   :  { %v5657_v52 = vpop.eup %5656 }
0x2500   :  { %v1911_v58 = vmul.f32 %v5657_v52, %v1789_v31 }
0x2563   :  { %v1914_v53 = vpop.permute.xlu1 %1913 }
0x2564   :  { %v1916_v57 = vmul.f32 %v5657_v52, %v1914_v53 }
0x2566   :  { %1918 = vrot.lane.b32.xlu0 %v1916_v57, %s5892_s21 }
0x25d8   :  { %v1919_v61 = vpop.permute.xlu0 %1918 }
0x25d9   :  { %v1921_v62 = vadd.f32 %v1919_v61, %v1911_v58 }
0x25db   :  { %5658 = vtanh.f32 %v1921_v62 }
0x25e5   :  { %v5659_v63 = vpop.eup %5658 }
0x25e6   :  { %1924 = vrot.lane.b32.xlu1 %v5659_v63, %s5891_s20 }
0x2658   :  { %v1925_v0 = vpop.permute.xlu1 %1924 }
0x2659   :  { %v6495_v3 = vmul.f32 %v5657_v52, %v1925_v0 }
0x265b   :  { %v1988_v7 = vpack.c.bf16 %v6495_v3, %v6495_v3 }
0x265d   :  { %1990 = vrot.lane.b32.xlu0 %v1988_v7, %s5892_s21 }
0x26cf   :  { %v1991_v9 = vpop.permute.xlu0 %1990 }
0x26d0   :  { %5185 = vmatmul.mubr.msk.bf16.vlgmr.msra.gmra.mrb[28].mxu0 %vm114_vm0, %v1991_v9 }
0x26d1   :  { %5209 = vmatpush3.bf16.xpose.msra.mxu0 %v5939_v2  ;;  %5224 = vmatprep.mubr.msk.bf16.mxu0 %vm5890_vm2, %v5889_v1 }
0x26d2   :  { %5210 = vmatprep.subr.bf16.mxu0 %v5889_v1 }
0x26d9   :  { %5211 = vmatpush3.bf16.xpose.msra.mxu0 %v5949_v4 }
0x26da   :  { %5212 = vmatprep.subr.bf16.mxu0 %v5889_v1 }
0x26e1   :  { %5213 = vmatpush3.bf16.xpose.msra.mxu0 %v5967_v6 }
0x26e2   :  { %5214 = vmatprep.subr.bf16.mxu0 %v5889_v1 }
0x26e9   :  { %5215 = vmatpush3.bf16.xpose.msra.mxu0 %v5977_v8 }
0x26ea   :  { %5216 = vmatprep.subr.bf16.mxu0 %v5889_v1 }
0x26f1   :  { %5217 = vmatpush3.bf16.xpose.msra.mxu0 %v5987_v10 }
0x26f2   :  { %5218 = vmatprep.subr.bf16.mxu0 %v5889_v1 }
0x26f9   :  { %5219 = vmatpush3.bf16.xpose.msra.mxu0 %v5997_v12 }
0x26fa   :  { %5220 = vmatprep.subr.bf16.mxu0 %v5889_v1 }
0x2701   :  { %5221 = vmatpush3.bf16.xpose.msra.mxu0 %v6007_v14 }
0x2702   :  { %5222 = vmatprep.subr.bf16.mxu0 %v5889_v1 }
0x2709   :  { %5223 = vmatpush3.bf16.xpose.msra.mxu0 %v6017_v16 }
0x270a   :  { %5248 = vmatprep.subr.bf16.mxu0 %v5889_v1 }
0x27a3   :  { %v2029_v18 = vpop.f32.mrb[28].mxu0 }
0x27a4   :  { %v2035_v19 = vadd.f32 %v2029_v18, %v1987_v17  ;;  %v5186_v20 = vpop.f32.mrb[29].mxu0 }
0x27a5   :  { %v2032_v21 = vpop.f32.mrb[30].mxu0 }
0x27a6   :  { %5660 = vtanh.f32 %v2035_v19  ;;  %v5187_v22 = vpop.f32.mrb[31].mxu0  ;;  %v4531_v24 = vmul.f32 -1.442695, %v2035_v19  ;;  %v2247_v21 = vld [vmem:[%s2246_s19] sm:$0x1] }
0x27a7   :  { %v2249_v22 = vrot.slane %v2247_v21, 7 }
0x27a8   :  { %5662 = vpow2.f32 %v4531_v24 }
0x27b0   :  { %v5661_v23 = vpop.eup %5660 }
0x27b1   :  { %2045 = vrot.lane.b32.xlu1 %v5661_v23, %s5891_s20  ;;  %v2241_v23 = vld [vmem:[%s2240_s24] sm:$0x1]  ;;  %s4553_s24 = sld [smem:[#allocation5 + $0x94]] }
0x27b2   :  { %v5663_v25 = vpop.eup %5662  ;;  %v2251_v24 = vsel %vm71_vm3, %v2241_v23, %v2249_v22 }
0x27b3   :  { %v2039_v28 = vadd.f32 1.0, %v5663_v25 }
0x27b5   :  { %5664 = vrcp.f32 %v2039_v28 }
0x27b7   :  { %s2774_s27 = scalar_lea.vmem %s7613_s1, %s4553_s24  ;;  %s4564_s24 = sld [smem:[#allocation5 + $0x17]] }
0x27bd   :  { %s3164_s29 = scalar_lea.vmem %s7613_s1, %s4564_s24 }
0x27bf   :  { %v5665_v31 = vpop.eup %5664 }
0x27c0   :  { %v2043_v36 = vmul.f32 %v5665_v31, %v1921_v62 }
0x2823   :  { %v2046_v32 = vpop.permute.xlu1 %2045 }
0x2824   :  { %v2048_v33 = vmul.f32 %v5665_v31, %v2046_v32 }
0x2826   :  { %2050 = vrot.lane.b32.xlu0 %v2048_v33, %s5892_s21 }
0x2898   :  { %v2051_v37 = vpop.permute.xlu0 %2050 }
0x2899   :  { %v2053_v38 = vadd.f32 %v2051_v37, %v2043_v36 }
0x289b   :  { %5666 = vtanh.f32 %v2053_v38 }
0x28a5   :  { %v5667_v39 = vpop.eup %5666 }
0x28a6   :  { %2056 = vrot.lane.b32.xlu1 %v5667_v39, %s5891_s20 }
0x2918   :  { %v2057_v40 = vpop.permute.xlu1 %2056 }
0x2919   :  { %v6529_v41 = vmul.f32 %v5665_v31, %v2057_v40 }
0x291b   :  { %v2120_v43 = vpack.c.bf16 %v6529_v41, %v6529_v41 }
0x291d   :  { %2122 = vrot.lane.b32.xlu0 %v2120_v43, %s5892_s21 }
0x298f   :  { %v2123_v44 = vpop.permute.xlu0 %2122 }
0x2990   :  { %5205 = vmatmul.mubr.msk.bf16.vlgmr.msra.gmra.mrb[28].mxu1 %vm114_vm0, %v2123_v44 }
0x2991   :  { %5229 = vmatpush3.bf16.xpose.msra.mxu1 %v5939_v2  ;;  %5244 = vmatprep.mubr.msk.bf16.mxu1 %vm5890_vm2, %v5889_v1 }
0x2992   :  { %5230 = vmatprep.subr.bf16.mxu1 %v5889_v1 }
0x2999   :  { %5231 = vmatpush3.bf16.xpose.msra.mxu1 %v5949_v4 }
0x299a   :  { %5232 = vmatprep.subr.bf16.mxu1 %v5889_v1 }
0x29a1   :  { %5233 = vmatpush3.bf16.xpose.msra.mxu1 %v5967_v6 }
0x29a2   :  { %5234 = vmatprep.subr.bf16.mxu1 %v5889_v1 }
0x29a9   :  { %5235 = vmatpush3.bf16.xpose.msra.mxu1 %v5977_v8 }
0x29aa   :  { %5236 = vmatprep.subr.bf16.mxu1 %v5889_v1 }
0x29b1   :  { %5237 = vmatpush3.bf16.xpose.msra.mxu1 %v5987_v10 }
0x29b2   :  { %5238 = vmatprep.subr.bf16.mxu1 %v5889_v1 }
0x29b9   :  { %5239 = vmatpush3.bf16.xpose.msra.mxu1 %v5997_v12 }
0x29ba   :  { %5240 = vmatprep.subr.bf16.mxu1 %v5889_v1 }
0x29c1   :  { %5241 = vmatpush3.bf16.xpose.msra.mxu1 %v6007_v14 }
0x29c2   :  { %5242 = vmatprep.subr.bf16.mxu1 %v5889_v1 }
0x29c9   :  { %5243 = vmatpush3.bf16.xpose.msra.mxu1 %v6017_v16 }
0x29ca   :  { %5268 = vmatprep.subr.bf16.mxu1 %v5889_v1 }
0x2a63   :  { %v2161_v49 = vpop.f32.mrb[28].mxu1 }
0x2a64   :  { %v2167_v50 = vadd.f32 %v2161_v49, %v2119_v48  ;;  %v5206_v51 = vpop.f32.mrb[29].mxu1 }
0x2a65   :  { %v2164_v52 = vpop.f32.mrb[30].mxu1 }
0x2a66   :  { %5668 = vtanh.f32 %v2167_v50  ;;  %v5207_v53 = vpop.f32.mrb[31].mxu1  ;;  %v4535_v58 = vmul.f32 -1.442695, %v2167_v50 }
0x2a67   :  { %v2379_v53 = vld [vmem:[%s2378_s28] sm:$0x1] }
0x2a68   :  { %5670 = vpow2.f32 %v4535_v58  ;;  %v2373_v58 = vld [vmem:[%s2372_s6] sm:$0x1]  ;;  %s4557_s6 = sld [smem:[#allocation5 + $0x95]] }
0x2a6e   :  { %s2906_s10 = scalar_lea.vmem %s7613_s1, %s4557_s6  ;;  %s4568_s6 = sld [smem:[#allocation5 + $0x18]] }
0x2a70   :  { %v5669_v57 = vpop.eup %5668 }
0x2a71   :  { %2177 = vrot.lane.b32.xlu1 %v5669_v57, %s5891_s20  ;;  %v2381_v57 = vrot.slane %v2379_v53, 7 }
0x2a72   :  { %v5671_v61 = vpop.eup %5670 }
0x2a73   :  { %v2171_v62 = vadd.f32 1.0, %v5671_v61  ;;  %v2383_v61 = vsel %vm71_vm3, %v2373_v58, %v2381_v57 }
0x2a74   :  { %s3296_s12 = scalar_lea.vmem %s7613_s1, %s4568_s6 }
0x2a75   :  { %5672 = vrcp.f32 %v2171_v62 }
0x2a7f   :  { %v5673_v63 = vpop.eup %5672 }
0x2a80   :  { %v2175_v9 = vmul.f32 %v5673_v63, %v2053_v38 }
0x2ae3   :  { %v2178_v0 = vpop.permute.xlu1 %2177 }
0x2ae4   :  { %v2180_v7 = vmul.f32 %v5673_v63, %v2178_v0 }
0x2ae6   :  { %2182 = vrot.lane.b32.xlu0 %v2180_v7, %s5892_s21 }
0x2b58   :  { %v2183_v11 = vpop.permute.xlu0 %2182 }
0x2b59   :  { %v2185_v13 = vadd.f32 %v2183_v11, %v2175_v9 }
0x2b5b   :  { %5674 = vtanh.f32 %v2185_v13 }
0x2b65   :  { %v5675_v15 = vpop.eup %5674 }
0x2b66   :  { %2188 = vrot.lane.b32.xlu1 %v5675_v15, %s5891_s20 }
0x2bd8   :  { %v2189_v17 = vpop.permute.xlu1 %2188 }
0x2bd9   :  { %v6563_v18 = vmul.f32 %v5673_v63, %v2189_v17 }
0x2bdb   :  { %v2252_v19 = vpack.c.bf16 %v6563_v18, %v6563_v18 }
0x2bdd   :  { %2254 = vrot.lane.b32.xlu0 %v2252_v19, %s5892_s21 }
0x2c4f   :  { %v2255_v20 = vpop.permute.xlu0 %2254 }
0x2c50   :  { %5225 = vmatmul.mubr.msk.bf16.vlgmr.msra.gmra.mrb[32].mxu0 %vm114_vm0, %v2255_v20 }
0x2c51   :  { %5249 = vmatpush3.bf16.xpose.msra.mxu0 %v5939_v2  ;;  %5264 = vmatprep.mubr.msk.bf16.mxu0 %vm5890_vm2, %v5889_v1 }
0x2c52   :  { %5250 = vmatprep.subr.bf16.mxu0 %v5889_v1 }
0x2c59   :  { %5251 = vmatpush3.bf16.xpose.msra.mxu0 %v5949_v4 }
0x2c5a   :  { %5252 = vmatprep.subr.bf16.mxu0 %v5889_v1 }
0x2c61   :  { %5253 = vmatpush3.bf16.xpose.msra.mxu0 %v5967_v6 }
0x2c62   :  { %5254 = vmatprep.subr.bf16.mxu0 %v5889_v1 }
0x2c69   :  { %5255 = vmatpush3.bf16.xpose.msra.mxu0 %v5977_v8 }
0x2c6a   :  { %5256 = vmatprep.subr.bf16.mxu0 %v5889_v1 }
0x2c71   :  { %5257 = vmatpush3.bf16.xpose.msra.mxu0 %v5987_v10 }
0x2c72   :  { %5258 = vmatprep.subr.bf16.mxu0 %v5889_v1 }
0x2c79   :  { %5259 = vmatpush3.bf16.xpose.msra.mxu0 %v5997_v12 }
0x2c7a   :  { %5260 = vmatprep.subr.bf16.mxu0 %v5889_v1 }
0x2c81   :  { %5261 = vmatpush3.bf16.xpose.msra.mxu0 %v6007_v14 }
0x2c82   :  { %5262 = vmatprep.subr.bf16.mxu0 %v5889_v1 }
0x2c89   :  { %5263 = vmatpush3.bf16.xpose.msra.mxu0 %v6017_v16 }
0x2c8a   :  { %5288 = vmatprep.subr.bf16.mxu0 %v5889_v1 }
0x2d23   :  { %v2293_v25 = vpop.f32.mrb[32].mxu0 }
0x2d24   :  { %v2299_v28 = vadd.f32 %v2293_v25, %v2251_v24  ;;  %v5226_v31 = vpop.f32.mrb[33].mxu0 }
0x2d25   :  { %v2296_v32 = vpop.f32.mrb[34].mxu0 }
0x2d26   :  { %5676 = vtanh.f32 %v2299_v28  ;;  %v5227_v33 = vpop.f32.mrb[35].mxu0  ;;  %v4539_v37 = vmul.f32 -1.442695, %v2299_v28 }
0x2d28   :  { %5678 = vpow2.f32 %v4539_v37 }
0x2d30   :  { %v5677_v36 = vpop.eup %5676 }
0x2d31   :  { %2309 = vrot.lane.b32.xlu1 %v5677_v36, %s5891_s20  ;;  %v2511_v36 = vld [vmem:[%s2510_s11] sm:$0x1] }
0x2d32   :  { %v5679_v38 = vpop.eup %5678  ;;  %v2513_v37 = vrot.slane %v2511_v36, 7 }
0x2d33   :  { %v2303_v39 = vadd.f32 1.0, %v5679_v38  ;;  %v2505_v38 = vld [vmem:[%s2504_s13] sm:$0x1]  ;;  %s4561_s13 = sld [smem:[#allocation5 + $0x96]] }
0x2d35   :  { %5680 = vrcp.f32 %v2303_v39  ;;  %v2515_v39 = vsel %vm71_vm3, %v2505_v38, %v2513_v37 }
0x2d39   :  { %s3038_s17 = scalar_lea.vmem %s7613_s1, %s4561_s13  ;;  %s4572_s13 = sld [smem:[#allocation5 + $0x19]] }
0x2d3f   :  { %v5681_v40 = vpop.eup %5680  ;;  %s3428_s19 = scalar_lea.vmem %s7613_s1, %s4572_s13 }
0x2d40   :  { %v2307_v45 = vmul.f32 %v5681_v40, %v2185_v13 }
0x2da3   :  { %v2310_v43 = vpop.permute.xlu1 %2309 }
0x2da4   :  { %v2312_v44 = vmul.f32 %v5681_v40, %v2310_v43 }
0x2da6   :  { %2314 = vrot.lane.b32.xlu0 %v2312_v44, %s5892_s21 }
0x2e18   :  { %v2315_v46 = vpop.permute.xlu0 %2314 }
0x2e19   :  { %v2317_v47 = vadd.f32 %v2315_v46, %v2307_v45 }
0x2e1b   :  { %5682 = vtanh.f32 %v2317_v47 }
0x2e25   :  { %v5683_v48 = vpop.eup %5682 }
0x2e26   :  { %2320 = vrot.lane.b32.xlu1 %v5683_v48, %s5891_s20 }
0x2e98   :  { %v2321_v49 = vpop.permute.xlu1 %2320 }
0x2e99   :  { %v6597_v50 = vmul.f32 %v5681_v40, %v2321_v49 }
0x2e9b   :  { %v2384_v51 = vpack.c.bf16 %v6597_v50, %v6597_v50 }
0x2e9d   :  { %2386 = vrot.lane.b32.xlu0 %v2384_v51, %s5892_s21 }
0x2f0f   :  { %v2387_v52 = vpop.permute.xlu0 %2386 }
0x2f10   :  { %5245 = vmatmul.mubr.msk.bf16.vlgmr.msra.gmra.mrb[32].mxu1 %vm114_vm0, %v2387_v52 }
0x2f11   :  { %5269 = vmatpush3.bf16.xpose.msra.mxu1 %v5939_v2  ;;  %5284 = vmatprep.mubr.msk.bf16.mxu1 %vm5890_vm2, %v5889_v1 }
0x2f12   :  { %5270 = vmatprep.subr.bf16.mxu1 %v5889_v1 }
0x2f19   :  { %5271 = vmatpush3.bf16.xpose.msra.mxu1 %v5949_v4 }
0x2f1a   :  { %5272 = vmatprep.subr.bf16.mxu1 %v5889_v1 }
0x2f21   :  { %5273 = vmatpush3.bf16.xpose.msra.mxu1 %v5967_v6 }
0x2f22   :  { %5274 = vmatprep.subr.bf16.mxu1 %v5889_v1 }
0x2f29   :  { %5275 = vmatpush3.bf16.xpose.msra.mxu1 %v5977_v8 }
0x2f2a   :  { %5276 = vmatprep.subr.bf16.mxu1 %v5889_v1 }
0x2f31   :  { %5277 = vmatpush3.bf16.xpose.msra.mxu1 %v5987_v10 }
0x2f32   :  { %5278 = vmatprep.subr.bf16.mxu1 %v5889_v1 }
0x2f39   :  { %5279 = vmatpush3.bf16.xpose.msra.mxu1 %v5997_v12 }
0x2f3a   :  { %5280 = vmatprep.subr.bf16.mxu1 %v5889_v1 }
0x2f41   :  { %5281 = vmatpush3.bf16.xpose.msra.mxu1 %v6007_v14 }
0x2f42   :  { %5282 = vmatprep.subr.bf16.mxu1 %v5889_v1 }
0x2f49   :  { %5283 = vmatpush3.bf16.xpose.msra.mxu1 %v6017_v16 }
0x2f4a   :  { %5308 = vmatprep.subr.bf16.mxu1 %v5889_v1 }
0x2fe3   :  { %v2425_v62 = vpop.f32.mrb[32].mxu1 }
0x2fe4   :  { %v2431_v63 = vadd.f32 %v2425_v62, %v2383_v61  ;;  %v5246_v0 = vpop.f32.mrb[33].mxu1 }
0x2fe5   :  { %v2428_v7 = vpop.f32.mrb[34].mxu1 }
0x2fe6   :  { %5684 = vtanh.f32 %v2431_v63  ;;  %v5247_v9 = vpop.f32.mrb[35].mxu1  ;;  %v4543_v13 = vmul.f32 -1.442695, %v2431_v63 }
0x2fe8   :  { %5686 = vpow2.f32 %v4543_v13  ;;  %v2643_v13 = vld [vmem:[%s2642_s18] sm:$0x1] }
0x2ff0   :  { %v5685_v11 = vpop.eup %5684 }
0x2ff1   :  { %2441 = vrot.lane.b32.xlu1 %v5685_v11, %s5891_s20 }
0x2ff2   :  { %v5687_v15 = vpop.eup %5686 }
0x2ff3   :  { %v2435_v17 = vadd.f32 1.0, %v5687_v15  ;;  %v2645_v15 = vrot.slane %v2643_v13, 7 }
0x2ff5   :  { %5688 = vrcp.f32 %v2435_v17  ;;  %v2637_v17 = vld [vmem:[%s2636_s23] sm:$0x1]  ;;  %s4565_s23 = sld [smem:[#allocation5 + $0x97]] }
0x2ffb   :  { %s3170_s26 = scalar_lea.vmem %s7613_s1, %s4565_s23  ;;  %s4576_s23 = sld [smem:[#allocation5 + $0x1a]] }
0x2fff   :  { %v5689_v19 = vpop.eup %5688 }
0x3000   :  { %v2439_v22 = vmul.f32 %v5689_v19, %v2317_v47 }
0x3001   :  { %s3560_s28 = scalar_lea.vmem %s7613_s1, %s4576_s23 }
0x3063   :  { %v2442_v20 = vpop.permute.xlu1 %2441 }
0x3064   :  { %v2444_v21 = vmul.f32 %v5689_v19, %v2442_v20 }
0x3066   :  { %2446 = vrot.lane.b32.xlu0 %v2444_v21, %s5892_s21 }
0x30d8   :  { %v2447_v23 = vpop.permute.xlu0 %2446 }
0x30d9   :  { %v2449_v24 = vadd.f32 %v2447_v23, %v2439_v22 }
0x30db   :  { %5690 = vtanh.f32 %v2449_v24 }
0x30e5   :  { %v5691_v25 = vpop.eup %5690 }
0x30e6   :  { %2452 = vrot.lane.b32.xlu1 %v5691_v25, %s5891_s20 }
0x3158   :  { %v2453_v28 = vpop.permute.xlu1 %2452 }
0x3159   :  { %v6631_v31 = vmul.f32 %v5689_v19, %v2453_v28  ;;  %v2647_v19 = vsel %vm71_vm3, %v2637_v17, %v2645_v15 }
0x315b   :  { %v2516_v32 = vpack.c.bf16 %v6631_v31, %v6631_v31 }
0x315d   :  { %2518 = vrot.lane.b32.xlu0 %v2516_v32, %s5892_s21 }
0x31cf   :  { %v2519_v33 = vpop.permute.xlu0 %2518 }
0x31d0   :  { %5265 = vmatmul.mubr.msk.bf16.vlgmr.msra.gmra.mrb[36].mxu0 %vm114_vm0, %v2519_v33 }
0x31d1   :  { %5289 = vmatpush3.bf16.xpose.msra.mxu0 %v5939_v2  ;;  %5304 = vmatprep.mubr.msk.bf16.mxu0 %vm5890_vm2, %v5889_v1 }
0x31d2   :  { %5290 = vmatprep.subr.bf16.mxu0 %v5889_v1 }
0x31d9   :  { %5291 = vmatpush3.bf16.xpose.msra.mxu0 %v5949_v4 }
0x31da   :  { %5292 = vmatprep.subr.bf16.mxu0 %v5889_v1 }
0x31e1   :  { %5293 = vmatpush3.bf16.xpose.msra.mxu0 %v5967_v6 }
0x31e2   :  { %5294 = vmatprep.subr.bf16.mxu0 %v5889_v1 }
0x31e9   :  { %5295 = vmatpush3.bf16.xpose.msra.mxu0 %v5977_v8 }
0x31ea   :  { %5296 = vmatprep.subr.bf16.mxu0 %v5889_v1 }
0x31f1   :  { %5297 = vmatpush3.bf16.xpose.msra.mxu0 %v5987_v10 }
0x31f2   :  { %5298 = vmatprep.subr.bf16.mxu0 %v5889_v1 }
0x31f9   :  { %5299 = vmatpush3.bf16.xpose.msra.mxu0 %v5997_v12 }
0x31fa   :  { %5300 = vmatprep.subr.bf16.mxu0 %v5889_v1 }
0x3201   :  { %5301 = vmatpush3.bf16.xpose.msra.mxu0 %v6007_v14 }
0x3202   :  { %5302 = vmatprep.subr.bf16.mxu0 %v5889_v1 }
0x3209   :  { %5303 = vmatpush3.bf16.xpose.msra.mxu0 %v6017_v16 }
0x320a   :  { %5328 = vmatprep.subr.bf16.mxu0 %v5889_v1 }
0x32a3   :  { %v2557_v40 = vpop.f32.mrb[36].mxu0 }
0x32a4   :  { %v2563_v43 = vadd.f32 %v2557_v40, %v2515_v39  ;;  %v5266_v44 = vpop.f32.mrb[37].mxu0 }
0x32a5   :  { %v2560_v45 = vpop.f32.mrb[38].mxu0 }
0x32a6   :  { %5692 = vtanh.f32 %v2563_v43  ;;  %v5267_v46 = vpop.f32.mrb[39].mxu0  ;;  %v4547_v48 = vmul.f32 -1.442695, %v2563_v43 }
0x32a8   :  { %5694 = vpow2.f32 %v4547_v48 }
0x32b0   :  { %v5693_v47 = vpop.eup %5692 }
0x32b1   :  { %2573 = vrot.lane.b32.xlu1 %v5693_v47, %s5891_s20 }
0x32b2   :  { %v5695_v49 = vpop.eup %5694 }
0x32b3   :  { %v2567_v51 = vadd.f32 1.0, %v5695_v49  ;;  %v2775_v49 = vld [vmem:[%s2774_s27] sm:$0x1] }
0x32b5   :  { %5696 = vrcp.f32 %v2567_v51  ;;  %v2777_v51 = vrot.slane %v2775_v49, 7 }
0x32bf   :  { %v5697_v52 = vpop.eup %5696 }
0x32c0   :  { %v2571_v58 = vmul.f32 %v5697_v52, %v2449_v24 }
0x3323   :  { %v2574_v53 = vpop.permute.xlu1 %2573 }
0x3324   :  { %v2576_v57 = vmul.f32 %v5697_v52, %v2574_v53 }
0x3326   :  { %2578 = vrot.lane.b32.xlu0 %v2576_v57, %s5892_s21 }
0x3398   :  { %v2579_v61 = vpop.permute.xlu0 %2578 }
0x3399   :  { %v2581_v62 = vadd.f32 %v2579_v61, %v2571_v58 }
0x339b   :  { %5698 = vtanh.f32 %v2581_v62 }
0x33a5   :  { %v5699_v63 = vpop.eup %5698 }
0x33a6   :  { %2584 = vrot.lane.b32.xlu1 %v5699_v63, %s5891_s20 }
0x3418   :  { %v2585_v0 = vpop.permute.xlu1 %2584 }
0x3419   :  { %v6665_v7 = vmul.f32 %v5697_v52, %v2585_v0  ;;  %v2769_v52 = vld [vmem:[%s2768_s30] sm:$0x1]  ;;  %s4569_s30 = sld [smem:[#allocation5 + $0x98]] }
0x341a   :  { %v2779_v53 = vsel %vm71_vm3, %v2769_v52, %v2777_v51 }
0x341b   :  { %v2648_v9 = vpack.c.bf16 %v6665_v7, %v6665_v7 }
0x341d   :  { %2650 = vrot.lane.b32.xlu0 %v2648_v9, %s5892_s21 }
0x341f   :  { %s3302_s9 = scalar_lea.vmem %s7613_s1, %s4569_s30  ;;  %s4580_s30 = sld [smem:[#allocation5 + $0x1b]] }
0x3425   :  { %s3692_s11 = scalar_lea.vmem %s7613_s1, %s4580_s30 }
0x348f   :  { %v2651_v11 = vpop.permute.xlu0 %2650 }
0x3490   :  { %5285 = vmatmul.mubr.msk.bf16.vlgmr.msra.gmra.mrb[36].mxu1 %vm114_vm0, %v2651_v11 }
0x3491   :  { %5309 = vmatpush3.bf16.xpose.msra.mxu1 %v5939_v2  ;;  %5324 = vmatprep.mubr.msk.bf16.mxu1 %vm5890_vm2, %v5889_v1 }
0x3492   :  { %5310 = vmatprep.subr.bf16.mxu1 %v5889_v1 }
0x3499   :  { %5311 = vmatpush3.bf16.xpose.msra.mxu1 %v5949_v4 }
0x349a   :  { %5312 = vmatprep.subr.bf16.mxu1 %v5889_v1 }
0x34a1   :  { %5313 = vmatpush3.bf16.xpose.msra.mxu1 %v5967_v6 }
0x34a2   :  { %5314 = vmatprep.subr.bf16.mxu1 %v5889_v1 }
0x34a9   :  { %5315 = vmatpush3.bf16.xpose.msra.mxu1 %v5977_v8 }
0x34aa   :  { %5316 = vmatprep.subr.bf16.mxu1 %v5889_v1 }
0x34b1   :  { %5317 = vmatpush3.bf16.xpose.msra.mxu1 %v5987_v10 }
0x34b2   :  { %5318 = vmatprep.subr.bf16.mxu1 %v5889_v1 }
0x34b9   :  { %5319 = vmatpush3.bf16.xpose.msra.mxu1 %v5997_v12 }
0x34ba   :  { %5320 = vmatprep.subr.bf16.mxu1 %v5889_v1 }
0x34c1   :  { %5321 = vmatpush3.bf16.xpose.msra.mxu1 %v6007_v14 }
0x34c2   :  { %5322 = vmatprep.subr.bf16.mxu1 %v5889_v1 }
0x34c9   :  { %5323 = vmatpush3.bf16.xpose.msra.mxu1 %v6017_v16 }
0x34ca   :  { %5348 = vmatprep.subr.bf16.mxu1 %v5889_v1 }
0x3563   :  { %v2689_v20 = vpop.f32.mrb[36].mxu1 }
0x3564   :  { %v2695_v21 = vadd.f32 %v2689_v20, %v2647_v19  ;;  %v5286_v22 = vpop.f32.mrb[37].mxu1 }
0x3565   :  { %v2692_v23 = vpop.f32.mrb[38].mxu1 }
0x3566   :  { %5700 = vtanh.f32 %v2695_v21  ;;  %v5287_v24 = vpop.f32.mrb[39].mxu1  ;;  %v4551_v28 = vmul.f32 -1.442695, %v2695_v21 }
0x3568   :  { %5702 = vpow2.f32 %v4551_v28 }
0x3570   :  { %v5701_v25 = vpop.eup %5700 }
0x3571   :  { %2705 = vrot.lane.b32.xlu1 %v5701_v25, %s5891_s20 }
0x3572   :  { %v5703_v32 = vpop.eup %5702 }
0x3573   :  { %v2699_v33 = vadd.f32 1.0, %v5703_v32 }
0x3575   :  { %5704 = vrcp.f32 %v2699_v33  ;;  %v2907_v33 = vld [vmem:[%s2906_s10] sm:$0x1] }
0x357f   :  { %v5705_v36 = vpop.eup %5704 }
0x3580   :  { %v2703_v39 = vmul.f32 %v5705_v36, %v2581_v62 }
0x35e3   :  { %v2706_v37 = vpop.permute.xlu1 %2705 }
0x35e4   :  { %v2708_v38 = vmul.f32 %v5705_v36, %v2706_v37  ;;  %v2901_v37 = vld [vmem:[%s2900_s2] sm:$0x1]  ;;  %s4573_s2 = sld [smem:[#allocation5 + $0x99]] }
0x35e6   :  { %2710 = vrot.lane.b32.xlu0 %v2708_v38, %s5892_s21 }
0x35ea   :  { %s3434_s16 = scalar_lea.vmem %s7613_s1, %s4573_s2  ;;  %s4584_s2 = sld [smem:[#allocation5 + $0x1c]] }
0x35f0   :  { %s3824_s18 = scalar_lea.vmem %s7613_s1, %s4584_s2 }
0x3658   :  { %v2711_v40 = vpop.permute.xlu0 %2710 }
0x3659   :  { %v2713_v43 = vadd.f32 %v2711_v40, %v2703_v39 }
0x365b   :  { %5706 = vtanh.f32 %v2713_v43 }
0x3665   :  { %v5707_v44 = vpop.eup %5706 }
0x3666   :  { %2716 = vrot.lane.b32.xlu1 %v5707_v44, %s5891_s20 }
0x36d8   :  { %v2717_v45 = vpop.permute.xlu1 %2716 }
0x36d9   :  { %v6699_v46 = vmul.f32 %v5705_v36, %v2717_v45  ;;  %v2909_v36 = vrot.slane %v2907_v33, 7 }
0x36db   :  { %v2780_v47 = vpack.c.bf16 %v6699_v46, %v6699_v46  ;;  %v2911_v38 = vsel %vm71_vm3, %v2901_v37, %v2909_v36 }
0x36dd   :  { %2782 = vrot.lane.b32.xlu0 %v2780_v47, %s5892_s21 }
0x374f   :  { %v2783_v48 = vpop.permute.xlu0 %2782 }
0x3750   :  { %5305 = vmatmul.mubr.msk.bf16.vlgmr.msra.gmra.mrb[40].mxu0 %vm114_vm0, %v2783_v48 }
0x3751   :  { %5329 = vmatpush3.bf16.xpose.msra.mxu0 %v5939_v2  ;;  %5344 = vmatprep.mubr.msk.bf16.mxu0 %vm5890_vm2, %v5889_v1 }
0x3752   :  { %5330 = vmatprep.subr.bf16.mxu0 %v5889_v1 }
0x3759   :  { %5331 = vmatpush3.bf16.xpose.msra.mxu0 %v5949_v4 }
0x375a   :  { %5332 = vmatprep.subr.bf16.mxu0 %v5889_v1 }
0x3761   :  { %5333 = vmatpush3.bf16.xpose.msra.mxu0 %v5967_v6 }
0x3762   :  { %5334 = vmatprep.subr.bf16.mxu0 %v5889_v1 }
0x3769   :  { %5335 = vmatpush3.bf16.xpose.msra.mxu0 %v5977_v8 }
0x376a   :  { %5336 = vmatprep.subr.bf16.mxu0 %v5889_v1 }
0x3771   :  { %5337 = vmatpush3.bf16.xpose.msra.mxu0 %v5987_v10 }
0x3772   :  { %5338 = vmatprep.subr.bf16.mxu0 %v5889_v1 }
0x3779   :  { %5339 = vmatpush3.bf16.xpose.msra.mxu0 %v5997_v12 }
0x377a   :  { %5340 = vmatprep.subr.bf16.mxu0 %v5889_v1 }
0x3781   :  { %5341 = vmatpush3.bf16.xpose.msra.mxu0 %v6007_v14 }
0x3782   :  { %5342 = vmatprep.subr.bf16.mxu0 %v5889_v1 }
0x3789   :  { %5343 = vmatpush3.bf16.xpose.msra.mxu0 %v6017_v16 }
0x378a   :  { %5368 = vmatprep.subr.bf16.mxu0 %v5889_v1 }
0x3823   :  { %v2821_v57 = vpop.f32.mrb[40].mxu0 }
0x3824   :  { %v2827_v58 = vadd.f32 %v2821_v57, %v2779_v53  ;;  %v5306_v61 = vpop.f32.mrb[41].mxu0 }
0x3825   :  { %v2824_v62 = vpop.f32.mrb[42].mxu0 }
0x3826   :  { %5708 = vtanh.f32 %v2827_v58  ;;  %v5307_v63 = vpop.f32.mrb[43].mxu0  ;;  %v4555_v9 = vmul.f32 -1.442695, %v2827_v58 }
0x3828   :  { %5710 = vpow2.f32 %v4555_v9 }
0x3830   :  { %v5709_v0 = vpop.eup %5708 }
0x3831   :  { %2837 = vrot.lane.b32.xlu1 %v5709_v0, %s5891_s20 }
0x3832   :  { %v5711_v11 = vpop.eup %5710 }
0x3833   :  { %v2831_v13 = vadd.f32 1.0, %v5711_v11 }
0x3835   :  { %5712 = vrcp.f32 %v2831_v13 }
0x383f   :  { %v5713_v15 = vpop.eup %5712 }
0x3840   :  { %v2835_v20 = vmul.f32 %v5713_v15, %v2713_v43 }
0x38a3   :  { %v2838_v17 = vpop.permute.xlu1 %2837 }
0x38a4   :  { %v2840_v19 = vmul.f32 %v5713_v15, %v2838_v17 }
0x38a6   :  { %2842 = vrot.lane.b32.xlu0 %v2840_v19, %s5892_s21  ;;  %v3033_v19 = vld [vmem:[%s3032_s22] sm:$0x1]  ;;  %s4577_s22 = sld [smem:[#allocation5 + $0x9a]] }
0x38ac   :  { %s3566_s25 = scalar_lea.vmem %s7613_s1, %s4577_s22  ;;  %s4588_s22 = sld [smem:[#allocation5 + $0x1d]] }
0x38b2   :  { %s3956_s27 = scalar_lea.vmem %s7613_s1, %s4588_s22 }
0x3918   :  { %v2843_v21 = vpop.permute.xlu0 %2842 }
0x3919   :  { %v2845_v22 = vadd.f32 %v2843_v21, %v2835_v20 }
0x391b   :  { %5714 = vtanh.f32 %v2845_v22 }
0x3925   :  { %v5715_v23 = vpop.eup %5714 }
0x3926   :  { %2848 = vrot.lane.b32.xlu1 %v5715_v23, %s5891_s20 }
0x3998   :  { %v2849_v24 = vpop.permute.xlu1 %2848 }
0x3999   :  { %v6733_v25 = vmul.f32 %v5713_v15, %v2849_v24  ;;  %v3039_v15 = vld [vmem:[%s3038_s17] sm:$0x1] }
0x399a   :  { %v3041_v17 = vrot.slane %v3039_v15, 7 }
0x399b   :  { %v2912_v28 = vpack.c.bf16 %v6733_v25, %v6733_v25 }
0x399c   :  { %v3043_v20 = vsel %vm71_vm3, %v3033_v19, %v3041_v17 }
0x399d   :  { %2914 = vrot.lane.b32.xlu0 %v2912_v28, %s5892_s21 }
0x3a0f   :  { %v2915_v32 = vpop.permute.xlu0 %2914 }
0x3a10   :  { %5325 = vmatmul.mubr.msk.bf16.vlgmr.msra.gmra.mrb[40].mxu1 %vm114_vm0, %v2915_v32 }
0x3a11   :  { %5349 = vmatpush3.bf16.xpose.msra.mxu1 %v5939_v2  ;;  %5364 = vmatprep.mubr.msk.bf16.mxu1 %vm5890_vm2, %v5889_v1 }
0x3a12   :  { %5350 = vmatprep.subr.bf16.mxu1 %v5889_v1 }
0x3a19   :  { %5351 = vmatpush3.bf16.xpose.msra.mxu1 %v5949_v4 }
0x3a1a   :  { %5352 = vmatprep.subr.bf16.mxu1 %v5889_v1 }
0x3a21   :  { %5353 = vmatpush3.bf16.xpose.msra.mxu1 %v5967_v6 }
0x3a22   :  { %5354 = vmatprep.subr.bf16.mxu1 %v5889_v1 }
0x3a29   :  { %5355 = vmatpush3.bf16.xpose.msra.mxu1 %v5977_v8 }
0x3a2a   :  { %5356 = vmatprep.subr.bf16.mxu1 %v5889_v1 }
0x3a31   :  { %5357 = vmatpush3.bf16.xpose.msra.mxu1 %v5987_v10 }
0x3a32   :  { %5358 = vmatprep.subr.bf16.mxu1 %v5889_v1 }
0x3a39   :  { %5359 = vmatpush3.bf16.xpose.msra.mxu1 %v5997_v12 }
0x3a3a   :  { %5360 = vmatprep.subr.bf16.mxu1 %v5889_v1 }
0x3a41   :  { %5361 = vmatpush3.bf16.xpose.msra.mxu1 %v6007_v14 }
0x3a42   :  { %5362 = vmatprep.subr.bf16.mxu1 %v5889_v1 }
0x3a49   :  { %5363 = vmatpush3.bf16.xpose.msra.mxu1 %v6017_v16 }
0x3a4a   :  { %5388 = vmatprep.subr.bf16.mxu1 %v5889_v1 }
0x3ae3   :  { %v2953_v39 = vpop.f32.mrb[40].mxu1 }
0x3ae4   :  { %v2959_v40 = vadd.f32 %v2953_v39, %v2911_v38  ;;  %v5326_v43 = vpop.f32.mrb[41].mxu1 }
0x3ae5   :  { %v2956_v44 = vpop.f32.mrb[42].mxu1 }
0x3ae6   :  { %5716 = vtanh.f32 %v2959_v40  ;;  %v5327_v45 = vpop.f32.mrb[43].mxu1  ;;  %v4559_v48 = vmul.f32 -1.442695, %v2959_v40 }
0x3ae8   :  { %5718 = vpow2.f32 %v4559_v48 }
0x3af0   :  { %v5717_v47 = vpop.eup %5716 }
0x3af1   :  { %2969 = vrot.lane.b32.xlu1 %v5717_v47, %s5891_s20 }
0x3af2   :  { %v5719_v49 = vpop.eup %5718 }
0x3af3   :  { %v2963_v51 = vadd.f32 1.0, %v5719_v49 }
0x3af5   :  { %5720 = vrcp.f32 %v2963_v51 }
0x3aff   :  { %v5721_v52 = vpop.eup %5720 }
0x3b00   :  { %v2967_v58 = vmul.f32 %v5721_v52, %v2845_v22 }
0x3b63   :  { %v2970_v53 = vpop.permute.xlu1 %2969 }
0x3b64   :  { %v2972_v57 = vmul.f32 %v5721_v52, %v2970_v53  ;;  %v3171_v53 = vld [vmem:[%s3170_s26] sm:$0x1] }
0x3b66   :  { %2974 = vrot.lane.b32.xlu0 %v2972_v57, %s5892_s21  ;;  %v3173_v57 = vrot.slane %v3171_v53, 7 }
0x3bd8   :  { %v2975_v61 = vpop.permute.xlu0 %2974 }
0x3bd9   :  { %v2977_v62 = vadd.f32 %v2975_v61, %v2967_v58  ;;  %v3165_v58 = vld [vmem:[%s3164_s29] sm:$0x1]  ;;  %s4581_s29 = sld [smem:[#allocation5 + $0x9b]] }
0x3bda   :  { %v3175_v61 = vsel %vm71_vm3, %v3165_v58, %v3173_v57 }
0x3bdb   :  { %5722 = vtanh.f32 %v2977_v62 }
0x3bdf   :  { %s3698_s8 = scalar_lea.vmem %s7613_s1, %s4581_s29  ;;  %s4592_s29 = sld [smem:[#allocation5 + $0x1e]] }
0x3be5   :  { %v5723_v63 = vpop.eup %5722  ;;  %s4088_s10 = scalar_lea.vmem %s7613_s1, %s4592_s29 }
0x3be6   :  { %2980 = vrot.lane.b32.xlu1 %v5723_v63, %s5891_s20 }
0x3c58   :  { %v2981_v0 = vpop.permute.xlu1 %2980 }
0x3c59   :  { %v6767_v9 = vmul.f32 %v5721_v52, %v2981_v0 }
0x3c5b   :  { %v3044_v11 = vpack.c.bf16 %v6767_v9, %v6767_v9 }
0x3c5d   :  { %3046 = vrot.lane.b32.xlu0 %v3044_v11, %s5892_s21 }
0x3ccf   :  { %v3047_v13 = vpop.permute.xlu0 %3046 }
0x3cd0   :  { %5345 = vmatmul.mubr.msk.bf16.vlgmr.msra.gmra.mrb[44].mxu0 %vm114_vm0, %v3047_v13 }
0x3cd1   :  { %5369 = vmatpush3.bf16.xpose.msra.mxu0 %v5939_v2  ;;  %5384 = vmatprep.mubr.msk.bf16.mxu0 %vm5890_vm2, %v5889_v1 }
0x3cd2   :  { %5370 = vmatprep.subr.bf16.mxu0 %v5889_v1 }
0x3cd9   :  { %5371 = vmatpush3.bf16.xpose.msra.mxu0 %v5949_v4 }
0x3cda   :  { %5372 = vmatprep.subr.bf16.mxu0 %v5889_v1 }
0x3ce1   :  { %5373 = vmatpush3.bf16.xpose.msra.mxu0 %v5967_v6 }
0x3ce2   :  { %5374 = vmatprep.subr.bf16.mxu0 %v5889_v1 }
0x3ce9   :  { %5375 = vmatpush3.bf16.xpose.msra.mxu0 %v5977_v8 }
0x3cea   :  { %5376 = vmatprep.subr.bf16.mxu0 %v5889_v1 }
0x3cf1   :  { %5377 = vmatpush3.bf16.xpose.msra.mxu0 %v5987_v10 }
0x3cf2   :  { %5378 = vmatprep.subr.bf16.mxu0 %v5889_v1 }
0x3cf9   :  { %5379 = vmatpush3.bf16.xpose.msra.mxu0 %v5997_v12 }
0x3cfa   :  { %5380 = vmatprep.subr.bf16.mxu0 %v5889_v1 }
0x3d01   :  { %5381 = vmatpush3.bf16.xpose.msra.mxu0 %v6007_v14 }
0x3d02   :  { %5382 = vmatprep.subr.bf16.mxu0 %v5889_v1 }
0x3d09   :  { %5383 = vmatpush3.bf16.xpose.msra.mxu0 %v6017_v16 }
0x3d0a   :  { %5408 = vmatprep.subr.bf16.mxu0 %v5889_v1 }
0x3da3   :  { %v3085_v21 = vpop.f32.mrb[44].mxu0 }
0x3da4   :  { %v3091_v22 = vadd.f32 %v3085_v21, %v3043_v20  ;;  %v5346_v23 = vpop.f32.mrb[45].mxu0 }
0x3da5   :  { %v3088_v24 = vpop.f32.mrb[46].mxu0 }
0x3da6   :  { %5724 = vtanh.f32 %v3091_v22  ;;  %v5347_v28 = vpop.f32.mrb[47].mxu0  ;;  %v4563_v33 = vmul.f32 -1.442695, %v3091_v22 }
0x3da8   :  { %5726 = vpow2.f32 %v4563_v33 }
0x3db0   :  { %v5725_v32 = vpop.eup %5724 }
0x3db1   :  { %3101 = vrot.lane.b32.xlu1 %v5725_v32, %s5891_s20 }
0x3db2   :  { %v5727_v36 = vpop.eup %5726 }
0x3db3   :  { %v3095_v37 = vadd.f32 1.0, %v5727_v36 }
0x3db5   :  { %5728 = vrcp.f32 %v3095_v37 }
0x3dbf   :  { %v5729_v38 = vpop.eup %5728 }
0x3dc0   :  { %v3099_v43 = vmul.f32 %v5729_v38, %v2977_v62 }
0x3e23   :  { %v3102_v39 = vpop.permute.xlu1 %3101 }
0x3e24   :  { %v3104_v40 = vmul.f32 %v5729_v38, %v3102_v39 }
0x3e26   :  { %3106 = vrot.lane.b32.xlu0 %v3104_v40, %s5892_s21  ;;  %v3303_v40 = vld [vmem:[%s3302_s9] sm:$0x1] }
0x3e98   :  { %v3107_v44 = vpop.permute.xlu0 %3106 }
0x3e99   :  { %v3109_v45 = vadd.f32 %v3107_v44, %v3099_v43  ;;  %v3305_v43 = vrot.slane %v3303_v40, 7  ;;  %v3297_v44 = vld [vmem:[%s3296_s12] sm:$0x1]  ;;  %s4585_s12 = sld [smem:[#allocation5 + $0x9c]] }
0x3e9b   :  { %5730 = vtanh.f32 %v3109_v45 }
0x3e9f   :  { %s3830_s15 = scalar_lea.vmem %s7613_s1, %s4585_s12  ;;  %s4596_s12 = sld [smem:[#allocation5 + $0x1f]] }
0x3ea5   :  { %v5731_v47 = vpop.eup %5730  ;;  %s4220_s17 = scalar_lea.vmem %s7613_s1, %s4596_s12 }
0x3ea6   :  { %3112 = vrot.lane.b32.xlu1 %v5731_v47, %s5891_s20 }
0x3f18   :  { %v3113_v48 = vpop.permute.xlu1 %3112 }
0x3f19   :  { %v6801_v49 = vmul.f32 %v5729_v38, %v3113_v48 }
0x3f1b   :  { %v3176_v51 = vpack.c.bf16 %v6801_v49, %v6801_v49 }
0x3f1d   :  { %3178 = vrot.lane.b32.xlu0 %v3176_v51, %s5892_s21 }
0x3f8f   :  { %v3179_v52 = vpop.permute.xlu0 %3178 }
0x3f90   :  { %5365 = vmatmul.mubr.msk.bf16.vlgmr.msra.gmra.mrb[44].mxu1 %vm114_vm0, %v3179_v52 }
0x3f91   :  { %5389 = vmatpush3.bf16.xpose.msra.mxu1 %v5939_v2  ;;  %5404 = vmatprep.mubr.msk.bf16.mxu1 %vm5890_vm2, %v5889_v1 }
0x3f92   :  { %5390 = vmatprep.subr.bf16.mxu1 %v5889_v1 }
0x3f99   :  { %5391 = vmatpush3.bf16.xpose.msra.mxu1 %v5949_v4 }
0x3f9a   :  { %5392 = vmatprep.subr.bf16.mxu1 %v5889_v1 }
0x3fa1   :  { %5393 = vmatpush3.bf16.xpose.msra.mxu1 %v5967_v6 }
0x3fa2   :  { %5394 = vmatprep.subr.bf16.mxu1 %v5889_v1 }
0x3fa9   :  { %5395 = vmatpush3.bf16.xpose.msra.mxu1 %v5977_v8 }
0x3faa   :  { %5396 = vmatprep.subr.bf16.mxu1 %v5889_v1 }
0x3fb1   :  { %5397 = vmatpush3.bf16.xpose.msra.mxu1 %v5987_v10 }
0x3fb2   :  { %5398 = vmatprep.subr.bf16.mxu1 %v5889_v1 }
0x3fb9   :  { %5399 = vmatpush3.bf16.xpose.msra.mxu1 %v5997_v12 }
0x3fba   :  { %5400 = vmatprep.subr.bf16.mxu1 %v5889_v1 }
0x3fc1   :  { %5401 = vmatpush3.bf16.xpose.msra.mxu1 %v6007_v14 }
0x3fc2   :  { %5402 = vmatprep.subr.bf16.mxu1 %v5889_v1 }
0x3fc9   :  { %5403 = vmatpush3.bf16.xpose.msra.mxu1 %v6017_v16 }
0x3fca   :  { %5428 = vmatprep.subr.bf16.mxu1 %v5889_v1 }
0x4063   :  { %v3217_v62 = vpop.f32.mrb[44].mxu1 }
0x4064   :  { %v3223_v63 = vadd.f32 %v3217_v62, %v3175_v61  ;;  %v5366_v0 = vpop.f32.mrb[45].mxu1 }
0x4065   :  { %v3220_v11 = vpop.f32.mrb[46].mxu1 }
0x4066   :  { %5732 = vtanh.f32 %v3223_v63  ;;  %v5367_v13 = vpop.f32.mrb[47].mxu1  ;;  %v4567_v17 = vmul.f32 -1.442695, %v3223_v63 }
0x4068   :  { %5734 = vpow2.f32 %v4567_v17 }
0x4070   :  { %v5733_v15 = vpop.eup %5732 }
0x4071   :  { %3233 = vrot.lane.b32.xlu1 %v5733_v15, %s5891_s20 }
0x4072   :  { %v5735_v19 = vpop.eup %5734 }
0x4073   :  { %v3227_v20 = vadd.f32 1.0, %v5735_v19 }
0x4075   :  { %5736 = vrcp.f32 %v3227_v20 }
0x407f   :  { %v5737_v21 = vpop.eup %5736 }
0x4080   :  { %v3231_v24 = vmul.f32 %v5737_v21, %v3109_v45  ;;  %v3307_v45 = vsel %vm71_vm3, %v3297_v44, %v3305_v43 }
0x40e3   :  { %v3234_v22 = vpop.permute.xlu1 %3233 }
0x40e4   :  { %v3236_v23 = vmul.f32 %v5737_v21, %v3234_v22 }
0x40e6   :  { %3238 = vrot.lane.b32.xlu0 %v3236_v23, %s5892_s21 }
0x4158   :  { %v3239_v28 = vpop.permute.xlu0 %3238 }
0x4159   :  { %v3241_v32 = vadd.f32 %v3239_v28, %v3231_v24  ;;  %v3435_v24 = vld [vmem:[%s3434_s16] sm:$0x1] }
0x415a   :  { %v3437_v28 = vrot.slane %v3435_v24, 7 }
0x415b   :  { %5738 = vtanh.f32 %v3241_v32 }
0x4165   :  { %v5739_v33 = vpop.eup %5738 }
0x4166   :  { %3244 = vrot.lane.b32.xlu1 %v5739_v33, %s5891_s20 }
0x41d8   :  { %v3245_v36 = vpop.permute.xlu1 %3244 }
0x41d9   :  { %v6835_v37 = vmul.f32 %v5737_v21, %v3245_v36 }
0x41db   :  { %v3308_v38 = vpack.c.bf16 %v6835_v37, %v6835_v37 }
0x41dd   :  { %3310 = vrot.lane.b32.xlu0 %v3308_v38, %s5892_s21 }
0x424f   :  { %v3311_v39 = vpop.permute.xlu0 %3310 }
0x4250   :  { %5385 = vmatmul.mubr.msk.bf16.vlgmr.msra.gmra.mrb[48].mxu0 %vm114_vm0, %v3311_v39 }
0x4251   :  { %5409 = vmatpush3.bf16.xpose.msra.mxu0 %v5939_v2  ;;  %5424 = vmatprep.mubr.msk.bf16.mxu0 %vm5890_vm2, %v5889_v1 }
0x4252   :  { %5410 = vmatprep.subr.bf16.mxu0 %v5889_v1 }
0x4259   :  { %5411 = vmatpush3.bf16.xpose.msra.mxu0 %v5949_v4 }
0x425a   :  { %5412 = vmatprep.subr.bf16.mxu0 %v5889_v1 }
0x4261   :  { %5413 = vmatpush3.bf16.xpose.msra.mxu0 %v5967_v6 }
0x4262   :  { %5414 = vmatprep.subr.bf16.mxu0 %v5889_v1 }
0x4269   :  { %5415 = vmatpush3.bf16.xpose.msra.mxu0 %v5977_v8 }
0x426a   :  { %5416 = vmatprep.subr.bf16.mxu0 %v5889_v1 }
0x4271   :  { %5417 = vmatpush3.bf16.xpose.msra.mxu0 %v5987_v10 }
0x4272   :  { %5418 = vmatprep.subr.bf16.mxu0 %v5889_v1 }
0x4279   :  { %5419 = vmatpush3.bf16.xpose.msra.mxu0 %v5997_v12 }
0x427a   :  { %5420 = vmatprep.subr.bf16.mxu0 %v5889_v1 }
0x4281   :  { %5421 = vmatpush3.bf16.xpose.msra.mxu0 %v6007_v14 }
0x4282   :  { %5422 = vmatprep.subr.bf16.mxu0 %v5889_v1 }
0x4289   :  { %5423 = vmatpush3.bf16.xpose.msra.mxu0 %v6017_v16 }
0x428a   :  { %5448 = vmatprep.subr.bf16.mxu0 %v5889_v1 }
0x4323   :  { %v3349_v47 = vpop.f32.mrb[48].mxu0 }
0x4324   :  { %v3355_v48 = vadd.f32 %v3349_v47, %v3307_v45  ;;  %v5386_v51 = vpop.f32.mrb[49].mxu0 }
0x4325   :  { %v3352_v52 = vpop.f32.mrb[50].mxu0 }
0x4326   :  { %5740 = vtanh.f32 %v3355_v48  ;;  %v5387_v53 = vpop.f32.mrb[51].mxu0  ;;  %v4571_v58 = vmul.f32 -1.442695, %v3355_v48 }
0x4328   :  { %5742 = vpow2.f32 %v4571_v58 }
0x4330   :  { %v5741_v57 = vpop.eup %5740 }
0x4331   :  { %3365 = vrot.lane.b32.xlu1 %v5741_v57, %s5891_s20 }
0x4332   :  { %v5743_v61 = vpop.eup %5742 }
0x4333   :  { %v3359_v62 = vadd.f32 1.0, %v5743_v61 }
0x4335   :  { %5744 = vrcp.f32 %v3359_v62 }
0x433f   :  { %v5745_v63 = vpop.eup %5744 }
0x4340   :  { %v3363_v13 = vmul.f32 %v5745_v63, %v3241_v32  ;;  %v3429_v32 = vld [vmem:[%s3428_s19] sm:$0x1]  ;;  %s4589_s19 = sld [smem:[#allocation5 + $0x9d]] }
0x4341   :  { %v3439_v33 = vsel %vm71_vm3, %v3429_v32, %v3437_v28 }
0x4346   :  { %s3962_s0 = scalar_lea.vmem %s7613_s1, %s4589_s19 }
0x43a3   :  { %v3366_v0 = vpop.permute.xlu1 %3365 }
0x43a4   :  { %v3368_v11 = vmul.f32 %v5745_v63, %v3366_v0 }
0x43a6   :  { %3370 = vrot.lane.b32.xlu0 %v3368_v11, %s5892_s21 }
0x4418   :  { %v3371_v15 = vpop.permute.xlu0 %3370 }
0x4419   :  { %v3373_v17 = vadd.f32 %v3371_v15, %v3363_v13  ;;  %v3567_v15 = vld [vmem:[%s3566_s25] sm:$0x1] }
0x441b   :  { %5746 = vtanh.f32 %v3373_v17 }
0x4425   :  { %v5747_v19 = vpop.eup %5746 }
0x4426   :  { %3376 = vrot.lane.b32.xlu1 %v5747_v19, %s5891_s20  ;;  %v3561_v19 = vld [vmem:[%s3560_s28] sm:$0x1]  ;;  %s4593_s28 = sld [smem:[#allocation5 + $0x9e]] }
0x442c   :  { %s4094_s7 = scalar_lea.vmem %s7613_s1, %s4593_s28 }
0x4498   :  { %v3377_v20 = vpop.permute.xlu1 %3376 }
0x4499   :  { %v6869_v21 = vmul.f32 %v5745_v63, %v3377_v20 }
0x449b   :  { %v3440_v22 = vpack.c.bf16 %v6869_v21, %v6869_v21 }
0x449d   :  { %3442 = vrot.lane.b32.xlu0 %v3440_v22, %s5892_s21 }
0x450f   :  { %v3443_v23 = vpop.permute.xlu0 %3442 }
0x4510   :  { %5405 = vmatmul.mubr.msk.bf16.vlgmr.msra.gmra.mrb[48].mxu1 %vm114_vm0, %v3443_v23 }
0x4511   :  { %5429 = vmatpush3.bf16.xpose.msra.mxu1 %v5939_v2  ;;  %5444 = vmatprep.mubr.msk.bf16.mxu1 %vm5890_vm2, %v5889_v1 }
0x4512   :  { %5430 = vmatprep.subr.bf16.mxu1 %v5889_v1 }
0x4519   :  { %5431 = vmatpush3.bf16.xpose.msra.mxu1 %v5949_v4 }
0x451a   :  { %5432 = vmatprep.subr.bf16.mxu1 %v5889_v1 }
0x4521   :  { %5433 = vmatpush3.bf16.xpose.msra.mxu1 %v5967_v6 }
0x4522   :  { %5434 = vmatprep.subr.bf16.mxu1 %v5889_v1 }
0x4529   :  { %5435 = vmatpush3.bf16.xpose.msra.mxu1 %v5977_v8 }
0x452a   :  { %5436 = vmatprep.subr.bf16.mxu1 %v5889_v1 }
0x4531   :  { %5437 = vmatpush3.bf16.xpose.msra.mxu1 %v5987_v10 }
0x4532   :  { %5438 = vmatprep.subr.bf16.mxu1 %v5889_v1 }
0x4539   :  { %5439 = vmatpush3.bf16.xpose.msra.mxu1 %v5997_v12 }
0x453a   :  { %5440 = vmatprep.subr.bf16.mxu1 %v5889_v1 }
0x4541   :  { %5441 = vmatpush3.bf16.xpose.msra.mxu1 %v6007_v14 }
0x4542   :  { %5442 = vmatprep.subr.bf16.mxu1 %v5889_v1 }
0x4549   :  { %5443 = vmatpush3.bf16.xpose.msra.mxu1 %v6017_v16 }
0x454a   :  { %5468 = vmatprep.subr.bf16.mxu1 %v5889_v1 }
0x45e3   :  { %v3481_v36 = vpop.f32.mrb[48].mxu1 }
0x45e4   :  { %v3487_v38 = vadd.f32 %v3481_v36, %v3439_v33  ;;  %v5406_v39 = vpop.f32.mrb[49].mxu1 }
0x45e5   :  { %v3484_v40 = vpop.f32.mrb[50].mxu1 }
0x45e6   :  { %5748 = vtanh.f32 %v3487_v38  ;;  %v5407_v43 = vpop.f32.mrb[51].mxu1  ;;  %v4575_v45 = vmul.f32 -1.442695, %v3487_v38 }
0x45e8   :  { %5750 = vpow2.f32 %v4575_v45 }
0x45f0   :  { %v5749_v44 = vpop.eup %5748 }
0x45f1   :  { %3497 = vrot.lane.b32.xlu1 %v5749_v44, %s5891_s20 }
0x45f2   :  { %v5751_v47 = vpop.eup %5750 }
0x45f3   :  { %v3491_v48 = vadd.f32 1.0, %v5751_v47 }
0x45f5   :  { %5752 = vrcp.f32 %v3491_v48 }
0x45ff   :  { %v5753_v51 = vpop.eup %5752 }
0x4600   :  { %v3495_v57 = vmul.f32 %v5753_v51, %v3373_v17  ;;  %v3569_v17 = vrot.slane %v3567_v15, 7 }
0x4602   :  { %v3571_v20 = vsel %vm71_vm3, %v3561_v19, %v3569_v17 }
0x4663   :  { %v3498_v52 = vpop.permute.xlu1 %3497 }
0x4664   :  { %v3500_v53 = vmul.f32 %v5753_v51, %v3498_v52 }
0x4666   :  { %3502 = vrot.lane.b32.xlu0 %v3500_v53, %s5892_s21 }
0x46d8   :  { %v3503_v58 = vpop.permute.xlu0 %3502 }
0x46d9   :  { %v3505_v61 = vadd.f32 %v3503_v58, %v3495_v57 }
0x46db   :  { %5754 = vtanh.f32 %v3505_v61 }
0x46e5   :  { %v5755_v62 = vpop.eup %5754 }
0x46e6   :  { %3508 = vrot.lane.b32.xlu1 %v5755_v62, %s5891_s20 }
0x4758   :  { %v3509_v63 = vpop.permute.xlu1 %3508 }
0x4759   :  { %v6903_v0 = vmul.f32 %v5753_v51, %v3509_v63  ;;  %v3693_v63 = vld [vmem:[%s3692_s11] sm:$0x1]  ;;  %s4597_s11 = sld [smem:[#allocation5 + $0x9f]] }
0x475b   :  { %v3572_v11 = vpack.c.bf16 %v6903_v0, %v6903_v0 }
0x475d   :  { %3574 = vrot.lane.b32.xlu0 %v3572_v11, %s5892_s21 }
0x475f   :  { %s4226_s14 = scalar_lea.vmem %s7613_s1, %s4597_s11  ;;  %s5894_s1 = smov 96  }
0x47cf   :  { %v3575_v13 = vpop.permute.xlu0 %3574 }
0x47d0   :  { %5425 = vmatmul.mubr.msk.bf16.vlgmr.msra.gmra.mrb[52].mxu0 %vm114_vm0, %v3575_v13 }
0x47d1   :  { %5449 = vmatpush3.bf16.xpose.msra.mxu0 %v5939_v2  ;;  %5464 = vmatprep.mubr.msk.bf16.mxu0 %vm5890_vm2, %v5889_v1 }
0x47d2   :  { %5450 = vmatprep.subr.bf16.mxu0 %v5889_v1 }
0x47d9   :  { %5451 = vmatpush3.bf16.xpose.msra.mxu0 %v5949_v4 }
0x47da   :  { %5452 = vmatprep.subr.bf16.mxu0 %v5889_v1 }
0x47e1   :  { %5453 = vmatpush3.bf16.xpose.msra.mxu0 %v5967_v6 }
0x47e2   :  { %5454 = vmatprep.subr.bf16.mxu0 %v5889_v1 }
0x47e9   :  { %5455 = vmatpush3.bf16.xpose.msra.mxu0 %v5977_v8 }
0x47ea   :  { %5456 = vmatprep.subr.bf16.mxu0 %v5889_v1 }
0x47f1   :  { %5457 = vmatpush3.bf16.xpose.msra.mxu0 %v5987_v10 }
0x47f2   :  { %5458 = vmatprep.subr.bf16.mxu0 %v5889_v1 }
0x47f9   :  { %5459 = vmatpush3.bf16.xpose.msra.mxu0 %v5997_v12 }
0x47fa   :  { %5460 = vmatprep.subr.bf16.mxu0 %v5889_v1 }
0x4801   :  { %5461 = vmatpush3.bf16.xpose.msra.mxu0 %v6007_v14 }
0x4802   :  { %5462 = vmatprep.subr.bf16.mxu0 %v5889_v1 }
0x4809   :  { %5463 = vmatpush3.bf16.xpose.msra.mxu0 %v6017_v16 }
0x480a   :  { %5488 = vmatprep.subr.bf16.mxu0 %v5889_v1 }
0x48a3   :  { %v3613_v22 = vpop.f32.mrb[52].mxu0 }
0x48a4   :  { %v3619_v23 = vadd.f32 %v3613_v22, %v3571_v20  ;;  %v5426_v24 = vpop.f32.mrb[53].mxu0 }
0x48a5   :  { %v3616_v28 = vpop.f32.mrb[54].mxu0 }
0x48a6   :  { %5756 = vtanh.f32 %v3619_v23  ;;  %v5427_v32 = vpop.f32.mrb[55].mxu0  ;;  %v4579_v36 = vmul.f32 -1.442695, %v3619_v23 }
0x48a8   :  { %5758 = vpow2.f32 %v4579_v36 }
0x48b0   :  { %v5757_v33 = vpop.eup %5756 }
0x48b1   :  { %3629 = vrot.lane.b32.xlu1 %v5757_v33, %s5891_s20 }
0x48b2   :  { %v5759_v38 = vpop.eup %5758 }
0x48b3   :  { %v3623_v39 = vadd.f32 1.0, %v5759_v38 }
0x48b5   :  { %5760 = vrcp.f32 %v3623_v39 }
0x48bf   :  { %v5761_v40 = vpop.eup %5760 }
0x48c0   :  { %v3627_v45 = vmul.f32 %v5761_v40, %v3505_v61  ;;  %v3699_v61 = vld [vmem:[%s3698_s8] sm:$0x1] }
0x48c1   :  { %v3701_v62 = vrot.slane %v3699_v61, 7 }
0x48c3   :  { %v3703_v11 = vsel %vm71_vm3, %v3693_v63, %v3701_v62 }
0x4923   :  { %v3630_v43 = vpop.permute.xlu1 %3629 }
0x4924   :  { %v3632_v44 = vmul.f32 %v5761_v40, %v3630_v43 }
0x4926   :  { %3634 = vrot.lane.b32.xlu0 %v3632_v44, %s5892_s21 }
0x4998   :  { %v3635_v47 = vpop.permute.xlu0 %3634 }
0x4999   :  { %v3637_v48 = vadd.f32 %v3635_v47, %v3627_v45 }
0x499b   :  { %5762 = vtanh.f32 %v3637_v48 }
0x49a5   :  { %v5763_v51 = vpop.eup %5762 }
0x49a6   :  { %3640 = vrot.lane.b32.xlu1 %v5763_v51, %s5891_s20 }
0x4a18   :  { %v3641_v52 = vpop.permute.xlu1 %3640 }
0x4a19   :  { %v6937_v53 = vmul.f32 %v5761_v40, %v3641_v52 }
0x4a1b   :  { %v3704_v57 = vpack.c.bf16 %v6937_v53, %v6937_v53 }
0x4a1d   :  { %3706 = vrot.lane.b32.xlu0 %v3704_v57, %s5892_s21  ;;  %v3825_v57 = vld [vmem:[%s3824_s18] sm:$0x1] }
0x4a8f   :  { %v3707_v58 = vpop.permute.xlu0 %3706 }
0x4a90   :  { %5445 = vmatmul.mubr.msk.bf16.vlgmr.msra.gmra.mrb[52].mxu1 %vm114_vm0, %v3707_v58 }
0x4a91   :  { %5469 = vmatpush3.bf16.xpose.msra.mxu1 %v5939_v2  ;;  %5484 = vmatprep.mubr.msk.bf16.mxu1 %vm5890_vm2, %v5889_v1 }
0x4a92   :  { %5470 = vmatprep.subr.bf16.mxu1 %v5889_v1 }
0x4a99   :  { %5471 = vmatpush3.bf16.xpose.msra.mxu1 %v5949_v4 }
0x4a9a   :  { %5472 = vmatprep.subr.bf16.mxu1 %v5889_v1 }
0x4aa1   :  { %5473 = vmatpush3.bf16.xpose.msra.mxu1 %v5967_v6 }
0x4aa2   :  { %5474 = vmatprep.subr.bf16.mxu1 %v5889_v1 }
0x4aa9   :  { %5475 = vmatpush3.bf16.xpose.msra.mxu1 %v5977_v8 }
0x4aaa   :  { %5476 = vmatprep.subr.bf16.mxu1 %v5889_v1 }
0x4ab1   :  { %5477 = vmatpush3.bf16.xpose.msra.mxu1 %v5987_v10 }
0x4ab2   :  { %5478 = vmatprep.subr.bf16.mxu1 %v5889_v1 }
0x4ab9   :  { %5479 = vmatpush3.bf16.xpose.msra.mxu1 %v5997_v12 }
0x4aba   :  { %5480 = vmatprep.subr.bf16.mxu1 %v5889_v1 }
0x4ac1   :  { %5481 = vmatpush3.bf16.xpose.msra.mxu1 %v6007_v14 }
0x4ac2   :  { %5482 = vmatprep.subr.bf16.mxu1 %v5889_v1 }
0x4ac9   :  { %5483 = vmatpush3.bf16.xpose.msra.mxu1 %v6017_v16 }
0x4aca   :  { %5508 = vmatprep.subr.bf16.mxu1 %v5889_v1 }
0x4b63   :  { %v3745_v13 = vpop.f32.mrb[52].mxu1 }
0x4b64   :  { %v3751_v15 = vadd.f32 %v3745_v13, %v3703_v11  ;;  %v5446_v17 = vpop.f32.mrb[53].mxu1 }
0x4b65   :  { %v3748_v19 = vpop.f32.mrb[54].mxu1 }
0x4b66   :  { %5764 = vtanh.f32 %v3751_v15  ;;  %v5447_v20 = vpop.f32.mrb[55].mxu1  ;;  %v4583_v23 = vmul.f32 -1.442695, %v3751_v15 }
0x4b68   :  { %5766 = vpow2.f32 %v4583_v23 }
0x4b70   :  { %v5765_v22 = vpop.eup %5764 }
0x4b71   :  { %3761 = vrot.lane.b32.xlu1 %v5765_v22, %s5891_s20 }
0x4b72   :  { %v5767_v24 = vpop.eup %5766 }
0x4b73   :  { %v3755_v28 = vadd.f32 1.0, %v5767_v24 }
0x4b75   :  { %5768 = vrcp.f32 %v3755_v28 }
0x4b7f   :  { %v5769_v32 = vpop.eup %5768 }
0x4b80   :  { %v3759_v38 = vmul.f32 %v5769_v32, %v3637_v48  ;;  %v3831_v48 = vld [vmem:[%s3830_s15] sm:$0x1] }
0x4b81   :  { %v3833_v52 = vrot.slane %v3831_v48, 7 }
0x4b83   :  { %v3835_v58 = vsel %vm71_vm3, %v3825_v57, %v3833_v52 }
0x4be3   :  { %v3762_v33 = vpop.permute.xlu1 %3761 }
0x4be4   :  { %v3764_v36 = vmul.f32 %v5769_v32, %v3762_v33 }
0x4be6   :  { %3766 = vrot.lane.b32.xlu0 %v3764_v36, %s5892_s21 }
0x4c58   :  { %v3767_v39 = vpop.permute.xlu0 %3766 }
0x4c59   :  { %v3769_v40 = vadd.f32 %v3767_v39, %v3759_v38 }
0x4c5b   :  { %5770 = vtanh.f32 %v3769_v40 }
0x4c65   :  { %v5771_v43 = vpop.eup %5770 }
0x4c66   :  { %3772 = vrot.lane.b32.xlu1 %v5771_v43, %s5891_s20 }
0x4cd8   :  { %v3773_v44 = vpop.permute.xlu1 %3772 }
0x4cd9   :  { %v6971_v45 = vmul.f32 %v5769_v32, %v3773_v44 }
0x4cdb   :  { %v3836_v47 = vpack.c.bf16 %v6971_v45, %v6971_v45 }
0x4cdd   :  { %3838 = vrot.lane.b32.xlu0 %v3836_v47, %s5892_s21 }
0x4d4f   :  { %v3839_v51 = vpop.permute.xlu0 %3838 }
0x4d50   :  { %5465 = vmatmul.mubr.msk.bf16.vlgmr.msra.gmra.mrb[56].mxu0 %vm114_vm0, %v3839_v51 }
0x4d51   :  { %5489 = vmatpush3.bf16.xpose.msra.mxu0 %v5939_v2  ;;  %5504 = vmatprep.mubr.msk.bf16.mxu0 %vm5890_vm2, %v5889_v1 }
0x4d52   :  { %5490 = vmatprep.subr.bf16.mxu0 %v5889_v1 }
0x4d59   :  { %5491 = vmatpush3.bf16.xpose.msra.mxu0 %v5949_v4 }
0x4d5a   :  { %5492 = vmatprep.subr.bf16.mxu0 %v5889_v1 }
0x4d61   :  { %5493 = vmatpush3.bf16.xpose.msra.mxu0 %v5967_v6 }
0x4d62   :  { %5494 = vmatprep.subr.bf16.mxu0 %v5889_v1 }
0x4d69   :  { %5495 = vmatpush3.bf16.xpose.msra.mxu0 %v5977_v8 }
0x4d6a   :  { %5496 = vmatprep.subr.bf16.mxu0 %v5889_v1 }
0x4d71   :  { %5497 = vmatpush3.bf16.xpose.msra.mxu0 %v5987_v10 }
0x4d72   :  { %5498 = vmatprep.subr.bf16.mxu0 %v5889_v1 }
0x4d79   :  { %5499 = vmatpush3.bf16.xpose.msra.mxu0 %v5997_v12 }
0x4d7a   :  { %5500 = vmatprep.subr.bf16.mxu0 %v5889_v1 }
0x4d81   :  { %5501 = vmatpush3.bf16.xpose.msra.mxu0 %v6007_v14 }
0x4d82   :  { %5502 = vmatprep.subr.bf16.mxu0 %v5889_v1 }
0x4d89   :  { %5503 = vmatpush3.bf16.xpose.msra.mxu0 %v6017_v16 }
0x4e23   :  { %v3877_v61 = vpop.f32.mrb[56].mxu0 }
0x4e24   :  { %v3883_v62 = vadd.f32 %v3877_v61, %v3835_v58  ;;  %v5466_v63 = vpop.f32.mrb[57].mxu0 }
0x4e25   :  { %v3880_v11 = vpop.f32.mrb[58].mxu0 }
0x4e26   :  { %5772 = vtanh.f32 %v3883_v62  ;;  %v5467_v13 = vpop.f32.mrb[59].mxu0  ;;  %v4587_v17 = vmul.f32 -1.442695, %v3883_v62 }
0x4e28   :  { %5774 = vpow2.f32 %v4587_v17 }
0x4e30   :  { %v5773_v15 = vpop.eup %5772 }
0x4e31   :  { %3893 = vrot.lane.b32.xlu1 %v5773_v15, %s5891_s20 }
0x4e32   :  { %v5775_v19 = vpop.eup %5774 }
0x4e33   :  { %v3887_v20 = vadd.f32 1.0, %v5775_v19 }
0x4e35   :  { %5776 = vrcp.f32 %v3887_v20  ;;  %v4095_v20 = vld [vmem:[%s4094_s7] sm:$0x1] }
0x4e3f   :  { %v5777_v22 = vpop.eup %5776 }
0x4e40   :  { %v3891_v28 = vmul.f32 %v5777_v22, %v3769_v40 }
0x4ea3   :  { %v3894_v23 = vpop.permute.xlu1 %3893 }
0x4ea4   :  { %v3896_v24 = vmul.f32 %v5777_v22, %v3894_v23  ;;  %v4089_v23 = vld [vmem:[%s4088_s10] sm:$0x1] }
0x4ea6   :  { %3898 = vrot.lane.b32.xlu0 %v3896_v24, %s5892_s21 }
0x4f18   :  { %v3899_v32 = vpop.permute.xlu0 %3898 }
0x4f19   :  { %v3901_v33 = vadd.f32 %v3899_v32, %v3891_v28 }
0x4f1b   :  { %5778 = vtanh.f32 %v3901_v33 }
0x4f25   :  { %v5779_v36 = vpop.eup %5778 }
0x4f26   :  { %3904 = vrot.lane.b32.xlu1 %v5779_v36, %s5891_s20 }
0x4f98   :  { %v3905_v38 = vpop.permute.xlu1 %3904 }
0x4f99   :  { %v7004_v39 = vmul.f32 %v5777_v22, %v3905_v38  ;;  %v4097_v22 = vrot.slane %v4095_v20, 7 }
0x4f9b   :  { %v3968_v43 = vpack.c.bf16 %v7004_v39, %v7004_v39  ;;  %v4099_v24 = vsel %vm71_vm3, %v4089_v23, %v4097_v22 }
0x4f9d   :  { %3970 = vrot.lane.b32.xlu0 %v3968_v43, %s5892_s21 }
0x500f   :  { %v3971_v44 = vpop.permute.xlu0 %3970 }
0x5010   :  { %5485 = vmatmul.mubr.msk.bf16.vlgmr.msra.gmra.mrb[56].mxu1 %vm114_vm0, %v3971_v44 }
0x5011   :  { %5509 = vmatpush3.bf16.xpose.msra.mxu1 %v5939_v2  ;;  %5524 = vmatprep.mubr.msk.bf16.mxu1 %vm5890_vm2, %v5889_v1  ;;  %v3963_v2 = vld [vmem:[%s3962_s0] sm:$0x1] }
0x5012   :  { %5510 = vmatprep.subr.bf16.mxu1 %v5889_v1 }
0x5019   :  { %5511 = vmatpush3.bf16.xpose.msra.mxu1 %v5949_v4  ;;  %v3965_v4 = vrot.slane %v3963_v2, 7 }
0x501a   :  { %5512 = vmatprep.subr.bf16.mxu1 %v5889_v1 }
0x5021   :  { %5513 = vmatpush3.bf16.xpose.msra.mxu1 %v5967_v6  ;;  %v3957_v6 = vld [vmem:[%s3956_s27] sm:$0x1] }
0x5022   :  { %5514 = vmatprep.subr.bf16.mxu1 %v5889_v1 }
0x5029   :  { %5515 = vmatpush3.bf16.xpose.msra.mxu1 %v5977_v8  ;;  %v3967_v8 = vsel %vm71_vm3, %v3957_v6, %v3965_v4 }
0x502a   :  { %5516 = vmatprep.subr.bf16.mxu1 %v5889_v1 }
0x5031   :  { %5517 = vmatpush3.bf16.xpose.msra.mxu1 %v5987_v10 }
0x5032   :  { %5518 = vmatprep.subr.bf16.mxu1 %v5889_v1 }
0x5039   :  { %5519 = vmatpush3.bf16.xpose.msra.mxu1 %v5997_v12 }
0x503a   :  { %5520 = vmatprep.subr.bf16.mxu1 %v5889_v1 }
0x5041   :  { %5521 = vmatpush3.bf16.xpose.msra.mxu1 %v6007_v14 }
0x5042   :  { %5522 = vmatprep.subr.bf16.mxu1 %v5889_v1 }
0x5049   :  { %5523 = vmatpush3.bf16.xpose.msra.mxu1 %v6017_v16 }
0x50e3   :  { %v4009_v10 = vpop.f32.mrb[56].mxu1 }
0x50e4   :  { %v4015_v12 = vadd.f32 %v4009_v10, %v3967_v8  ;;  %v5486_v1 = vpop.f32.mrb[57].mxu1 }
0x50e5   :  { %v4012_v14 = vpop.f32.mrb[58].mxu1 }
0x50e6   :  { %5780 = vtanh.f32 %v4015_v12  ;;  %v5487_v16 = vpop.f32.mrb[59].mxu1  ;;  %v4591_v47 = vmul.f32 -1.442695, %v4015_v12 }
0x50e8   :  { %5782 = vpow2.f32 %v4591_v47 }
0x50f0   :  { %v5781_v40 = vpop.eup %5780 }
0x50f1   :  { %4025 = vrot.lane.b32.xlu1 %v5781_v40, %s5891_s20 }
0x50f2   :  { %v5783_v51 = vpop.eup %5782 }
0x50f3   :  { %v4019_v48 = vadd.f32 1.0, %v5783_v51 }
0x50f5   :  { %5784 = vrcp.f32 %v4019_v48 }
0x50ff   :  { %v5785_v52 = vpop.eup %5784 }
0x5100   :  { %v4023_v61 = vmul.f32 %v5785_v52, %v3901_v33 }
0x5163   :  { %v4026_v57 = vpop.permute.xlu1 %4025 }
0x5164   :  { %v4028_v58 = vmul.f32 %v5785_v52, %v4026_v57 }
0x5166   :  { %4030 = vrot.lane.b32.xlu0 %v4028_v58, %s5892_s21  ;;  %v4221_v58 = vld [vmem:[%s4220_s17] sm:$0x1] }
0x51d8   :  { %v4031_v62 = vpop.permute.xlu0 %4030 }
0x51d9   :  { %v4033_v63 = vadd.f32 %v4031_v62, %v4023_v61  ;;  %v5893_v61 = vmov 1966171168  }
0x51da   :  { %v213_v62 = vunpack.c.l.s4 %v5893_v61 }
0x51db   :  { %5786 = vtanh.f32 %v4033_v63 }
0x51e5   :  { %v5787_v11 = vpop.eup %5786 }
0x51e6   :  { %4036 = vrot.lane.b32.xlu1 %v5787_v11, %s5891_s20 }
0x5258   :  { %v4037_v13 = vpop.permute.xlu1 %4036 }
0x5259   :  { %v7037_v15 = vmul.f32 %v5785_v52, %v4037_v13  ;;  %v4227_v52 = vld [vmem:[%s4226_s14] sm:$0x1]  ;;  %v214_v13 = vunpack.c.0.s8 %v213_v62 }
0x525a   :  { %v4229_v57 = vrot.slane %v4227_v52, 7 }
0x525b   :  { %v4100_v17 = vpack.c.bf16 %v7037_v15, %v7037_v15 }
0x525c   :  { %v4231_v11 = vsel %vm71_vm3, %v4221_v58, %v4229_v57 }
0x525d   :  { %4102 = vrot.lane.b32.xlu0 %v4100_v17, %s5892_s21 }
0x52cf   :  { %v4103_v19 = vpop.permute.xlu0 %4102 }
0x52d0   :  { %5505 = vmatmul.mubr.msk.bf16.vlgmr.msra.gmra.mrb[60].mxu0 %vm114_vm0, %v4103_v19 }
0x53a3   :  { %v4141_v28 = vpop.f32.mrb[60].mxu0 }
0x53a4   :  { %v4147_v32 = vadd.f32 %v4141_v28, %v4099_v24  ;;  %v5506_v33 = vpop.f32.mrb[61].mxu0 }
0x53a5   :  { %v4144_v36 = vpop.f32.mrb[62].mxu0 }
0x53a6   :  { %5788 = vtanh.f32 %v4147_v32  ;;  %v5507_v38 = vpop.f32.mrb[63].mxu0  ;;  %v4595_v44 = vmul.f32 -1.442695, %v4147_v32 }
0x53a8   :  { %5790 = vpow2.f32 %v4595_v44 }
0x53b0   :  { %v5789_v43 = vpop.eup %5788 }
0x53b1   :  { %4157 = vrot.lane.b32.xlu1 %v5789_v43, %s5891_s20 }
0x53b2   :  { %v5791_v2 = vpop.eup %5790 }
0x53b3   :  { %v4151_v4 = vadd.f32 1.0, %v5791_v2 }
0x53b5   :  { %5792 = vrcp.f32 %v4151_v4 }
0x53bf   :  { %v5793_v6 = vpop.eup %5792 }
0x53c0   :  { %v4155_v12 = vmul.f32 %v5793_v6, %v4033_v63  ;;  %v215_v63 = vlaneseq }
0x53c2   :  { %v216_v17 = vshrl.u32 %v215_v63, 7 }
0x53c4   :  { %v7072_v28 = vsub.s32 %v214_v13, %v216_v17  ;;  %v7088_v43 = vsub.s32 0, %v216_v17 }
0x53c6   :  { %v7076_v32 = vrot.slane %v6053_v42, %v7072_v28  ;;  %v7082_v36 = vrot.slane %v6087_v5, %v7072_v28  ;;  %v7086_v38 = vrot.slane %v6121_v35, %v7072_v28  ;;  %v7097_v4 = vrot.slane %v6155_v60, %v7072_v28 }
0x53c7   :  { %v7133_v57 = vrot.slane %v6291_v54, %v7072_v28  ;;  %v7142_v62 = vrot.slane %v6325_v26, %v7072_v28  ;;  %v7151_v13 = vrot.slane %v6359_v55, %v7072_v28 }
0x53c8   :  { %v226_v33 = vrot.slane %v7076_v32, %v7072_v28  ;;  %v359_v42 = vrot.slane %v7082_v36, %v7072_v28  ;;  %v484_v2 = vcombine.high %v7086_v38, %v7086_v38 }
0x53c9   :  { %v1144_v61 = vcombine.high %v7133_v57, %v7133_v57 }
0x53ca   :  { %v237_v5 = vrot.slane %v226_v33, %v7088_v43  ;;  %v498_v35 = vrot.slane %v484_v2, %v7072_v28  ;;  %v7169_v33 = vrot.slane %v6427_v59, %v7072_v28  ;;  %v7178_v2 = vrot.slane %v6461_v34, %v7072_v28 }
0x53cb   :  { %v1158_v54 = vrot.slane %v1144_v61, %v7072_v28 }
0x5423   :  { %v4158_v8 = vpop.permute.xlu1 %4157 }
0x5424   :  { %v4160_v10 = vmul.f32 %v5793_v6, %v4158_v8  ;;  %v7106_v8 = vrot.slane %v6189_v30, %v7072_v28 }
0x5426   :  { %4162 = vrot.lane.b32.xlu0 %v4160_v10, %s5892_s21  ;;  %v370_v10 = vrot.slane %v359_v42, %v7088_v43  ;;  %v1672_v42 = vcombine.high %v7169_v33, %v7169_v33 }
0x5428   :  { %v1686_v59 = vrot.slane %v1672_v42, %v7072_v28 }
0x5498   :  { %v4163_v1 = vpop.permute.xlu0 %4162 }
0x5499   :  { %v7052_v14 = vadd.f32 %v4163_v1, %v4155_v12  ;;  %v748_v12 = vcombine.high %v7106_v8, %v7106_v8  ;;  %v7115_v1 = vrot.slane %v6223_v56, %v7072_v28 }
0x549b   :  { %5794 = vtanh.f32 %v7052_v14  ;;  %v762_v30 = vrot.slane %v748_v12, %v7072_v28  ;;  %v7196_v12 = vrot.slane %v6529_v41, %v7072_v28 }
0x549d   :  { %v770_v58 = vrot.slane %v762_v30, %v7088_v43  ;;  %v2068_v30 = vcombine.high %v7196_v12, %v7196_v12 }
0x549f   :  { %v2082_v41 = vrot.slane %v2068_v30, %v7072_v28 }
0x54a5   :  { %v5795_v16 = vpop.eup %5794 }
0x54a6   :  { %4168 = vrot.lane.b32.xlu1 %v5795_v16, %s5891_s20  ;;  %v506_v16 = vrot.slane %v498_v35, %v7088_v43  ;;  %v1804_v35 = vcombine.high %v7178_v2, %v7178_v2 }
0x54a8   :  { %v1818_v34 = vrot.slane %v1804_v35, %v7072_v28 }
0x5518   :  { %v4169_v40 = vpop.permute.xlu1 %4168 }
0x5519   :  { %v7056_v47 = vmul.f32 %v5793_v6, %v4169_v40  ;;  %v616_v6 = vcombine.high %v7097_v4, %v7097_v4  ;;  %v880_v40 = vcombine.high %v7115_v1, %v7115_v1 }
0x551b   :  { %v4232_v51 = vpack.c.bf16 %v7056_v47, %v7056_v47  ;;  %v630_v60 = vrot.slane %v616_v6, %v7072_v28  ;;  %v894_v56 = vrot.slane %v880_v40, %v7072_v28  ;;  %v7187_v6 = vrot.slane %v6495_v3, %v7072_v28 }
0x551c   :  { %v7205_v40 = vrot.slane %v6563_v18, %v7072_v28 }
0x551d   :  { %4234 = vrot.lane.b32.xlu0 %v4232_v51, %s5892_s21  ;;  %v7124_v51 = vrot.slane %v6257_v27, %v7072_v28  ;;  %v902_v63 = vrot.slane %v894_v56, %v7088_v43 }
0x551e   :  { %v2200_v56 = vcombine.high %v7205_v40, %v7205_v40 }
0x551f   :  { %v1012_v52 = vcombine.high %v7124_v51, %v7124_v51 }
0x5521   :  { %v1026_v27 = vrot.slane %v1012_v52, %v7072_v28 }
0x5523   :  { %v1034_v17 = vrot.slane %v1026_v27, %v7088_v43  ;;  %v2090_v27 = vrot.slane %v2082_v41, %v7088_v43 }
0x558f   :  { %v4235_v48 = vpop.permute.xlu0 %4234 }
0x5590   :  { %5525 = vmatmul.mubr.msk.bf16.vlgmr.msra.gmra.mrb[60].mxu1 %vm114_vm0, %v4235_v48  ;;  %v638_v48 = vrot.slane %v630_v60, %v7088_v43  ;;  %v1936_v60 = vcombine.high %v7187_v6, %v7187_v6 }
0x5592   :  { %v1950_v3 = vrot.slane %v1936_v60, %v7072_v28 }
0x5594   :  { %v1958_v52 = vrot.slane %v1950_v3, %v7088_v43 }
0x5663   :  { %v4273_v19 = vpop.f32.mrb[60].mxu1 }
0x5664   :  { %v7069_v20 = vadd.f32 %v4273_v19, %v4231_v11  ;;  %v5526_v22 = vpop.f32.mrb[61].mxu1  ;;  %v1276_v11 = vcombine.high %v7142_v62, %v7142_v62  ;;  %v1408_v19 = vcombine.high %v7151_v13, %v7151_v13 }
0x5665   :  { %v4276_v23 = vpop.f32.mrb[62].mxu1  ;;  %v7160_v22 = vrot.slane %v6393_v29, %v7072_v28 }
0x5666   :  { %5796 = vtanh.f32 %v7069_v20  ;;  %v5527_v24 = vpop.f32.mrb[63].mxu1  ;;  %v1290_v26 = vrot.slane %v1276_v11, %v7072_v28  ;;  %v1166_v23 = vrot.slane %v1158_v54, %v7088_v43  ;;  %v1422_v55 = vrot.slane %v1408_v19, %v7072_v28 }
0x5667   :  { %v1540_v24 = vcombine.high %v7160_v22, %v7160_v22  ;;  %v4599_v61 = vmul.f32 -1.442695, %v7069_v20  ;;  %v219_v11 = vcombine.high %v7076_v32, %v7076_v32 }
0x5669   :  { %v1554_v29 = vrot.slane %v1540_v24, %v7072_v28  ;;  %5798 = vpow2.f32 %v4599_v61  ;;  %v233_v19 = vrot.slane %v219_v11, %v7072_v28 }
0x566b   :  { %v241_v32 = vrot.slane %v233_v19, %v7088_v43 }
0x5670   :  { %v5797_v44 = vpop.eup %5796 }
0x5671   :  { %4289 = vrot.lane.b32.xlu1 %v5797_v44, %s5891_s20  ;;  %v1298_v44 = vrot.slane %v1290_v26, %v7088_v43 }
0x5675   :  { %242 = vrot.lane.b32.xlu1 %v237_v5, %s5892_s21  ;;  %v1430_v5 = vrot.slane %v1422_v55, %v7088_v43 }
0x5679   :  { %375 = vrot.lane.b32.xlu1 %v370_v10, %s5892_s21  ;;  %v1562_v10 = vrot.slane %v1554_v29, %v7088_v43  ;;  %v491_v29 = vrot.slane %v7086_v38, %v7072_v28  ;;  %v755_v38 = vrot.slane %v7106_v8, %v7072_v28  ;;  %v1019_v8 = vrot.slane %v7124_v51, %v7072_v28 }
0x567a   :  { %v1283_v51 = vrot.slane %v7142_v62, %v7072_v28  ;;  %v1547_v62 = vrot.slane %v7160_v22, %v7072_v28  ;;  %v1811_v22 = vrot.slane %v7178_v2, %v7072_v28  ;;  %v2075_v2 = vrot.slane %v7196_v12, %v7072_v28 }
0x567b   :  { %v766_v60 = vrot.slane %v755_v38, %v7088_v43 }
0x567c   :  { %v1822_v19 = vrot.slane %v1811_v22, %v7088_v43 }
0x567d   :  { %509 = vrot.lane.b32.xlu1 %v506_v16, %s5892_s21  ;;  %v1694_v16 = vrot.slane %v1686_v59, %v7088_v43  ;;  %v502_v59 = vrot.slane %v491_v29, %v7088_v43  ;;  %v7311_v29 = vrot.slane %v6631_v31, %v7072_v28  ;;  %v7326_v31 = vrot.slane %v6699_v46, %v7072_v28 }
0x5681   :  { %641 = vrot.lane.b32.xlu1 %v638_v48, %s5892_s21  ;;  %v1826_v48 = vrot.slane %v1818_v34, %v7088_v43 }
0x5685   :  { %773 = vrot.lane.b32.xlu1 %v770_v58, %s5892_s21  ;;  %v2214_v58 = vrot.slane %v2200_v56, %v7072_v28 }
0x5687   :  { %v2222_v18 = vrot.slane %v2214_v58, %v7088_v43  ;;  %v1294_v58 = vrot.slane %v1283_v51, %v7088_v43 }
0x5689   :  { %905 = vrot.lane.b32.xlu1 %v902_v63, %s5892_s21  ;;  %v5799_v63 = vpop.eup %5798 }
0x568a   :  { %v4283_v54 = vadd.f32 1.0, %v5799_v63  ;;  %v1558_v63 = vrot.slane %v1547_v62, %v7088_v43 }
0x568c   :  { %5800 = vrcp.f32 %v4283_v54 }
0x568d   :  { %1037 = vrot.lane.b32.xlu1 %v1034_v17, %s5892_s21 }
0x5691   :  { %1169 = vrot.lane.b32.xlu1 %v1166_v23, %s5892_s21  ;;  %v352_v23 = vcombine.high %v7082_v36, %v7082_v36 }
0x5693   :  { %v366_v24 = vrot.slane %v352_v23, %v7072_v28 }
0x5695   :  { %1301 = vrot.lane.b32.xlu1 %v1298_v44, %s5892_s21  ;;  %v374_v36 = vrot.slane %v366_v24, %v7088_v43  ;;  %v7302_v24 = vrot.slane %v6597_v50, %v7072_v28 }
0x5696   :  { %v7222_v17 = vpop.eup %5800 }
0x5699   :  { %1433 = vrot.lane.b32.xlu1 %v1430_v5, %s5892_s21  ;;  %v623_v5 = vrot.slane %v7097_v4, %v7072_v28  ;;  %v887_v4 = vrot.slane %v7115_v1, %v7072_v28  ;;  %v1151_v1 = vrot.slane %v7133_v57, %v7072_v28  ;;  %v1415_v57 = vrot.slane %v7151_v13, %v7072_v28 }
0x569a   :  { %v1679_v13 = vrot.slane %v7169_v33, %v7072_v28  ;;  %v1943_v33 = vrot.slane %v7187_v6, %v7072_v28  ;;  %v2207_v6 = vrot.slane %v7205_v40, %v7072_v28  ;;  %v7315_v40 = vrot.slane %v6665_v7, %v7072_v28 }
0x569b   :  { %v898_v3 = vrot.slane %v887_v4, %v7088_v43  ;;  %v1162_v56 = vrot.slane %v1151_v1, %v7088_v43 }
0x569c   :  { %v1690_v11 = vrot.slane %v1679_v13, %v7088_v43  ;;  %v2218_v50 = vrot.slane %v2207_v6, %v7088_v43 }
0x569d   :  { %1565 = vrot.lane.b32.xlu1 %v1562_v10, %s5892_s21  ;;  %v634_v10 = vrot.slane %v623_v5, %v7088_v43 }
0x56a1   :  { %1697 = vrot.lane.b32.xlu1 %v1694_v16, %s5892_s21 }
0x56a5   :  { %1829 = vrot.lane.b32.xlu1 %v1826_v48, %s5892_s21  ;;  %v1030_v48 = vrot.slane %v1019_v8, %v7088_v43 }
0x56a9   :  { %1961 = vrot.lane.b32.xlu1 %v1958_v52, %s5892_s21 }
0x56ad   :  { %2093 = vrot.lane.b32.xlu1 %v2090_v27, %s5892_s21 }
0x56b1   :  { %2225 = vrot.lane.b32.xlu1 %v2222_v18, %s5892_s21  ;;  %v1426_v18 = vrot.slane %v1415_v57, %v7088_v43 }
0x56e3   :  { %v4290_v26 = vpop.permute.xlu1 %4289 }
0x56e4   :  { %v4292_v55 = vmul.f32 %v7222_v17, %v4290_v26 }
0x56e6   :  { %4294 = vrot.lane.b32.xlu0 %v4292_v55, %s5892_s21  ;;  %v1954_v55 = vrot.slane %v1943_v33, %v7088_v43 }
0x56e7   :  { %v243_v20 = vpop.permute.xlu1 %242 }
0x56e8   :  { %249 = vst.msk [vmem:[#allocation6] sm:$0x1] %vm248_vm4, %v243_v20 }
0x56ea   :  { %244 = vrot.lane.b32.xlu0 %v241_v32, %s5892_s21  ;;  %v2086_v32 = vrot.slane %v2075_v2, %v7088_v43 }
0x56eb   :  { %v376_v44 = vpop.permute.xlu1 %375 }
0x56ec   :  { %381 = vst.msk [vmem:[#allocation6 + $0x1] sm:$0x1] %vm248_vm4, %v376_v44  ;;  %v2339_v44 = vrot.slane %v7302_v24, %v7072_v28 }
0x56ee   :  { %377 = vrot.lane.b32.xlu0 %v374_v36, %s5892_s21  ;;  %v2471_v36 = vrot.slane %v7311_v29, %v7072_v28  ;;  %v2350_v5 = vrot.slane %v2339_v44, %v7088_v43 }
0x56ef   :  { %v510_v42 = vpop.permute.xlu1 %509 }
0x56f0   :  { %514 = vst.msk [vmem:[#allocation6 + $0x22] sm:$0x1] %vm248_vm4, %v510_v42  ;;  %v2596_v42 = vcombine.high %v7315_v40, %v7315_v40  ;;  %v2482_v38 = vrot.slane %v2471_v36, %v7088_v43 }
0x56f2   :  { %507 = vrot.lane.b32.xlu0 %v502_v59, %s5892_s21  ;;  %v2610_v7 = vrot.slane %v2596_v42, %v7072_v28  ;;  %v2728_v59 = vcombine.high %v7326_v31, %v7326_v31 }
0x56f3   :  { %v642_v35 = vpop.permute.xlu1 %641 }
0x56f4   :  { %646 = vst.msk [vmem:[#allocation6 + $0x23] sm:$0x1] %vm248_vm4, %v642_v35  ;;  %v7335_v35 = vrot.slane %v6733_v25, %v7072_v28  ;;  %v2742_v46 = vrot.slane %v2728_v59, %v7072_v28  ;;  %v2618_v4 = vrot.slane %v2610_v7, %v7088_v43  ;;  %v2464_v7 = vcombine.high %v7311_v29, %v7311_v29 }
0x56f6   :  { %639 = vrot.lane.b32.xlu0 %v634_v10, %s5892_s21  ;;  %v2860_v10 = vcombine.high %v7335_v35, %v7335_v35  ;;  %v2750_v8 = vrot.slane %v2742_v46, %v7088_v43 }
0x56f7   :  { %v774_v34 = vpop.permute.xlu1 %773 }
0x56f8   :  { %778 = vst.msk [vmem:[#allocation6 + $0x24] sm:$0x1] %vm248_vm4, %v774_v34  ;;  %v7344_v34 = vrot.slane %v6767_v9, %v7072_v28  ;;  %v2874_v25 = vrot.slane %v2860_v10, %v7072_v28 }
0x56fa   :  { %771 = vrot.lane.b32.xlu0 %v766_v60, %s5892_s21  ;;  %v2992_v60 = vcombine.high %v7344_v34, %v7344_v34  ;;  %v2882_v1 = vrot.slane %v2874_v25, %v7088_v43 }
0x56fb   :  { %v906_v16 = vpop.permute.xlu1 %905 }
0x56fc   :  { %910 = vst.msk [vmem:[#allocation6 + $0x25] sm:$0x1] %vm248_vm4, %v906_v16  ;;  %v7353_v16 = vrot.slane %v6801_v49, %v7072_v28  ;;  %v3006_v9 = vrot.slane %v2992_v60, %v7072_v28  ;;  %v2735_v60 = vrot.slane %v7326_v31, %v7072_v28  ;;  %v2999_v31 = vrot.slane %v7344_v34, %v7072_v28 }
0x56fe   :  { %903 = vrot.lane.b32.xlu0 %v898_v3, %s5892_s21  ;;  %v3124_v3 = vcombine.high %v7353_v16, %v7353_v16  ;;  %v3014_v51 = vrot.slane %v3006_v9, %v7088_v43 }
0x56ff   :  { %v1038_v30 = vpop.permute.xlu1 %1037 }
0x5700   :  { %1042 = vst.msk [vmem:[#allocation6 + $0x26] sm:$0x1] %vm248_vm4, %v1038_v30  ;;  %v7362_v30 = vrot.slane %v6835_v37, %v7072_v28  ;;  %v3138_v49 = vrot.slane %v3124_v3, %v7072_v28 }
0x5702   :  { %1035 = vrot.lane.b32.xlu0 %v1030_v48, %s5892_s21  ;;  %v3256_v48 = vcombine.high %v7362_v30, %v7362_v30  ;;  %v3146_v57 = vrot.slane %v3138_v49, %v7088_v43  ;;  %v3263_v34 = vrot.slane %v7362_v30, %v7072_v28 }
0x5703   :  { %v1170_v41 = vpop.permute.xlu1 %1169 }
0x5704   :  { %1174 = vst.msk [vmem:[#allocation6 + $0x27] sm:$0x1] %vm248_vm4, %v1170_v41  ;;  %v7371_v41 = vrot.slane %v6869_v21, %v7072_v28  ;;  %v3270_v37 = vrot.slane %v3256_v48, %v7072_v28 }
0x5706   :  { %1167 = vrot.lane.b32.xlu0 %v1162_v56, %s5892_s21  ;;  %v3388_v56 = vcombine.high %v7371_v41, %v7371_v41  ;;  %v3278_v62 = vrot.slane %v3270_v37, %v7088_v43  ;;  %v3010_v37 = vrot.slane %v2999_v31, %v7088_v43 }
0x5707   :  { %v1302_v52 = vpop.permute.xlu1 %1301 }
0x5708   :  { %1306 = vst.msk [vmem:[#allocation6 + $0x28] sm:$0x1] %vm248_vm4, %v1302_v52  ;;  %v7380_v52 = vrot.slane %v6903_v0, %v7072_v28  ;;  %v3402_v21 = vrot.slane %v3388_v56, %v7072_v28 }
0x570a   :  { %1299 = vrot.lane.b32.xlu0 %v1294_v58, %s5892_s21  ;;  %v3520_v58 = vcombine.high %v7380_v52, %v7380_v52  ;;  %v3410_v13 = vrot.slane %v3402_v21, %v7088_v43  ;;  %v3527_v30 = vrot.slane %v7380_v52, %v7072_v28 }
0x570b   :  { %v1434_v27 = vpop.permute.xlu1 %1433 }
0x570c   :  { %1438 = vst.msk [vmem:[#allocation6 + $0x29] sm:$0x1] %vm248_vm4, %v1434_v27  ;;  %v7389_v27 = vrot.slane %v6937_v53, %v7072_v28  ;;  %v3534_v0 = vrot.slane %v3520_v58, %v7072_v28  ;;  %v3274_v58 = vrot.slane %v3263_v34, %v7088_v43 }
0x570e   :  { %1431 = vrot.lane.b32.xlu0 %v1426_v18, %s5892_s21  ;;  %v3652_v18 = vcombine.high %v7389_v27, %v7389_v27  ;;  %v3542_v22 = vrot.slane %v3534_v0, %v7088_v43 }
0x570f   :  { %v1566_v61 = vpop.permute.xlu1 %1565 }
0x5710   :  { %1570 = vst.msk [vmem:[#allocation6 + $0x2a] sm:$0x1] %vm248_vm4, %v1566_v61  ;;  %v7398_v61 = vrot.slane %v6971_v45, %v7072_v28  ;;  %v3666_v53 = vrot.slane %v3652_v18, %v7072_v28  ;;  %v3538_v18 = vrot.slane %v3527_v30, %v7088_v43 }
0x5712   :  { %1563 = vrot.lane.b32.xlu0 %v1558_v63, %s5892_s21  ;;  %v3784_v63 = vcombine.high %v7398_v61, %v7398_v61  ;;  %v3674_v33 = vrot.slane %v3666_v53, %v7088_v43  ;;  %v3791_v52 = vrot.slane %v7398_v61, %v7072_v28 }
0x5713   :  { %v1698_v54 = vpop.permute.xlu1 %1697 }
0x5714   :  { %1702 = vst.msk [vmem:[#allocation6 + $0x2b] sm:$0x1] %vm248_vm4, %v1698_v54  ;;  %v7407_v54 = vrot.slane %v7004_v39, %v7072_v28  ;;  %v3798_v45 = vrot.slane %v3784_v63, %v7072_v28 }
0x5716   :  { %1695 = vrot.lane.b32.xlu0 %v1690_v11, %s5892_s21  ;;  %v3916_v11 = vcombine.high %v7407_v54, %v7407_v54  ;;  %v3806_v2 = vrot.slane %v3798_v45, %v7088_v43 }
0x5717   :  { %v1830_v26 = vpop.permute.xlu1 %1829 }
0x5718   :  { %1834 = vst.msk [vmem:[#allocation6 + $0x2c] sm:$0x1] %vm248_vm4, %v1830_v26  ;;  %v7416_v26 = vrot.slane %v7037_v15, %v7072_v28  ;;  %v3930_v39 = vrot.slane %v3916_v11, %v7072_v28  ;;  %v4287_v15 = vmul.f32 %v7222_v17, %v7052_v14  ;;  %v2332_v14 = vcombine.high %v7302_v24, %v7302_v24 }
0x5719   :  { %v2478_v24 = vrot.slane %v2464_v7, %v7072_v28 }
0x571a   :  { %1827 = vrot.lane.b32.xlu0 %v1822_v19, %s5892_s21  ;;  %v4048_v19 = vcombine.high %v7416_v26, %v7416_v26  ;;  %v4055_v61 = vrot.slane %v7416_v26, %v7072_v28 }
0x571b   :  { %v1962_v23 = vpop.permute.xlu1 %1961  ;;  %v2486_v29 = vrot.slane %v2478_v24, %v7088_v43 }
0x571c   :  { %1966 = vst.msk [vmem:[#allocation6 + $0x2d] sm:$0x1] %vm248_vm4, %v1962_v23  ;;  %v7425_v23 = vrot.slane %v7056_v47, %v7072_v28 }
0x571e   :  { %1959 = vrot.lane.b32.xlu0 %v1954_v55, %s5892_s21  ;;  %v4062_v55 = vrot.slane %v4048_v19, %v7072_v28 }
0x571f   :  { %v2094_v20 = vpop.permute.xlu1 %2093 }
0x5720   :  { %2098 = vst.msk [vmem:[#allocation6 + $0x2e] sm:$0x1] %vm248_vm4, %v2094_v20  ;;  %v4180_v20 = vcombine.high %v7425_v23, %v7425_v23 }
0x5722   :  { %2091 = vrot.lane.b32.xlu0 %v2086_v32, %s5892_s21  ;;  %v3938_v32 = vrot.slane %v3930_v39, %v7088_v43  ;;  %v4194_v47 = vrot.slane %v4180_v20, %v7072_v28  ;;  %v4066_v39 = vrot.slane %v4055_v61, %v7088_v43 }
0x5723   :  { %v2226_v12 = vpop.permute.xlu1 %2225 }
0x5724   :  { %2230 = vst.msk [vmem:[#allocation6 + $0x2f] sm:$0x1] %vm248_vm4, %v2226_v12  ;;  %v4202_v42 = vrot.slane %v4194_v47, %v7088_v43 }
0x5726   :  { %2223 = vrot.lane.b32.xlu0 %v2218_v50, %s5892_s21  ;;  %v4070_v50 = vrot.slane %v4062_v55, %v7088_v43 }
0x572a   :  { %2355 = vrot.lane.b32.xlu0 %v2350_v5, %s5892_s21  ;;  %v2346_v5 = vrot.slane %v2332_v14, %v7072_v28 }
0x572c   :  { %v2354_v10 = vrot.slane %v2346_v5, %v7088_v43 }
0x572e   :  { %2487 = vrot.lane.b32.xlu0 %v2482_v38, %s5892_s21 }
0x5732   :  { %2621 = vrot.lane.b32.xlu0 %v2618_v4, %s5892_s21  ;;  %v2603_v4 = vrot.slane %v7315_v40, %v7072_v28  ;;  %v2867_v40 = vrot.slane %v7335_v35, %v7072_v28  ;;  %v3131_v35 = vrot.slane %v7353_v16, %v7072_v28  ;;  %v3395_v16 = vrot.slane %v7371_v41, %v7072_v28 }
0x5733   :  { %v3659_v41 = vrot.slane %v7389_v27, %v7072_v28  ;;  %v3923_v27 = vrot.slane %v7407_v54, %v7072_v28  ;;  %v4187_v54 = vrot.slane %v7425_v23, %v7072_v28 }
0x5734   :  { %v2614_v9 = vrot.slane %v2603_v4, %v7088_v43  ;;  %v2878_v48 = vrot.slane %v2867_v40, %v7088_v43 }
0x5735   :  { %v3670_v53 = vrot.slane %v3659_v41, %v7088_v43  ;;  %v3934_v11 = vrot.slane %v3923_v27, %v7088_v43 }
0x5736   :  { %2753 = vrot.lane.b32.xlu0 %v2750_v8, %s5892_s21 }
0x573a   :  { %2885 = vrot.lane.b32.xlu0 %v2882_v1, %s5892_s21  ;;  %v2746_v1 = vrot.slane %v2735_v60, %v7088_v43 }
0x573e   :  { %3017 = vrot.lane.b32.xlu0 %v3014_v51, %s5892_s21 }
0x5742   :  { %3149 = vrot.lane.b32.xlu0 %v3146_v57, %s5892_s21  ;;  %v3142_v57 = vrot.slane %v3131_v35, %v7088_v43 }
0x5746   :  { %3281 = vrot.lane.b32.xlu0 %v3278_v62, %s5892_s21  ;;  %v3406_v62 = vrot.slane %v3395_v16, %v7088_v43 }
0x574a   :  { %3413 = vrot.lane.b32.xlu0 %v3410_v13, %s5892_s21 }
0x574e   :  { %3545 = vrot.lane.b32.xlu0 %v3542_v22, %s5892_s21  ;;  %v3802_v22 = vrot.slane %v3791_v52, %v7088_v43 }
0x5752   :  { %3677 = vrot.lane.b32.xlu0 %v3674_v33, %s5892_s21 }
0x5756   :  { %3809 = vrot.lane.b32.xlu0 %v3806_v2, %s5892_s21  ;;  %v4198_v2 = vrot.slane %v4187_v54, %v7088_v43 }
0x5758   :  { %v4295_v6 = vpop.permute.xlu0 %4294 }
0x5759   :  { %v7435_v12 = vadd.f32 %v4295_v6, %v4287_v15 }
0x575a   :  { %3941 = vrot.lane.b32.xlu0 %v3938_v32, %s5892_s21 }
0x575b   :  { %5802 = vtanh.f32 %v7435_v12 }
0x575c   :  { %v245_v44 = vpop.permute.xlu0 %244 }
0x575d   :  { %250 = vst.msk [vmem:[#allocation6 + $0x20] sm:$0x1] %vm248_vm4, %v245_v44 }
0x575e   :  { %4073 = vrot.lane.b32.xlu0 %v4070_v50, %s5892_s21 }
0x5760   :  { %v378_v36 = vpop.permute.xlu0 %377 }
0x5761   :  { %382 = vst.msk [vmem:[#allocation6 + $0x21] sm:$0x1] %vm248_vm4, %v378_v36 }
0x5762   :  { %4205 = vrot.lane.b32.xlu0 %v4202_v42, %s5892_s21 }
0x5764   :  { %v508_v59 = vpop.permute.xlu0 %507 }
0x5765   :  { %v5803_v38 = vpop.eup %5802  ;;  %513 = vst.msk [vmem:[#allocation6 + $0x2] sm:$0x1] %vm248_vm4, %v508_v59 }
0x5766   :  { %4300 = vrot.lane.b32.xlu1 %v5803_v38, %s5891_s20  ;;  %s5895_s20 = smov [#allocation8]  }
0x5768   :  { %v640_v46 = vpop.permute.xlu0 %639 }
0x5769   :  { %645 = vst.msk [vmem:[#allocation6 + $0x3] sm:$0x1] %vm248_vm4, %v640_v46 }
0x576a   :  { %2357 = vrot.lane.b32.xlu1 %v2354_v10, %s5892_s21 }
0x576c   :  { %v772_v25 = vpop.permute.xlu0 %771 }
0x576d   :  { %777 = vst.msk [vmem:[#allocation6 + $0x4] sm:$0x1] %vm248_vm4, %v772_v25 }
0x576e   :  { %2489 = vrot.lane.b32.xlu1 %v2486_v29, %s5892_s21 }
0x5770   :  { %v904_v8 = vpop.permute.xlu0 %903 }
0x5771   :  { %909 = vst.msk [vmem:[#allocation6 + $0x5] sm:$0x1] %vm248_vm4, %v904_v8 }
0x5772   :  { %2619 = vrot.lane.b32.xlu1 %v2614_v9, %s5892_s21 }
0x5774   :  { %v1036_v3 = vpop.permute.xlu0 %1035 }
0x5775   :  { %1041 = vst.msk [vmem:[#allocation6 + $0x6] sm:$0x1] %vm248_vm4, %v1036_v3 }
0x5776   :  { %2751 = vrot.lane.b32.xlu1 %v2746_v1, %s5892_s21 }
0x5778   :  { %v1168_v49 = vpop.permute.xlu0 %1167 }
0x5779   :  { %1173 = vst.msk [vmem:[#allocation6 + $0x7] sm:$0x1] %vm248_vm4, %v1168_v49 }
0x577a   :  { %2883 = vrot.lane.b32.xlu1 %v2878_v48, %s5892_s21 }
0x577c   :  { %v1300_v51 = vpop.permute.xlu0 %1299 }
0x577d   :  { %1305 = vst.msk [vmem:[#allocation6 + $0x8] sm:$0x1] %vm248_vm4, %v1300_v51 }
0x577e   :  { %3015 = vrot.lane.b32.xlu1 %v3010_v37, %s5892_s21 }
0x5780   :  { %v1432_v56 = vpop.permute.xlu0 %1431 }
0x5781   :  { %1437 = vst.msk [vmem:[#allocation6 + $0x9] sm:$0x1] %vm248_vm4, %v1432_v56 }
0x5782   :  { %3147 = vrot.lane.b32.xlu1 %v3142_v57, %s5892_s21 }
0x5784   :  { %v1564_v21 = vpop.permute.xlu0 %1563 }
0x5785   :  { %1569 = vst.msk [vmem:[#allocation6 + $0xa] sm:$0x1] %vm248_vm4, %v1564_v21 }
0x5786   :  { %3279 = vrot.lane.b32.xlu1 %v3274_v58, %s5892_s21 }
0x5788   :  { %v1696_v0 = vpop.permute.xlu0 %1695 }
0x5789   :  { %1701 = vst.msk [vmem:[#allocation6 + $0xb] sm:$0x1] %vm248_vm4, %v1696_v0 }
0x578a   :  { %3411 = vrot.lane.b32.xlu1 %v3406_v62, %s5892_s21 }
0x578c   :  { %v1828_v13 = vpop.permute.xlu0 %1827 }
0x578d   :  { %1833 = vst.msk [vmem:[#allocation6 + $0xc] sm:$0x1] %vm248_vm4, %v1828_v13 }
0x578e   :  { %3543 = vrot.lane.b32.xlu1 %v3538_v18, %s5892_s21 }
0x5790   :  { %v1960_v63 = vpop.permute.xlu0 %1959 }
0x5791   :  { %1965 = vst.msk [vmem:[#allocation6 + $0xd] sm:$0x1] %vm248_vm4, %v1960_v63 }
0x5792   :  { %3675 = vrot.lane.b32.xlu1 %v3670_v53, %s5892_s21 }
0x5794   :  { %v2092_v45 = vpop.permute.xlu0 %2091 }
0x5795   :  { %2097 = vst.msk [vmem:[#allocation6 + $0xe] sm:$0x1] %vm248_vm4, %v2092_v45 }
0x5796   :  { %3807 = vrot.lane.b32.xlu1 %v3802_v22, %s5892_s21 }
0x5798   :  { %v2224_v33 = vpop.permute.xlu0 %2223 }
0x5799   :  { %2229 = vst.msk [vmem:[#allocation6 + $0xf] sm:$0x1] %vm248_vm4, %v2224_v33 }
0x579a   :  { %3939 = vrot.lane.b32.xlu1 %v3934_v11, %s5892_s21 }
0x579c   :  { %v2356_v19 = vpop.permute.xlu0 %2355 }
0x579d   :  { %2361 = vst.msk [vmem:[#allocation6 + $0x10] sm:$0x1] %vm248_vm4, %v2356_v19 }
0x579e   :  { %4071 = vrot.lane.b32.xlu1 %v4066_v39, %s5892_s21 }
0x57a0   :  { %v2488_v15 = vpop.permute.xlu0 %2487 }
0x57a1   :  { %2493 = vst.msk [vmem:[#allocation6 + $0x11] sm:$0x1] %vm248_vm4, %v2488_v15 }
0x57a2   :  { %4203 = vrot.lane.b32.xlu1 %v4198_v2, %s5892_s21 }
0x57a4   :  { %v2622_v26 = vpop.permute.xlu0 %2621 }
0x57a5   :  { %2626 = vst.msk [vmem:[#allocation6 + $0x32] sm:$0x1] %vm248_vm4, %v2622_v26 }
0x57a8   :  { %v2754_v55 = vpop.permute.xlu0 %2753 }
0x57a9   :  { %2758 = vst.msk [vmem:[#allocation6 + $0x33] sm:$0x1] %vm248_vm4, %v2754_v55 }
0x57ac   :  { %v2886_v20 = vpop.permute.xlu0 %2885 }
0x57ad   :  { %2890 = vst.msk [vmem:[#allocation6 + $0x34] sm:$0x1] %vm248_vm4, %v2886_v20 }
0x57b0   :  { %v3018_v23 = vpop.permute.xlu0 %3017 }
0x57b1   :  { %3022 = vst.msk [vmem:[#allocation6 + $0x35] sm:$0x1] %vm248_vm4, %v3018_v23 }
0x57b4   :  { %v3150_v6 = vpop.permute.xlu0 %3149 }
0x57b5   :  { %3154 = vst.msk [vmem:[#allocation6 + $0x36] sm:$0x1] %vm248_vm4, %v3150_v6 }
0x57b8   :  { %v3282_v32 = vpop.permute.xlu0 %3281 }
0x57b9   :  { %3286 = vst.msk [vmem:[#allocation6 + $0x37] sm:$0x1] %vm248_vm4, %v3282_v32 }
0x57bc   :  { %v3414_v47 = vpop.permute.xlu0 %3413 }
0x57bd   :  { %3418 = vst.msk [vmem:[#allocation6 + $0x38] sm:$0x1] %vm248_vm4, %v3414_v47 }
0x57c0   :  { %v3546_v44 = vpop.permute.xlu0 %3545 }
0x57c1   :  { %3550 = vst.msk [vmem:[#allocation6 + $0x39] sm:$0x1] %vm248_vm4, %v3546_v44 }
0x57c4   :  { %v3678_v50 = vpop.permute.xlu0 %3677 }
0x57c5   :  { %3682 = vst.msk [vmem:[#allocation6 + $0x3a] sm:$0x1] %vm248_vm4, %v3678_v50 }
0x57c8   :  { %v3810_v14 = vpop.permute.xlu0 %3809 }
0x57c9   :  { %3814 = vst.msk [vmem:[#allocation6 + $0x3b] sm:$0x1] %vm248_vm4, %v3810_v14 }
0x57cc   :  { %v3942_v36 = vpop.permute.xlu0 %3941 }
0x57cd   :  { %3946 = vst.msk [vmem:[#allocation6 + $0x3c] sm:$0x1] %vm248_vm4, %v3942_v36 }
0x57d0   :  { %v4074_v42 = vpop.permute.xlu0 %4073 }
0x57d1   :  { %4078 = vst.msk [vmem:[#allocation6 + $0x3d] sm:$0x1] %vm248_vm4, %v4074_v42 }
0x57d4   :  { %v4206_v5 = vpop.permute.xlu0 %4205 }
0x57d5   :  { %4210 = vst.msk [vmem:[#allocation6 + $0x3e] sm:$0x1] %vm248_vm4, %v4206_v5 }
0x57d8   :  { %v4301_v7 = vpop.permute.xlu1 %4300 }
0x57d9   :  { %v4303_v59 = vmul.f32 %v7222_v17, %v4301_v7 }
0x57db   :  { %v4311_v38 = vrot.slane %v4303_v59, %v7072_v28  ;;  %4343 = vrot.lane.b32.xlu0 %v4303_v59, %s5892_s21 }
0x57dc   :  { %v2358_v24 = vpop.permute.xlu1 %2357 }
0x57dd   :  { %v4312_v46 = vcombine.high %v4311_v38, %v4311_v38  ;;  %v4319_v10 = vrot.slane %v4311_v38, %v7072_v28  ;;  %2362 = vst.msk [vmem:[#allocation6 + $0x30] sm:$0x1] %vm248_vm4, %v2358_v24 }
0x57df   :  { %v4326_v4 = vrot.slane %v4312_v46, %v7072_v28  ;;  %v4330_v25 = vrot.slane %v4319_v10, %v7088_v43 }
0x57e0   :  { %v2490_v29 = vpop.permute.xlu1 %2489 }
0x57e1   :  { %2494 = vst.msk [vmem:[#allocation6 + $0x31] sm:$0x1] %vm248_vm4, %v2490_v29  ;;  %4335 = vrot.lane.b32.xlu1 %v4330_v25, %s5892_s21  ;;  %v4334_v17 = vrot.slane %v4326_v4, %v7088_v43 }
0x57e3   :  { %4337 = vrot.lane.b32.xlu0 %v4334_v17, %s5892_s21  ;;  %s4376_s21 = sshll.u32 %s5895_s20, 4  ;;  %s4377_s21 = int_to_ptr.vmem [resolvable:$true] %s4376_s21 }
0x57e4   :  { %v2620_v60 = vpop.permute.xlu1 %2619  ;;  %s5816_s18 = scalar_lea.vmem %s4377_s21, 32  ;;  %p5821_p6 = scmp.lt.s32.totalorder %s4377_s21, %s4377_s21 }
0x57e5   :  { %2625 = vst.msk [vmem:[#allocation6 + $0x12] sm:$0x1] %vm248_vm4, %v2620_v60  ;;  %4349 = vrot.lane.b32.xlu1 %v7435_v12, %s5894_s1  ;;  %p5817_p5 = scmp.ne.s32.totalorder %s4377_s21, %s5816_s18  ;;  %p5822_p7 = scmp.lt.s32.totalorder %s5816_s18, %s5816_s18 }
0x57e7   :  { %p5823_p8 = por %p5822_p7, %p5821_p6 }
0x57e8   :  { %v2752_v8 = vpop.permute.xlu1 %2751 }
0x57e9   :  { %2757 = vst.msk [vmem:[#allocation6 + $0x13] sm:$0x1] %vm248_vm4, %v2752_v8  ;;  %p5824_p9 = pnand %p5823_p8, %p5817_p5 }
0x57ec   :  { %v2884_v28 = vpop.permute.xlu1 %2883 }
0x57ed   :  { %2889 = vst.msk [vmem:[#allocation6 + $0x14] sm:$0x1] %vm248_vm4, %v2884_v28 }
0x57f0   :  { %v3016_v9 = vpop.permute.xlu1 %3015 }
0x57f1   :  { %3021 = vst.msk [vmem:[#allocation6 + $0x15] sm:$0x1] %vm248_vm4, %v3016_v9 }
0x57f4   :  { %v3148_v40 = vpop.permute.xlu1 %3147 }
0x57f5   :  { %3153 = vst.msk [vmem:[#allocation6 + $0x16] sm:$0x1] %vm248_vm4, %v3148_v40 }
0x57f8   :  { %v3280_v43 = vpop.permute.xlu1 %3279 }
0x57f9   :  { %3285 = vst.msk [vmem:[#allocation6 + $0x17] sm:$0x1] %vm248_vm4, %v3280_v43 }
0x57fc   :  { %v3412_v3 = vpop.permute.xlu1 %3411 }
0x57fd   :  { %3417 = vst.msk [vmem:[#allocation6 + $0x18] sm:$0x1] %vm248_vm4, %v3412_v3 }
0x5800   :  { %v3544_v1 = vpop.permute.xlu1 %3543 }
0x5801   :  { %3549 = vst.msk [vmem:[#allocation6 + $0x19] sm:$0x1] %vm248_vm4, %v3544_v1 }
0x5804   :  { %v3676_v12 = vpop.permute.xlu1 %3675 }
0x5805   :  { %3681 = vst.msk [vmem:[#allocation6 + $0x1a] sm:$0x1] %vm248_vm4, %v3676_v12 }
0x5808   :  { %v3808_v31 = vpop.permute.xlu1 %3807 }
0x5809   :  { %3813 = vst.msk [vmem:[#allocation6 + $0x1b] sm:$0x1] %vm248_vm4, %v3808_v31 }
0x580c   :  { %v3940_v49 = vpop.permute.xlu1 %3939 }
0x580d   :  { %3945 = vst.msk [vmem:[#allocation6 + $0x1c] sm:$0x1] %vm248_vm4, %v3940_v49 }
0x5810   :  { %v4072_v48 = vpop.permute.xlu1 %4071 }
0x5811   :  { %4077 = vst.msk [vmem:[#allocation6 + $0x1d] sm:$0x1] %vm248_vm4, %v4072_v48 }
0x5814   :  { %v4204_v35 = vpop.permute.xlu1 %4203 }
0x5815   :  { %4209 = vst.msk [vmem:[#allocation6 + $0x1e] sm:$0x1] %vm248_vm4, %v4204_v35 }
0x584d   :  { %v4344_v51 = vpop.permute.xlu0 %4343 }
0x584e   :  { %4347 = vst.msk [vmem:[#allocation2] sm:$0x3] %vm28_vm1, %v4344_v51  ;;  %4356 = vst.msk [vmem:[#allocation8] sm:$0x3] %vm28_vm1, %v4344_v51 }
0x584f   :  { %5827 = shalt.err (!%p5824_p9)
}
0x5850   :  { %s5828_s23 = scalar_lea.hbm %s7616_s4, 32 }
0x5851   :  { %p5829_p10 = scmp.ne.s32.totalorder %s7616_s4, %s5828_s23  ;;  %p5832_p11 = scmp.lt.u32.totalorder %s5828_s23, %s7616_s4 }
0x5853   :  { %p5834_p12 = pnand %p5832_p11, %p5829_p10 }
0x5855   :  { %5837 = shalt.err (!%p5834_p12)
}
0x5856   :  { %4379 = dma.vmem_to_hbm [thread:$0]  %s4377_s21, 32, %s7616_s4, [#allocation9]   ;;  %v4336_v37 = vpop.permute.xlu1 %4335  ;;  %v4338_v34 = vpop.permute.xlu0 %4337 }
0x5857   :  { %s5896_s29 = smov [#allocation6]   ;;  %s5897_s6 = smov [#allocation10]   ;;  %4341 = vst.msk [vmem:[#allocation6 + $0x1f] sm:$0x1] %vm248_vm4, %v4336_v37  ;;  %4342 = vst.msk [vmem:[#allocation6 + $0x3f] sm:$0x1] %vm248_vm4, %v4338_v34 }
0x5858   :  { %s4363_s30 = sshll.u32 %s5896_s29, 4  ;;  %s4386_s7 = sshll.u32 %s5897_s6, 4  ;;  %s4364_s30 = int_to_ptr.vmem [resolvable:$true] %s4363_s30  ;;  %s7579_s7 = int_to_ptr.vmem [resolvable:$true] %s4386_s7 }
0x5859   :  { %s5838_s8 = scalar_lea.vmem %s4364_s30, 1024  ;;  %p5843_p0 = scmp.lt.s32.totalorder %s4364_s30, %s4364_s30 }
0x585a   :  { %v4350_v56 = vpop.permute.xlu1 %4349  ;;  %p5839_p13 = scmp.ne.s32.totalorder %s4364_s30, %s5838_s8  ;;  %p5844_p1 = scmp.lt.s32.totalorder %s5838_s8, %s5838_s8 }
0x585c   :  { %p5845_p2 = por %p5844_p1, %p5843_p0 }
0x585e   :  { %p5846_p3 = pnand %p5845_p2, %p5839_p13 }
0x5860   :  { %5849 = shalt.err (!%p5846_p3)
}
0x5861   :  { %s5850_s10 = scalar_lea.hbm %s7615_s3, 1024 }
0x5862   :  { %p5851_p4 = scmp.ne.s32.totalorder %s7615_s3, %s5850_s10  ;;  %p5854_p5 = scmp.lt.u32.totalorder %s5850_s10, %s7615_s3 }
0x5864   :  { %p5856_p6 = pnand %p5854_p5, %p5851_p4 }
0x5866   :  { %5859 = shalt.err (!%p5856_p6)
}
0x5867   :  { %s5898_s14 = smov 128   ;;  %s5899_s15 = smov 8   ;;  %4352 = vst.msk [vmem:[#allocation3] sm:$0x3] %vm28_vm1, %v4350_v56  ;;  %4357 = vst.msk [vmem:[#allocation10] sm:$0x3] %vm28_vm1, %v4350_v56 }
0x5868   :  { %4369 = dma.vmem_to_hbm [thread:$0]  %s4364_s30, 1024, %s7615_s3, [#allocation7], %s5898_s14, %s5898_s14, %s5899_s15  }
0x5869   :  { %s5860_s1 = scalar_lea.vmem %s7579_s7, 32  ;;  %p5865_p8 = scmp.lt.s32.totalorder %s7579_s7, %s7579_s7 }
0x586a   :  { %p5861_p7 = scmp.ne.s32.totalorder %s7579_s7, %s5860_s1  ;;  %p5866_p9 = scmp.lt.s32.totalorder %s5860_s1, %s5860_s1 }
0x586c   :  { %p5867_p10 = por %p5866_p9, %p5865_p8 }
0x586e   :  { %p5868_p11 = pnand %p5867_p10, %p5861_p7 }
0x5870   :  { %5871 = shalt.err (!%p5868_p11)
}
0x5871   :  { %s5872_s18 = scalar_lea.hbm %s7617_s5, 32 }
0x5872   :  { %p5873_p12 = scmp.ne.s32.totalorder %s7617_s5, %s5872_s18  ;;  %p5876_p13 = scmp.lt.u32.totalorder %s5872_s18, %s7617_s5 }
0x5874   :  { %p5878_p0 = pnand %p5876_p13, %p5873_p12 }
0x5876   :  { %5881 = shalt.err (!%p5878_p0)
}
0x5877   :  { %4389 = dma.vmem_to_hbm [thread:$0]  %s7579_s7, 32, %s7617_s5, [#allocation9]  }
0x5878   :  { %5884 = dma.done.wait [#allocation7], 1024  }
0x5879   :  { %5885 = vsyncadd [#allocation7], 4294966272 }
0x587a   :  { %5886 = dma.done.wait [#allocation9], 64  }
0x587b   :  { %5887 = vsyncadd [#allocation9], 4294967232 }
0x587c   :  { %4399 = vsyncpa [#allocation7], 1 }
0x587d   :  { %4400 = vsyncpa [#allocation9], 1 }

</bundles_post_ra>
